<compile_context>
chip_gen: v7x
topology: tpu7x:2x2x1
jax: 0.10.0
libtpu: 0.0.40
codegen_flags: <defaults>
</compile_context>

<pallas_src>
import functools

import jax
import jax.numpy as jnp
from jax import lax
from jax.experimental import pallas as pl
from jax.experimental.pallas import tpu as pltpu


# ---------------------------------------------------------------------------
# Single fused kernel: all LSTM layers + fc1 + relu + fc2 + sigmoid.
# ---------------------------------------------------------------------------
def _fused_forward_kernel(*refs, num_layers, hidden_size, seq_len, unroll):
    L = num_layers
    H = hidden_size
    T = seq_len

    x_ref = refs[0]
    layer_refs = [tuple(refs[1 + 3 * l: 4 + 3 * l]) for l in range(L)]
    (h0_ref, c0_ref, b1_ref, w2_ref, b2_ref, w1_hbm_ref) = refs[1 + 3 * L: 7 + 3 * L]
    out_ref = refs[7 + 3 * L]
    xp_ref, seq_ref, w1_vmem_ref, w1_sem = refs[8 + 3 * L: 12 + 3 * L]

    F = b1_ref.shape[1]

    # Kick off the fc1-weight fetch immediately: the ~2 MiB bf16 DMA overlaps
    # the (serial, latency-bound) recurrence of the earlier layers.
    w1_copy = pltpu.make_async_copy(w1_hbm_ref, w1_vmem_ref, w1_sem)
    w1_copy.start()

    def lstm_cell(t, h, c, whh):
        # gates: (1, 4H) in PyTorch order [i | f | g | o]
        gates = xp_ref[pl.ds(t, 1), :] + jnp.dot(
            h, whh, preferred_element_type=jnp.float32)
        # One full-vreg EUP pass each for sigmoid/tanh, then per-gate lane
        # slices (cheaper than four quarter-vreg transcendentals).
        sg = jax.nn.sigmoid(gates)
        th = jnp.tanh(gates)
        i_g = sg[:, 0 * H:1 * H]
        f_g = sg[:, 1 * H:2 * H]
        o_g = sg[:, 3 * H:4 * H]
        g_g = th[:, 2 * H:3 * H]
        c_new = f_g * c + i_g * g_g
        h_new = o_g * jnp.tanh(c_new)
        return h_new, c_new

    def run_unrolled(body, carry):
        blocks = T // unroll

        def outer(i, carry):
            base = i * unroll
            for j in range(unroll):            # trace-time unroll by `unroll`
                carry = body(base + j, carry)
            return carry

        carry = lax.fori_loop(0, blocks, outer, carry)
        for t in range(blocks * unroll, T):    # static remainder (empty: 250 = 25*10)
            carry = body(t, carry)
        return carry

    # ---- layers 0 .. L-2: recurrence, hidden states staged in VMEM ---------
    for l in range(L - 1):
        wih_ref, whh_ref, b_ref = layer_refs[l]
        src_ref = x_ref if l == 0 else seq_ref
        # One big MXU matmul for the input projection of every timestep.
        xp_ref[...] = jnp.dot(src_ref[...], wih_ref[...],
                              preferred_element_type=jnp.float32) + b_ref[...]
        whh = whh_ref[...]                      # hoist loop-invariant load
        h = h0_ref[l:l + 1, :]
        c = c0_ref[l:l + 1, :]

        def body(t, carry, whh=whh):
            h, c = carry
            h, c = lstm_cell(t, h, c, whh)
            seq_ref[pl.ds(t, 1), :] = h         # VMEM staging for the next layer
            return (h, c)

        run_unrolled(body, (h, c))

    # ---- last layer: fc1 (flatten + matmul) fused into the recurrence ------
    wih_ref, whh_ref, b_ref = layer_refs[L - 1]
    src_ref = x_ref if L == 1 else seq_ref
    xp_ref[...] = jnp.dot(src_ref[...], wih_ref[...],
                          preferred_element_type=jnp.float32) + b_ref[...]

    # fc1 weights must be resident before the fused accumulation starts.
    w1_copy.wait()

    whh = whh_ref[...]
    h = h0_ref[L - 1:L, :]
    c = c0_ref[L - 1:L, :]
    acc0 = jnp.zeros((1, F), jnp.float32)

    def body_last(t, carry):
        h, c, acc = carry
        h, c = lstm_cell(t, h, c, whh)
        # fc1 is flat(lstm_out) @ W1 = sum_t h_t @ W1[t]; accumulate per step so
        # lstm_out is never materialized, flattened, or stored.
        acc = acc + jnp.dot(h.astype(jnp.bfloat16), w1_vmem_ref[t],
                            preferred_element_type=jnp.float32)
        return (h, c, acc)

    _, _, acc = run_unrolled(body_last, (h, c, acc0))

    # ---- MLP head tail: + b1 -> relu -> fc2 -> sigmoid ----------------------
    hidden = jnp.maximum(acc + b1_ref[...], 0.0)
    y = jnp.dot(hidden, w2_ref[...],
                preferred_element_type=jnp.float32) + b2_ref[...]
    out_ref[...] = jax.nn.sigmoid(y)


# ---------------------------------------------------------------------------
# Wrapper: builds the single fused pallas_call.
# ---------------------------------------------------------------------------
def my_neural_net_forward(x, params, h0, c0, *, hidden_size, num_layers):
    T = 250  # hard-coded by x.view(1, 250, -1) in the PyTorch forward
    H = hidden_size
    L = num_layers
    seq = x.reshape(T, -1).astype(jnp.float32)          # (250, input_size)
    in0 = seq.shape[1]

    w1_r, b1, w2, b2 = params["fc"]                      # w1_r: (T, H, F) bf16
    F = b1.shape[1]
    O = b2.shape[1]

    flat_w = []
    for (wih, whh, b) in params["lstm"]:
        flat_w += [wih, whh, b]

    h0_2d = h0.reshape(L, H).astype(jnp.float32)
    c0_2d = c0.reshape(L, H).astype(jnp.float32)

    operands = [seq, *flat_w, h0_2d, c0_2d, b1, w2, b2, w1_r]

    # Advisory cost estimate for the XLA scheduler.
    flops = 0
    in_f = in0
    for _ in range(L):
        flops += 2 * T * in_f * 4 * H + 2 * T * H * 4 * H
        in_f = H
    flops += 2 * T * H * F + 2 * F * O
    transcendentals = L * T * (4 * H + 4 * H + H)
    bytes_accessed = int(sum(int(a.size) * a.dtype.itemsize for a in operands)) + 4 * O

    vmem = pl.BlockSpec(memory_space=pltpu.MemorySpace.VMEM)
    in_specs = [vmem] * (len(operands) - 1) + [pl.BlockSpec(memory_space=pl.ANY)]

    kernel = functools.partial(
        _fused_forward_kernel,
        num_layers=L, hidden_size=H, seq_len=T, unroll=10)

    # TODO(synk): nn.MultiheadAttention(embed_dim=10000, num_heads=10000) output
    # is never used downstream in the PyTorch forward; omitted as dead code.
    return pl.pallas_call(
        kernel,
        out_shape=jax.ShapeDtypeStruct((1, O), jnp.float32),
        in_specs=in_specs,
        out_specs=vmem,
        scratch_shapes=[
            pltpu.VMEM((T, 4 * H), jnp.float32),      # per-layer input projection
            pltpu.VMEM((T, H), jnp.float32),          # inter-layer hidden states
            pltpu.VMEM((T, H, F), jnp.bfloat16),      # staged fc1 weights
            pltpu.SemaphoreType.DMA,                  # fc1 weight DMA completion
        ],
        compiler_params=pltpu.CompilerParams(vmem_limit_bytes=16 * 1024 * 1024),
        cost_estimate=pl.CostEstimate(
            flops=flops,
            transcendentals=transcendentals,
            bytes_accessed=bytes_accessed),
    )(*operands)


# ---------------------------------------------------------------------------
# Parameter init (PyTorch-style uniform(-1/sqrt(fan), 1/sqrt(fan))).
# ---------------------------------------------------------------------------
def init_params(key, *, input_size, hidden_size, num_layers, fc_hidden,
                output_size, seq_len):
    H = hidden_size
    params = {"lstm": [], "fc": None}
    k_lstm = 1.0 / jnp.sqrt(H)
    for layer in range(num_layers):
        in_feat = input_size if layer == 0 else H
        key, k1, k2, k3, k4 = jax.random.split(key, 5)
        w_ih_t = jax.random.uniform(k1, (in_feat, 4 * H), jnp.float32,
                                    -k_lstm, k_lstm)
        w_hh_t = jax.random.uniform(k2, (H, 4 * H), jnp.float32,
                                    -k_lstm, k_lstm)
        b_ih = jax.random.uniform(k3, (1, 4 * H), jnp.float32, -k_lstm, k_lstm)
        b_hh = jax.random.uniform(k4, (1, 4 * H), jnp.float32, -k_lstm, k_lstm)
        params["lstm"].append((w_ih_t, w_hh_t, b_ih + b_hh))

    d_flat = seq_len * H
    key, k1, k2, k3, k4 = jax.random.split(key, 5)
    kf1 = 1.0 / jnp.sqrt(d_flat)
    kf2 = 1.0 / jnp.sqrt(fc_hidden)
    w1 = jax.random.uniform(k1, (d_flat, fc_hidden), jnp.float32, -kf1, kf1)
    b1 = jax.random.uniform(k2, (1, fc_hidden), jnp.float32, -kf1, kf1)
    w2 = jax.random.uniform(k3, (fc_hidden, output_size), jnp.float32, -kf2, kf2)
    b2 = jax.random.uniform(k4, (1, output_size), jnp.float32, -kf2, kf2)
    # fc1 weight stored pre-reshaped to (T, H, F) and cast to bf16: row 32*t+d
    # of the (T*H, F) weight maps to [t, d, :]; bf16 halves the dominant HBM read.
    w1_r = w1.reshape(seq_len, H, fc_hidden).astype(jnp.bfloat16)
    params["fc"] = (w1_r, b1, w2, b2)
    return params, key


if __name__ == "__main__":
    # Small config consistent with the module (T=250 is fixed by the forward).
    SEQ_LEN = 250
    INPUT_SIZE = 16
    HIDDEN_SIZE = 32
    NUM_LAYERS = 2
    FC_HIDDEN = 128
    OUTPUT_SIZE = 4

    key = jax.random.PRNGKey(0)
    key, kx, kh, kc = jax.random.split(key, 4)

    # Input: anything that views to (1, 250, input_size).
    x = jax.random.normal(kx, (1, SEQ_LEN, INPUT_SIZE), jnp.float32)
    # h0 / c0 are torch.randn in the original forward -> deterministic normals.
    h0 = jax.random.normal(kh, (NUM_LAYERS, 1, HIDDEN_SIZE), jnp.float32)
    c0 = jax.random.normal(kc, (NUM_LAYERS, 1, HIDDEN_SIZE), jnp.float32)

    params, _ = init_params(
        key,
        input_size=INPUT_SIZE,
        hidden_size=HIDDEN_SIZE,
        num_layers=NUM_LAYERS,
        fc_hidden=FC_HIDDEN,
        output_size=OUTPUT_SIZE,
        seq_len=SEQ_LEN,
    )

    out = my_neural_net_forward(
        x, params, h0, c0, hidden_size=HIDDEN_SIZE, num_layers=NUM_LAYERS
    )
    out = jax.block_until_ready(out)
    assert out.shape == (1, OUTPUT_SIZE)
    assert bool(jnp.all((out >= 0.0) & (out <= 1.0)))
    print("KERNEL_OK")
</pallas_src>

<mosaic_0001>
module attributes {stable_mosaic.version = 11 : i64} {
  func.func @_fused_forward_kernel(%arg0: memref<250x16xf32, #tpu.memory_space<vmem>>, %arg1: memref<16x128xf32, #tpu.memory_space<vmem>>, %arg2: memref<32x128xf32, #tpu.memory_space<vmem>>, %arg3: memref<1x128xf32, #tpu.memory_space<vmem>>, %arg4: memref<32x128xf32, #tpu.memory_space<vmem>>, %arg5: memref<32x128xf32, #tpu.memory_space<vmem>>, %arg6: memref<1x128xf32, #tpu.memory_space<vmem>>, %arg7: memref<2x32xf32, #tpu.memory_space<vmem>>, %arg8: memref<2x32xf32, #tpu.memory_space<vmem>>, %arg9: memref<1x128xf32, #tpu.memory_space<vmem>>, %arg10: memref<128x4xf32, #tpu.memory_space<vmem>>, %arg11: memref<1x4xf32, #tpu.memory_space<vmem>>, %arg12: memref<250x32x128xbf16, #tpu.memory_space<any>>, %arg13: memref<1x4xf32, #tpu.memory_space<vmem>>, %arg14: memref<250x128xf32, #tpu.memory_space<vmem>>, %arg15: memref<250x32xf32, #tpu.memory_space<vmem>>, %arg16: memref<250x32x128xbf16, #tpu.memory_space<vmem>>, %arg17: memref<!tpu.dma_semaphore, #tpu.memory_space<semaphore_mem>>) attributes {dimension_semantics = [], scalar_prefetch = 0 : i64, scratch_operands = 4 : i64, tpu.core_type = #tpu.core_type<tc>} {
    tpu.enqueue_dma source(%arg12 : memref<250x32x128xbf16, #tpu.memory_space<any>>) target(%arg16 : memref<250x32x128xbf16, #tpu.memory_space<vmem>>) target_semaphore(%arg17 : memref<!tpu.dma_semaphore, #tpu.memory_space<semaphore_mem>>)
    %c0 = arith.constant 0 : index
    %c0_0 = arith.constant 0 : index
    %0 = vector.load %arg0[%c0, %c0_0] : memref<250x16xf32, #tpu.memory_space<vmem>>, vector<250x16xf32>
    %c0_1 = arith.constant 0 : index
    %c0_2 = arith.constant 0 : index
    %1 = vector.load %arg1[%c0_1, %c0_2] : memref<16x128xf32, #tpu.memory_space<vmem>>, vector<16x128xf32>
    %cst = arith.constant dense<0.000000e+00> : vector<250x128xf32>
    %2 = tpu.matmul %0, %1, %cst {dimension_numbers = #tpu.dot_dimension_numbers<[1], [0], [0], [1], [0, 0, 1, 1], [], []>} : vector<250x16xf32>, vector<16x128xf32>, vector<250x128xf32> -> vector<250x128xf32>
    %c0_3 = arith.constant 0 : index
    %c0_4 = arith.constant 0 : index
    %3 = vector.load %arg3[%c0_3, %c0_4] : memref<1x128xf32, #tpu.memory_space<vmem>>, vector<1x128xf32>
    %4 = vector.broadcast %3 : vector<1x128xf32> to vector<250x128xf32>
    %5 = arith.addf %2, %4 : vector<250x128xf32>
    %c0_5 = arith.constant 0 : index
    %c0_6 = arith.constant 0 : index
    %6 = vector.load %arg14[%c0_5, %c0_6] : memref<250x128xf32, #tpu.memory_space<vmem>>, vector<250x128xf32>
    tpu.vector_store %arg14[%c0_5, %c0_6], %5 {strides = array<i32>} : memref<250x128xf32, #tpu.memory_space<vmem>>, vector<250x128xf32>,
    %c0_7 = arith.constant 0 : index
    %c0_8 = arith.constant 0 : index
    %7 = vector.load %arg2[%c0_7, %c0_8] : memref<32x128xf32, #tpu.memory_space<vmem>>, vector<32x128xf32>
    %c0_9 = arith.constant 0 : index
    %c0_10 = arith.constant 0 : index
    %8 = vector.load %arg7[%c0_9, %c0_10] : memref<2x32xf32, #tpu.memory_space<vmem>>, vector<1x32xf32>
    %c0_11 = arith.constant 0 : index
    %c0_12 = arith.constant 0 : index
    %9 = vector.load %arg8[%c0_11, %c0_12] : memref<2x32xf32, #tpu.memory_space<vmem>>, vector<1x32xf32>
    %c0_i32 = arith.constant 0 : i32
    %c25_i32 = arith.constant 25 : i32
    %10 = arith.addi %c0_i32, %c25_i32 : i32
    %c1_i32 = arith.constant 1 : i32
    %11:2 = scf.for %arg18 = %c0_i32 to %10 step %c1_i32 iter_args(%arg19 = %8, %arg20 = %9) -> (vector<1x32xf32>, vector<1x32xf32>)  : i32 {
      %c10_i32 = arith.constant 10 : i32
      %39 = arith.muli %arg18, %c10_i32 : i32
      %c0_i32_44 = arith.constant 0 : i32
      %40 = arith.addi %39, %c0_i32_44 : i32
      %41 = arith.index_cast %40 : i32 to index
      %c0_45 = arith.constant 0 : index
      %42 = vector.load %arg14[%41, %c0_45] : memref<250x128xf32, #tpu.memory_space<vmem>>, vector<1x128xf32>
      %cst_46 = arith.constant dense<0.000000e+00> : vector<1x128xf32>
      %43 = tpu.matmul %arg19, %7, %cst_46 {dimension_numbers = #tpu.dot_dimension_numbers<[1], [0], [0], [1], [0, 0, 1, 1], [], []>} : vector<1x32xf32>, vector<32x128xf32>, vector<1x128xf32> -> vector<1x128xf32>
      %44 = arith.addf %42, %43 : vector<1x128xf32>
      %45 = arith.negf %44 : vector<1x128xf32>
      %46 = math.exp %45 : vector<1x128xf32>
      %cst_47 = arith.constant 1.000000e+00 : f32
      %47 = vector.broadcast %cst_47 : f32 to vector<1x128xf32>
      %48 = arith.addf %47, %46 : vector<1x128xf32>
      %49 = arith.divf %47, %48 : vector<1x128xf32>
      %50 = math.tanh %44 : vector<1x128xf32>
      %51 = vector.extract_strided_slice %49 {offsets = [0, 0], sizes = [1, 32], strides = [1, 1]} : vector<1x128xf32> to vector<1x32xf32>
      %52 = vector.extract_strided_slice %49 {offsets = [0, 32], sizes = [1, 32], strides = [1, 1]} : vector<1x128xf32> to vector<1x32xf32>
      %53 = vector.extract_strided_slice %49 {offsets = [0, 96], sizes = [1, 32], strides = [1, 1]} : vector<1x128xf32> to vector<1x32xf32>
      %54 = vector.extract_strided_slice %50 {offsets = [0, 64], sizes = [1, 32], strides = [1, 1]} : vector<1x128xf32> to vector<1x32xf32>
      %55 = arith.mulf %52, %arg20 : vector<1x32xf32>
      %56 = arith.mulf %51, %54 : vector<1x32xf32>
      %57 = arith.addf %55, %56 : vector<1x32xf32>
      %58 = math.tanh %57 : vector<1x32xf32>
      %59 = arith.mulf %53, %58 : vector<1x32xf32>
      %60 = arith.index_cast %40 : i32 to index
      %c0_48 = arith.constant 0 : index
      %61 = vector.load %arg15[%60, %c0_48] : memref<250x32xf32, #tpu.memory_space<vmem>>, vector<1x32xf32>
      tpu.vector_store %arg15[%60, %c0_48], %59 {strides = array<i32>} : memref<250x32xf32, #tpu.memory_space<vmem>>, vector<1x32xf32>,
      %c1_i32_49 = arith.constant 1 : i32
      %62 = arith.addi %39, %c1_i32_49 : i32
      %63 = arith.index_cast %62 : i32 to index
      %c0_50 = arith.constant 0 : index
      %64 = vector.load %arg14[%63, %c0_50] : memref<250x128xf32, #tpu.memory_space<vmem>>, vector<1x128xf32>
      %cst_51 = arith.constant dense<0.000000e+00> : vector<1x128xf32>
      %65 = tpu.matmul %59, %7, %cst_51 {dimension_numbers = #tpu.dot_dimension_numbers<[1], [0], [0], [1], [0, 0, 1, 1], [], []>} : vector<1x32xf32>, vector<32x128xf32>, vector<1x128xf32> -> vector<1x128xf32>
      %66 = arith.addf %64, %65 : vector<1x128xf32>
      %67 = arith.negf %66 : vector<1x128xf32>
      %68 = math.exp %67 : vector<1x128xf32>
      %cst_52 = arith.constant 1.000000e+00 : f32
      %69 = vector.broadcast %cst_52 : f32 to vector<1x128xf32>
      %70 = arith.addf %69, %68 : vector<1x128xf32>
      %71 = arith.divf %69, %70 : vector<1x128xf32>
      %72 = math.tanh %66 : vector<1x128xf32>
      %73 = vector.extract_strided_slice %71 {offsets = [0, 0], sizes = [1, 32], strides = [1, 1]} : vector<1x128xf32> to vector<1x32xf32>
      %74 = vector.extract_strided_slice %71 {offsets = [0, 32], sizes = [1, 32], strides = [1, 1]} : vector<1x128xf32> to vector<1x32xf32>
      %75 = vector.extract_strided_slice %71 {offsets = [0, 96], sizes = [1, 32], strides = [1, 1]} : vector<1x128xf32> to vector<1x32xf32>
      %76 = vector.extract_strided_slice %72 {offsets = [0, 64], sizes = [1, 32], strides = [1, 1]} : vector<1x128xf32> to vector<1x32xf32>
      %77 = arith.mulf %74, %57 : vector<1x32xf32>
      %78 = arith.mulf %73, %76 : vector<1x32xf32>
      %79 = arith.addf %77, %78 : vector<1x32xf32>
      %80 = math.tanh %79 : vector<1x32xf32>
      %81 = arith.mulf %75, %80 : vector<1x32xf32>
      %82 = arith.index_cast %62 : i32 to index
      %c0_53 = arith.constant 0 : index
      %83 = vector.load %arg15[%82, %c0_53] : memref<250x32xf32, #tpu.memory_space<vmem>>, vector<1x32xf32>
      tpu.vector_store %arg15[%82, %c0_53], %81 {strides = array<i32>} : memref<250x32xf32, #tpu.memory_space<vmem>>, vector<1x32xf32>,
      %c2_i32 = arith.constant 2 : i32
      %84 = arith.addi %39, %c2_i32 : i32
      %85 = arith.index_cast %84 : i32 to index
      %c0_54 = arith.constant 0 : index
      %86 = vector.load %arg14[%85, %c0_54] : memref<250x128xf32, #tpu.memory_space<vmem>>, vector<1x128xf32>
      %cst_55 = arith.constant dense<0.000000e+00> : vector<1x128xf32>
      %87 = tpu.matmul %81, %7, %cst_55 {dimension_numbers = #tpu.dot_dimension_numbers<[1], [0], [0], [1], [0, 0, 1, 1], [], []>} : vector<1x32xf32>, vector<32x128xf32>, vector<1x128xf32> -> vector<1x128xf32>
      %88 = arith.addf %86, %87 : vector<1x128xf32>
      %89 = arith.negf %88 : vector<1x128xf32>
      %90 = math.exp %89 : vector<1x128xf32>
      %cst_56 = arith.constant 1.000000e+00 : f32
      %91 = vector.broadcast %cst_56 : f32 to vector<1x128xf32>
      %92 = arith.addf %91, %90 : vector<1x128xf32>
      %93 = arith.divf %91, %92 : vector<1x128xf32>
      %94 = math.tanh %88 : vector<1x128xf32>
      %95 = vector.extract_strided_slice %93 {offsets = [0, 0], sizes = [1, 32], strides = [1, 1]} : vector<1x128xf32> to vector<1x32xf32>
      %96 = vector.extract_strided_slice %93 {offsets = [0, 32], sizes = [1, 32], strides = [1, 1]} : vector<1x128xf32> to vector<1x32xf32>
      %97 = vector.extract_strided_slice %93 {offsets = [0, 96], sizes = [1, 32], strides = [1, 1]} : vector<1x128xf32> to vector<1x32xf32>
      %98 = vector.extract_strided_slice %94 {offsets = [0, 64], sizes = [1, 32], strides = [1, 1]} : vector<1x128xf32> to vector<1x32xf32>
      %99 = arith.mulf %96, %79 : vector<1x32xf32>
      %100 = arith.mulf %95, %98 : vector<1x32xf32>
      %101 = arith.addf %99, %100 : vector<1x32xf32>
      %102 = math.tanh %101 : vector<1x32xf32>
      %103 = arith.mulf %97, %102 : vector<1x32xf32>
      %104 = arith.index_cast %84 : i32 to index
      %c0_57 = arith.constant 0 : index
      %105 = vector.load %arg15[%104, %c0_57] : memref<250x32xf32, #tpu.memory_space<vmem>>, vector<1x32xf32>
      tpu.vector_store %arg15[%104, %c0_57], %103 {strides = array<i32>} : memref<250x32xf32, #tpu.memory_space<vmem>>, vector<1x32xf32>,
      %c3_i32 = arith.constant 3 : i32
      %106 = arith.addi %39, %c3_i32 : i32
      %107 = arith.index_cast %106 : i32 to index
      %c0_58 = arith.constant 0 : index
      %108 = vector.load %arg14[%107, %c0_58] : memref<250x128xf32, #tpu.memory_space<vmem>>, vector<1x128xf32>
      %cst_59 = arith.constant dense<0.000000e+00> : vector<1x128xf32>
      %109 = tpu.matmul %103, %7, %cst_59 {dimension_numbers = #tpu.dot_dimension_numbers<[1], [0], [0], [1], [0, 0, 1, 1], [], []>} : vector<1x32xf32>, vector<32x128xf32>, vector<1x128xf32> -> vector<1x128xf32>
      %110 = arith.addf %108, %109 : vector<1x128xf32>
      %111 = arith.negf %110 : vector<1x128xf32>
      %112 = math.exp %111 : vector<1x128xf32>
      %cst_60 = arith.constant 1.000000e+00 : f32
      %113 = vector.broadcast %cst_60 : f32 to vector<1x128xf32>
      %114 = arith.addf %113, %112 : vector<1x128xf32>
      %115 = arith.divf %113, %114 : vector<1x128xf32>
      %116 = math.tanh %110 : vector<1x128xf32>
      %117 = vector.extract_strided_slice %115 {offsets = [0, 0], sizes = [1, 32], strides = [1, 1]} : vector<1x128xf32> to vector<1x32xf32>
      %118 = vector.extract_strided_slice %115 {offsets = [0, 32], sizes = [1, 32], strides = [1, 1]} : vector<1x128xf32> to vector<1x32xf32>
      %119 = vector.extract_strided_slice %115 {offsets = [0, 96], sizes = [1, 32], strides = [1, 1]} : vector<1x128xf32> to vector<1x32xf32>
      %120 = vector.extract_strided_slice %116 {offsets = [0, 64], sizes = [1, 32], strides = [1, 1]} : vector<1x128xf32> to vector<1x32xf32>
      %121 = arith.mulf %118, %101 : vector<1x32xf32>
      %122 = arith.mulf %117, %120 : vector<1x32xf32>
      %123 = arith.addf %121, %122 : vector<1x32xf32>
      %124 = math.tanh %123 : vector<1x32xf32>
      %125 = arith.mulf %119, %124 : vector<1x32xf32>
      %126 = arith.index_cast %106 : i32 to index
      %c0_61 = arith.constant 0 : index
      %127 = vector.load %arg15[%126, %c0_61] : memref<250x32xf32, #tpu.memory_space<vmem>>, vector<1x32xf32>
      tpu.vector_store %arg15[%126, %c0_61], %125 {strides = array<i32>} : memref<250x32xf32, #tpu.memory_space<vmem>>, vector<1x32xf32>,
      %c4_i32 = arith.constant 4 : i32
      %128 = arith.addi %39, %c4_i32 : i32
      %129 = arith.index_cast %128 : i32 to index
      %c0_62 = arith.constant 0 : index
      %130 = vector.load %arg14[%129, %c0_62] : memref<250x128xf32, #tpu.memory_space<vmem>>, vector<1x128xf32>
      %cst_63 = arith.constant dense<0.000000e+00> : vector<1x128xf32>
      %131 = tpu.matmul %125, %7, %cst_63 {dimension_numbers = #tpu.dot_dimension_numbers<[1], [0], [0], [1], [0, 0, 1, 1], [], []>} : vector<1x32xf32>, vector<32x128xf32>, vector<1x128xf32> -> vector<1x128xf32>
      %132 = arith.addf %130, %131 : vector<1x128xf32>
      %133 = arith.negf %132 : vector<1x128xf32>
      %134 = math.exp %133 : vector<1x128xf32>
      %cst_64 = arith.constant 1.000000e+00 : f32
      %135 = vector.broadcast %cst_64 : f32 to vector<1x128xf32>
      %136 = arith.addf %135, %134 : vector<1x128xf32>
      %137 = arith.divf %135, %136 : vector<1x128xf32>
      %138 = math.tanh %132 : vector<1x128xf32>
      %139 = vector.extract_strided_slice %137 {offsets = [0, 0], sizes = [1, 32], strides = [1, 1]} : vector<1x128xf32> to vector<1x32xf32>
      %140 = vector.extract_strided_slice %137 {offsets = [0, 32], sizes = [1, 32], strides = [1, 1]} : vector<1x128xf32> to vector<1x32xf32>
      %141 = vector.extract_strided_slice %137 {offsets = [0, 96], sizes = [1, 32], strides = [1, 1]} : vector<1x128xf32> to vector<1x32xf32>
      %142 = vector.extract_strided_slice %138 {offsets = [0, 64], sizes = [1, 32], strides = [1, 1]} : vector<1x128xf32> to vector<1x32xf32>
      %143 = arith.mulf %140, %123 : vector<1x32xf32>
      %144 = arith.mulf %139, %142 : vector<1x32xf32>
      %145 = arith.addf %143, %144 : vector<1x32xf32>
      %146 = math.tanh %145 : vector<1x32xf32>
      %147 = arith.mulf %141, %146 : vector<1x32xf32>
      %148 = arith.index_cast %128 : i32 to index
      %c0_65 = arith.constant 0 : index
      %149 = vector.load %arg15[%148, %c0_65] : memref<250x32xf32, #tpu.memory_space<vmem>>, vector<1x32xf32>
      tpu.vector_store %arg15[%148, %c0_65], %147 {strides = array<i32>} : memref<250x32xf32, #tpu.memory_space<vmem>>, vector<1x32xf32>,
      %c5_i32 = arith.constant 5 : i32
      %150 = arith.addi %39, %c5_i32 : i32
      %151 = arith.index_cast %150 : i32 to index
      %c0_66 = arith.constant 0 : index
      %152 = vector.load %arg14[%151, %c0_66] : memref<250x128xf32, #tpu.memory_space<vmem>>, vector<1x128xf32>
      %cst_67 = arith.constant dense<0.000000e+00> : vector<1x128xf32>
      %153 = tpu.matmul %147, %7, %cst_67 {dimension_numbers = #tpu.dot_dimension_numbers<[1], [0], [0], [1], [0, 0, 1, 1], [], []>} : vector<1x32xf32>, vector<32x128xf32>, vector<1x128xf32> -> vector<1x128xf32>
      %154 = arith.addf %152, %153 : vector<1x128xf32>
      %155 = arith.negf %154 : vector<1x128xf32>
      %156 = math.exp %155 : vector<1x128xf32>
      %cst_68 = arith.constant 1.000000e+00 : f32
      %157 = vector.broadcast %cst_68 : f32 to vector<1x128xf32>
      %158 = arith.addf %157, %156 : vector<1x128xf32>
      %159 = arith.divf %157, %158 : vector<1x128xf32>
      %160 = math.tanh %154 : vector<1x128xf32>
      %161 = vector.extract_strided_slice %159 {offsets = [0, 0], sizes = [1, 32], strides = [1, 1]} : vector<1x128xf32> to vector<1x32xf32>
      %162 = vector.extract_strided_slice %159 {offsets = [0, 32], sizes = [1, 32], strides = [1, 1]} : vector<1x128xf32> to vector<1x32xf32>
      %163 = vector.extract_strided_slice %159 {offsets = [0, 96], sizes = [1, 32], strides = [1, 1]} : vector<1x128xf32> to vector<1x32xf32>
      %164 = vector.extract_strided_slice %160 {offsets = [0, 64], sizes = [1, 32], strides = [1, 1]} : vector<1x128xf32> to vector<1x32xf32>
      %165 = arith.mulf %162, %145 : vector<1x32xf32>
      %166 = arith.mulf %161, %164 : vector<1x32xf32>
      %167 = arith.addf %165, %166 : vector<1x32xf32>
      %168 = math.tanh %167 : vector<1x32xf32>
      %169 = arith.mulf %163, %168 : vector<1x32xf32>
      %170 = arith.index_cast %150 : i32 to index
      %c0_69 = arith.constant 0 : index
      %171 = vector.load %arg15[%170, %c0_69] : memref<250x32xf32, #tpu.memory_space<vmem>>, vector<1x32xf32>
      tpu.vector_store %arg15[%170, %c0_69], %169 {strides = array<i32>} : memref<250x32xf32, #tpu.memory_space<vmem>>, vector<1x32xf32>,
      %c6_i32 = arith.constant 6 : i32
      %172 = arith.addi %39, %c6_i32 : i32
      %173 = arith.index_cast %172 : i32 to index
      %c0_70 = arith.constant 0 : index
      %174 = vector.load %arg14[%173, %c0_70] : memref<250x128xf32, #tpu.memory_space<vmem>>, vector<1x128xf32>
      %cst_71 = arith.constant dense<0.000000e+00> : vector<1x128xf32>
      %175 = tpu.matmul %169, %7, %cst_71 {dimension_numbers = #tpu.dot_dimension_numbers<[1], [0], [0], [1], [0, 0, 1, 1], [], []>} : vector<1x32xf32>, vector<32x128xf32>, vector<1x128xf32> -> vector<1x128xf32>
      %176 = arith.addf %174, %175 : vector<1x128xf32>
      %177 = arith.negf %176 : vector<1x128xf32>
      %178 = math.exp %177 : vector<1x128xf32>
      %cst_72 = arith.constant 1.000000e+00 : f32
      %179 = vector.broadcast %cst_72 : f32 to vector<1x128xf32>
      %180 = arith.addf %179, %178 : vector<1x128xf32>
      %181 = arith.divf %179, %180 : vector<1x128xf32>
      %182 = math.tanh %176 : vector<1x128xf32>
      %183 = vector.extract_strided_slice %181 {offsets = [0, 0], sizes = [1, 32], strides = [1, 1]} : vector<1x128xf32> to vector<1x32xf32>
      %184 = vector.extract_strided_slice %181 {offsets = [0, 32], sizes = [1, 32], strides = [1, 1]} : vector<1x128xf32> to vector<1x32xf32>
      %185 = vector.extract_strided_slice %181 {offsets = [0, 96], sizes = [1, 32], strides = [1, 1]} : vector<1x128xf32> to vector<1x32xf32>
      %186 = vector.extract_strided_slice %182 {offsets = [0, 64], sizes = [1, 32], strides = [1, 1]} : vector<1x128xf32> to vector<1x32xf32>
      %187 = arith.mulf %184, %167 : vector<1x32xf32>
      %188 = arith.mulf %183, %186 : vector<1x32xf32>
      %189 = arith.addf %187, %188 : vector<1x32xf32>
      %190 = math.tanh %189 : vector<1x32xf32>
      %191 = arith.mulf %185, %190 : vector<1x32xf32>
      %192 = arith.index_cast %172 : i32 to index
      %c0_73 = arith.constant 0 : index
      %193 = vector.load %arg15[%192, %c0_73] : memref<250x32xf32, #tpu.memory_space<vmem>>, vector<1x32xf32>
      tpu.vector_store %arg15[%192, %c0_73], %191 {strides = array<i32>} : memref<250x32xf32, #tpu.memory_space<vmem>>, vector<1x32xf32>,
      %c7_i32 = arith.constant 7 : i32
      %194 = arith.addi %39, %c7_i32 : i32
      %195 = arith.index_cast %194 : i32 to index
      %c0_74 = arith.constant 0 : index
      %196 = vector.load %arg14[%195, %c0_74] : memref<250x128xf32, #tpu.memory_space<vmem>>, vector<1x128xf32>
      %cst_75 = arith.constant dense<0.000000e+00> : vector<1x128xf32>
      %197 = tpu.matmul %191, %7, %cst_75 {dimension_numbers = #tpu.dot_dimension_numbers<[1], [0], [0], [1], [0, 0, 1, 1], [], []>} : vector<1x32xf32>, vector<32x128xf32>, vector<1x128xf32> -> vector<1x128xf32>
      %198 = arith.addf %196, %197 : vector<1x128xf32>
      %199 = arith.negf %198 : vector<1x128xf32>
      %200 = math.exp %199 : vector<1x128xf32>
      %cst_76 = arith.constant 1.000000e+00 : f32
      %201 = vector.broadcast %cst_76 : f32 to vector<1x128xf32>
      %202 = arith.addf %201, %200 : vector<1x128xf32>
      %203 = arith.divf %201, %202 : vector<1x128xf32>
      %204 = math.tanh %198 : vector<1x128xf32>
      %205 = vector.extract_strided_slice %203 {offsets = [0, 0], sizes = [1, 32], strides = [1, 1]} : vector<1x128xf32> to vector<1x32xf32>
      %206 = vector.extract_strided_slice %203 {offsets = [0, 32], sizes = [1, 32], strides = [1, 1]} : vector<1x128xf32> to vector<1x32xf32>
      %207 = vector.extract_strided_slice %203 {offsets = [0, 96], sizes = [1, 32], strides = [1, 1]} : vector<1x128xf32> to vector<1x32xf32>
      %208 = vector.extract_strided_slice %204 {offsets = [0, 64], sizes = [1, 32], strides = [1, 1]} : vector<1x128xf32> to vector<1x32xf32>
      %209 = arith.mulf %206, %189 : vector<1x32xf32>
      %210 = arith.mulf %205, %208 : vector<1x32xf32>
      %211 = arith.addf %209, %210 : vector<1x32xf32>
      %212 = math.tanh %211 : vector<1x32xf32>
      %213 = arith.mulf %207, %212 : vector<1x32xf32>
      %214 = arith.index_cast %194 : i32 to index
      %c0_77 = arith.constant 0 : index
      %215 = vector.load %arg15[%214, %c0_77] : memref<250x32xf32, #tpu.memory_space<vmem>>, vector<1x32xf32>
      tpu.vector_store %arg15[%214, %c0_77], %213 {strides = array<i32>} : memref<250x32xf32, #tpu.memory_space<vmem>>, vector<1x32xf32>,
      %c8_i32 = arith.constant 8 : i32
      %216 = arith.addi %39, %c8_i32 : i32
      %217 = arith.index_cast %216 : i32 to index
      %c0_78 = arith.constant 0 : index
      %218 = vector.load %arg14[%217, %c0_78] : memref<250x128xf32, #tpu.memory_space<vmem>>, vector<1x128xf32>
      %cst_79 = arith.constant dense<0.000000e+00> : vector<1x128xf32>
      %219 = tpu.matmul %213, %7, %cst_79 {dimension_numbers = #tpu.dot_dimension_numbers<[1], [0], [0], [1], [0, 0, 1, 1], [], []>} : vector<1x32xf32>, vector<32x128xf32>, vector<1x128xf32> -> vector<1x128xf32>
      %220 = arith.addf %218, %219 : vector<1x128xf32>
      %221 = arith.negf %220 : vector<1x128xf32>
      %222 = math.exp %221 : vector<1x128xf32>
      %cst_80 = arith.constant 1.000000e+00 : f32
      %223 = vector.broadcast %cst_80 : f32 to vector<1x128xf32>
      %224 = arith.addf %223, %222 : vector<1x128xf32>
      %225 = arith.divf %223, %224 : vector<1x128xf32>
      %226 = math.tanh %220 : vector<1x128xf32>
      %227 = vector.extract_strided_slice %225 {offsets = [0, 0], sizes = [1, 32], strides = [1, 1]} : vector<1x128xf32> to vector<1x32xf32>
      %228 = vector.extract_strided_slice %225 {offsets = [0, 32], sizes = [1, 32], strides = [1, 1]} : vector<1x128xf32> to vector<1x32xf32>
      %229 = vector.extract_strided_slice %225 {offsets = [0, 96], sizes = [1, 32], strides = [1, 1]} : vector<1x128xf32> to vector<1x32xf32>
      %230 = vector.extract_strided_slice %226 {offsets = [0, 64], sizes = [1, 32], strides = [1, 1]} : vector<1x128xf32> to vector<1x32xf32>
      %231 = arith.mulf %228, %211 : vector<1x32xf32>
      %232 = arith.mulf %227, %230 : vector<1x32xf32>
      %233 = arith.addf %231, %232 : vector<1x32xf32>
      %234 = math.tanh %233 : vector<1x32xf32>
      %235 = arith.mulf %229, %234 : vector<1x32xf32>
      %236 = arith.index_cast %216 : i32 to index
      %c0_81 = arith.constant 0 : index
      %237 = vector.load %arg15[%236, %c0_81] : memref<250x32xf32, #tpu.memory_space<vmem>>, vector<1x32xf32>
      tpu.vector_store %arg15[%236, %c0_81], %235 {strides = array<i32>} : memref<250x32xf32, #tpu.memory_space<vmem>>, vector<1x32xf32>,
      %c9_i32 = arith.constant 9 : i32
      %238 = arith.addi %39, %c9_i32 : i32
      %239 = arith.index_cast %238 : i32 to index
      %c0_82 = arith.constant 0 : index
      %240 = vector.load %arg14[%239, %c0_82] : memref<250x128xf32, #tpu.memory_space<vmem>>, vector<1x128xf32>
      %cst_83 = arith.constant dense<0.000000e+00> : vector<1x128xf32>
      %241 = tpu.matmul %235, %7, %cst_83 {dimension_numbers = #tpu.dot_dimension_numbers<[1], [0], [0], [1], [0, 0, 1, 1], [], []>} : vector<1x32xf32>, vector<32x128xf32>, vector<1x128xf32> -> vector<1x128xf32>
      %242 = arith.addf %240, %241 : vector<1x128xf32>
      %243 = arith.negf %242 : vector<1x128xf32>
      %244 = math.exp %243 : vector<1x128xf32>
      %cst_84 = arith.constant 1.000000e+00 : f32
      %245 = vector.broadcast %cst_84 : f32 to vector<1x128xf32>
      %246 = arith.addf %245, %244 : vector<1x128xf32>
      %247 = arith.divf %245, %246 : vector<1x128xf32>
      %248 = math.tanh %242 : vector<1x128xf32>
      %249 = vector.extract_strided_slice %247 {offsets = [0, 0], sizes = [1, 32], strides = [1, 1]} : vector<1x128xf32> to vector<1x32xf32>
      %250 = vector.extract_strided_slice %247 {offsets = [0, 32], sizes = [1, 32], strides = [1, 1]} : vector<1x128xf32> to vector<1x32xf32>
      %251 = vector.extract_strided_slice %247 {offsets = [0, 96], sizes = [1, 32], strides = [1, 1]} : vector<1x128xf32> to vector<1x32xf32>
      %252 = vector.extract_strided_slice %248 {offsets = [0, 64], sizes = [1, 32], strides = [1, 1]} : vector<1x128xf32> to vector<1x32xf32>
      %253 = arith.mulf %250, %233 : vector<1x32xf32>
      %254 = arith.mulf %249, %252 : vector<1x32xf32>
      %255 = arith.addf %253, %254 : vector<1x32xf32>
      %256 = math.tanh %255 : vector<1x32xf32>
      %257 = arith.mulf %251, %256 : vector<1x32xf32>
      %258 = arith.index_cast %238 : i32 to index
      %c0_85 = arith.constant 0 : index
      %259 = vector.load %arg15[%258, %c0_85] : memref<250x32xf32, #tpu.memory_space<vmem>>, vector<1x32xf32>
      tpu.vector_store %arg15[%258, %c0_85], %257 {strides = array<i32>} : memref<250x32xf32, #tpu.memory_space<vmem>>, vector<1x32xf32>,
      scf.yield %257, %255 : vector<1x32xf32>, vector<1x32xf32>
    }
    %c25_i32_13 = arith.constant 25 : i32
    %c0_14 = arith.constant 0 : index
    %c0_15 = arith.constant 0 : index
    %12 = vector.load %arg15[%c0_14, %c0_15] : memref<250x32xf32, #tpu.memory_space<vmem>>, vector<250x32xf32>
    %c0_16 = arith.constant 0 : index
    %c0_17 = arith.constant 0 : index
    %13 = vector.load %arg4[%c0_16, %c0_17] : memref<32x128xf32, #tpu.memory_space<vmem>>, vector<32x128xf32>
    %cst_18 = arith.constant dense<0.000000e+00> : vector<250x128xf32>
    %14 = tpu.matmul %12, %13, %cst_18 {dimension_numbers = #tpu.dot_dimension_numbers<[1], [0], [0], [1], [0, 0, 1, 1], [], []>} : vector<250x32xf32>, vector<32x128xf32>, vector<250x128xf32> -> vector<250x128xf32>
    %c0_19 = arith.constant 0 : index
    %c0_20 = arith.constant 0 : index
    %15 = vector.load %arg6[%c0_19, %c0_20] : memref<1x128xf32, #tpu.memory_space<vmem>>, vector<1x128xf32>
    %16 = vector.broadcast %15 : vector<1x128xf32> to vector<250x128xf32>
    %17 = arith.addf %14, %16 : vector<250x128xf32>
    %c0_21 = arith.constant 0 : index
    %c0_22 = arith.constant 0 : index
    %18 = vector.load %arg14[%c0_21, %c0_22] : memref<250x128xf32, #tpu.memory_space<vmem>>, vector<250x128xf32>
    tpu.vector_store %arg14[%c0_21, %c0_22], %17 {strides = array<i32>} : memref<250x128xf32, #tpu.memory_space<vmem>>, vector<250x128xf32>,
    tpu.wait_dma2 semaphore(%arg17 : memref<!tpu.dma_semaphore, #tpu.memory_space<semaphore_mem>>) src(%arg12 : memref<250x32x128xbf16, #tpu.memory_space<any>>) dst(%arg16 : memref<250x32x128xbf16, #tpu.memory_space<vmem>>)
    %c0_23 = arith.constant 0 : index
    %c0_24 = arith.constant 0 : index
    %19 = vector.load %arg5[%c0_23, %c0_24] : memref<32x128xf32, #tpu.memory_space<vmem>>, vector<32x128xf32>
    %c1 = arith.constant 1 : index
    %c0_25 = arith.constant 0 : index
    %20 = vector.load %arg7[%c1, %c0_25] : memref<2x32xf32, #tpu.memory_space<vmem>>, vector<1x32xf32>
    %c1_26 = arith.constant 1 : index
    %c0_27 = arith.constant 0 : index
    %21 = vector.load %arg8[%c1_26, %c0_27] : memref<2x32xf32, #tpu.memory_space<vmem>>, vector<1x32xf32>
    %cst_28 = arith.constant 0.000000e+00 : f32
    %22 = vector.broadcast %cst_28 : f32 to vector<1x128xf32>
    %c0_i32_29 = arith.constant 0 : i32
    %c25_i32_30 = arith.constant 25 : i32
    %23 = arith.addi %c0_i32_29, %c25_i32_30 : i32
    %c1_i32_31 = arith.constant 1 : i32
    %24:3 = scf.for %arg18 = %c0_i32_29 to %23 step %c1_i32_31 iter_args(%arg19 = %20, %arg20 = %21, %arg21 = %22) -> (vector<1x32xf32>, vector<1x32xf32>, vector<1x128xf32>)  : i32 {
      %c10_i32 = arith.constant 10 : i32
      %39 = arith.muli %arg18, %c10_i32 : i32
      %c0_i32_44 = arith.constant 0 : i32
      %40 = arith.addi %39, %c0_i32_44 : i32
      %41 = arith.index_cast %40 : i32 to index
      %c0_45 = arith.constant 0 : index
      %42 = vector.load %arg14[%41, %c0_45] : memref<250x128xf32, #tpu.memory_space<vmem>>, vector<1x128xf32>
      %cst_46 = arith.constant dense<0.000000e+00> : vector<1x128xf32>
      %43 = tpu.matmul %arg19, %19, %cst_46 {dimension_numbers = #tpu.dot_dimension_numbers<[1], [0], [0], [1], [0, 0, 1, 1], [], []>} : vector<1x32xf32>, vector<32x128xf32>, vector<1x128xf32> -> vector<1x128xf32>
      %44 = arith.addf %42, %43 : vector<1x128xf32>
      %45 = arith.negf %44 : vector<1x128xf32>
      %46 = math.exp %45 : vector<1x128xf32>
      %cst_47 = arith.constant 1.000000e+00 : f32
      %47 = vector.broadcast %cst_47 : f32 to vector<1x128xf32>
      %48 = arith.addf %47, %46 : vector<1x128xf32>
      %49 = arith.divf %47, %48 : vector<1x128xf32>
      %50 = math.tanh %44 : vector<1x128xf32>
      %51 = vector.extract_strided_slice %49 {offsets = [0, 0], sizes = [1, 32], strides = [1, 1]} : vector<1x128xf32> to vector<1x32xf32>
      %52 = vector.extract_strided_slice %49 {offsets = [0, 32], sizes = [1, 32], strides = [1, 1]} : vector<1x128xf32> to vector<1x32xf32>
      %53 = vector.extract_strided_slice %49 {offsets = [0, 96], sizes = [1, 32], strides = [1, 1]} : vector<1x128xf32> to vector<1x32xf32>
      %54 = vector.extract_strided_slice %50 {offsets = [0, 64], sizes = [1, 32], strides = [1, 1]} : vector<1x128xf32> to vector<1x32xf32>
      %55 = arith.mulf %52, %arg20 : vector<1x32xf32>
      %56 = arith.mulf %51, %54 : vector<1x32xf32>
      %57 = arith.addf %55, %56 : vector<1x32xf32>
      %58 = math.tanh %57 : vector<1x32xf32>
      %59 = arith.mulf %53, %58 : vector<1x32xf32>
      %60 = arith.truncf %59 : vector<1x32xf32> to vector<1x32xbf16>
      %61 = arith.index_cast %40 : i32 to index
      %c0_48 = arith.constant 0 : index
      %c0_49 = arith.constant 0 : index
      %62 = vector.load %arg16[%61, %c0_48, %c0_49] : memref<250x32x128xbf16, #tpu.memory_space<vmem>>, vector<1x32x128xbf16>
      %63 = vector.shape_cast %62 : vector<1x32x128xbf16> to vector<32x128xbf16>
      %cst_50 = arith.constant dense<0.000000e+00> : vector<1x128xf32>
      %64 = tpu.matmul %60, %63, %cst_50 {dimension_numbers = #tpu.dot_dimension_numbers<[1], [0], [0], [1], [0, 0, 1, 1], [], []>} : vector<1x32xbf16>, vector<32x128xbf16>, vector<1x128xf32> -> vector<1x128xf32>
      %65 = arith.addf %arg21, %64 : vector<1x128xf32>
      %c1_i32_51 = arith.constant 1 : i32
      %66 = arith.addi %39, %c1_i32_51 : i32
      %67 = arith.index_cast %66 : i32 to index
      %c0_52 = arith.constant 0 : index
      %68 = vector.load %arg14[%67, %c0_52] : memref<250x128xf32, #tpu.memory_space<vmem>>, vector<1x128xf32>
      %cst_53 = arith.constant dense<0.000000e+00> : vector<1x128xf32>
      %69 = tpu.matmul %59, %19, %cst_53 {dimension_numbers = #tpu.dot_dimension_numbers<[1], [0], [0], [1], [0, 0, 1, 1], [], []>} : vector<1x32xf32>, vector<32x128xf32>, vector<1x128xf32> -> vector<1x128xf32>
      %70 = arith.addf %68, %69 : vector<1x128xf32>
      %71 = arith.negf %70 : vector<1x128xf32>
      %72 = math.exp %71 : vector<1x128xf32>
      %cst_54 = arith.constant 1.000000e+00 : f32
      %73 = vector.broadcast %cst_54 : f32 to vector<1x128xf32>
      %74 = arith.addf %73, %72 : vector<1x128xf32>
      %75 = arith.divf %73, %74 : vector<1x128xf32>
      %76 = math.tanh %70 : vector<1x128xf32>
      %77 = vector.extract_strided_slice %75 {offsets = [0, 0], sizes = [1, 32], strides = [1, 1]} : vector<1x128xf32> to vector<1x32xf32>
      %78 = vector.extract_strided_slice %75 {offsets = [0, 32], sizes = [1, 32], strides = [1, 1]} : vector<1x128xf32> to vector<1x32xf32>
      %79 = vector.extract_strided_slice %75 {offsets = [0, 96], sizes = [1, 32], strides = [1, 1]} : vector<1x128xf32> to vector<1x32xf32>
      %80 = vector.extract_strided_slice %76 {offsets = [0, 64], sizes = [1, 32], strides = [1, 1]} : vector<1x128xf32> to vector<1x32xf32>
      %81 = arith.mulf %78, %57 : vector<1x32xf32>
      %82 = arith.mulf %77, %80 : vector<1x32xf32>
      %83 = arith.addf %81, %82 : vector<1x32xf32>
      %84 = math.tanh %83 : vector<1x32xf32>
      %85 = arith.mulf %79, %84 : vector<1x32xf32>
      %86 = arith.truncf %85 : vector<1x32xf32> to vector<1x32xbf16>
      %87 = arith.index_cast %66 : i32 to index
      %c0_55 = arith.constant 0 : index
      %c0_56 = arith.constant 0 : index
      %88 = vector.load %arg16[%87, %c0_55, %c0_56] : memref<250x32x128xbf16, #tpu.memory_space<vmem>>, vector<1x32x128xbf16>
      %89 = vector.shape_cast %88 : vector<1x32x128xbf16> to vector<32x128xbf16>
      %cst_57 = arith.constant dense<0.000000e+00> : vector<1x128xf32>
      %90 = tpu.matmul %86, %89, %cst_57 {dimension_numbers = #tpu.dot_dimension_numbers<[1], [0], [0], [1], [0, 0, 1, 1], [], []>} : vector<1x32xbf16>, vector<32x128xbf16>, vector<1x128xf32> -> vector<1x128xf32>
      %91 = arith.addf %65, %90 : vector<1x128xf32>
      %c2_i32 = arith.constant 2 : i32
      %92 = arith.addi %39, %c2_i32 : i32
      %93 = arith.index_cast %92 : i32 to index
      %c0_58 = arith.constant 0 : index
      %94 = vector.load %arg14[%93, %c0_58] : memref<250x128xf32, #tpu.memory_space<vmem>>, vector<1x128xf32>
      %cst_59 = arith.constant dense<0.000000e+00> : vector<1x128xf32>
      %95 = tpu.matmul %85, %19, %cst_59 {dimension_numbers = #tpu.dot_dimension_numbers<[1], [0], [0], [1], [0, 0, 1, 1], [], []>} : vector<1x32xf32>, vector<32x128xf32>, vector<1x128xf32> -> vector<1x128xf32>
      %96 = arith.addf %94, %95 : vector<1x128xf32>
      %97 = arith.negf %96 : vector<1x128xf32>
      %98 = math.exp %97 : vector<1x128xf32>
      %cst_60 = arith.constant 1.000000e+00 : f32
      %99 = vector.broadcast %cst_60 : f32 to vector<1x128xf32>
      %100 = arith.addf %99, %98 : vector<1x128xf32>
      %101 = arith.divf %99, %100 : vector<1x128xf32>
      %102 = math.tanh %96 : vector<1x128xf32>
      %103 = vector.extract_strided_slice %101 {offsets = [0, 0], sizes = [1, 32], strides = [1, 1]} : vector<1x128xf32> to vector<1x32xf32>
      %104 = vector.extract_strided_slice %101 {offsets = [0, 32], sizes = [1, 32], strides = [1, 1]} : vector<1x128xf32> to vector<1x32xf32>
      %105 = vector.extract_strided_slice %101 {offsets = [0, 96], sizes = [1, 32], strides = [1, 1]} : vector<1x128xf32> to vector<1x32xf32>
      %106 = vector.extract_strided_slice %102 {offsets = [0, 64], sizes = [1, 32], strides = [1, 1]} : vector<1x128xf32> to vector<1x32xf32>
      %107 = arith.mulf %104, %83 : vector<1x32xf32>
      %108 = arith.mulf %103, %106 : vector<1x32xf32>
      %109 = arith.addf %107, %108 : vector<1x32xf32>
      %110 = math.tanh %109 : vector<1x32xf32>
      %111 = arith.mulf %105, %110 : vector<1x32xf32>
      %112 = arith.truncf %111 : vector<1x32xf32> to vector<1x32xbf16>
      %113 = arith.index_cast %92 : i32 to index
      %c0_61 = arith.constant 0 : index
      %c0_62 = arith.constant 0 : index
      %114 = vector.load %arg16[%113, %c0_61, %c0_62] : memref<250x32x128xbf16, #tpu.memory_space<vmem>>, vector<1x32x128xbf16>
      %115 = vector.shape_cast %114 : vector<1x32x128xbf16> to vector<32x128xbf16>
      %cst_63 = arith.constant dense<0.000000e+00> : vector<1x128xf32>
      %116 = tpu.matmul %112, %115, %cst_63 {dimension_numbers = #tpu.dot_dimension_numbers<[1], [0], [0], [1], [0, 0, 1, 1], [], []>} : vector<1x32xbf16>, vector<32x128xbf16>, vector<1x128xf32> -> vector<1x128xf32>
      %117 = arith.addf %91, %116 : vector<1x128xf32>
      %c3_i32 = arith.constant 3 : i32
      %118 = arith.addi %39, %c3_i32 : i32
      %119 = arith.index_cast %118 : i32 to index
      %c0_64 = arith.constant 0 : index
      %120 = vector.load %arg14[%119, %c0_64] : memref<250x128xf32, #tpu.memory_space<vmem>>, vector<1x128xf32>
      %cst_65 = arith.constant dense<0.000000e+00> : vector<1x128xf32>
      %121 = tpu.matmul %111, %19, %cst_65 {dimension_numbers = #tpu.dot_dimension_numbers<[1], [0], [0], [1], [0, 0, 1, 1], [], []>} : vector<1x32xf32>, vector<32x128xf32>, vector<1x128xf32> -> vector<1x128xf32>
      %122 = arith.addf %120, %121 : vector<1x128xf32>
      %123 = arith.negf %122 : vector<1x128xf32>
      %124 = math.exp %123 : vector<1x128xf32>
      %cst_66 = arith.constant 1.000000e+00 : f32
      %125 = vector.broadcast %cst_66 : f32 to vector<1x128xf32>
      %126 = arith.addf %125, %124 : vector<1x128xf32>
      %127 = arith.divf %125, %126 : vector<1x128xf32>
      %128 = math.tanh %122 : vector<1x128xf32>
      %129 = vector.extract_strided_slice %127 {offsets = [0, 0], sizes = [1, 32], strides = [1, 1]} : vector<1x128xf32> to vector<1x32xf32>
      %130 = vector.extract_strided_slice %127 {offsets = [0, 32], sizes = [1, 32], strides = [1, 1]} : vector<1x128xf32> to vector<1x32xf32>
      %131 = vector.extract_strided_slice %127 {offsets = [0, 96], sizes = [1, 32], strides = [1, 1]} : vector<1x128xf32> to vector<1x32xf32>
      %132 = vector.extract_strided_slice %128 {offsets = [0, 64], sizes = [1, 32], strides = [1, 1]} : vector<1x128xf32> to vector<1x32xf32>
      %133 = arith.mulf %130, %109 : vector<1x32xf32>
      %134 = arith.mulf %129, %132 : vector<1x32xf32>
      %135 = arith.addf %133, %134 : vector<1x32xf32>
      %136 = math.tanh %135 : vector<1x32xf32>
      %137 = arith.mulf %131, %136 : vector<1x32xf32>
      %138 = arith.truncf %137 : vector<1x32xf32> to vector<1x32xbf16>
      %139 = arith.index_cast %118 : i32 to index
      %c0_67 = arith.constant 0 : index
      %c0_68 = arith.constant 0 : index
      %140 = vector.load %arg16[%139, %c0_67, %c0_68] : memref<250x32x128xbf16, #tpu.memory_space<vmem>>, vector<1x32x128xbf16>
      %141 = vector.shape_cast %140 : vector<1x32x128xbf16> to vector<32x128xbf16>
      %cst_69 = arith.constant dense<0.000000e+00> : vector<1x128xf32>
      %142 = tpu.matmul %138, %141, %cst_69 {dimension_numbers = #tpu.dot_dimension_numbers<[1], [0], [0], [1], [0, 0, 1, 1], [], []>} : vector<1x32xbf16>, vector<32x128xbf16>, vector<1x128xf32> -> vector<1x128xf32>
      %143 = arith.addf %117, %142 : vector<1x128xf32>
      %c4_i32 = arith.constant 4 : i32
      %144 = arith.addi %39, %c4_i32 : i32
      %145 = arith.index_cast %144 : i32 to index
      %c0_70 = arith.constant 0 : index
      %146 = vector.load %arg14[%145, %c0_70] : memref<250x128xf32, #tpu.memory_space<vmem>>, vector<1x128xf32>
      %cst_71 = arith.constant dense<0.000000e+00> : vector<1x128xf32>
      %147 = tpu.matmul %137, %19, %cst_71 {dimension_numbers = #tpu.dot_dimension_numbers<[1], [0], [0], [1], [0, 0, 1, 1], [], []>} : vector<1x32xf32>, vector<32x128xf32>, vector<1x128xf32> -> vector<1x128xf32>
      %148 = arith.addf %146, %147 : vector<1x128xf32>
      %149 = arith.negf %148 : vector<1x128xf32>
      %150 = math.exp %149 : vector<1x128xf32>
      %cst_72 = arith.constant 1.000000e+00 : f32
      %151 = vector.broadcast %cst_72 : f32 to vector<1x128xf32>
      %152 = arith.addf %151, %150 : vector<1x128xf32>
      %153 = arith.divf %151, %152 : vector<1x128xf32>
      %154 = math.tanh %148 : vector<1x128xf32>
      %155 = vector.extract_strided_slice %153 {offsets = [0, 0], sizes = [1, 32], strides = [1, 1]} : vector<1x128xf32> to vector<1x32xf32>
      %156 = vector.extract_strided_slice %153 {offsets = [0, 32], sizes = [1, 32], strides = [1, 1]} : vector<1x128xf32> to vector<1x32xf32>
      %157 = vector.extract_strided_slice %153 {offsets = [0, 96], sizes = [1, 32], strides = [1, 1]} : vector<1x128xf32> to vector<1x32xf32>
      %158 = vector.extract_strided_slice %154 {offsets = [0, 64], sizes = [1, 32], strides = [1, 1]} : vector<1x128xf32> to vector<1x32xf32>
      %159 = arith.mulf %156, %135 : vector<1x32xf32>
      %160 = arith.mulf %155, %158 : vector<1x32xf32>
      %161 = arith.addf %159, %160 : vector<1x32xf32>
      %162 = math.tanh %161 : vector<1x32xf32>
      %163 = arith.mulf %157, %162 : vector<1x32xf32>
      %164 = arith.truncf %163 : vector<1x32xf32> to vector<1x32xbf16>
      %165 = arith.index_cast %144 : i32 to index
      %c0_73 = arith.constant 0 : index
      %c0_74 = arith.constant 0 : index
      %166 = vector.load %arg16[%165, %c0_73, %c0_74] : memref<250x32x128xbf16, #tpu.memory_space<vmem>>, vector<1x32x128xbf16>
      %167 = vector.shape_cast %166 : vector<1x32x128xbf16> to vector<32x128xbf16>
      %cst_75 = arith.constant dense<0.000000e+00> : vector<1x128xf32>
      %168 = tpu.matmul %164, %167, %cst_75 {dimension_numbers = #tpu.dot_dimension_numbers<[1], [0], [0], [1], [0, 0, 1, 1], [], []>} : vector<1x32xbf16>, vector<32x128xbf16>, vector<1x128xf32> -> vector<1x128xf32>
      %169 = arith.addf %143, %168 : vector<1x128xf32>
      %c5_i32 = arith.constant 5 : i32
      %170 = arith.addi %39, %c5_i32 : i32
      %171 = arith.index_cast %170 : i32 to index
      %c0_76 = arith.constant 0 : index
      %172 = vector.load %arg14[%171, %c0_76] : memref<250x128xf32, #tpu.memory_space<vmem>>, vector<1x128xf32>
      %cst_77 = arith.constant dense<0.000000e+00> : vector<1x128xf32>
      %173 = tpu.matmul %163, %19, %cst_77 {dimension_numbers = #tpu.dot_dimension_numbers<[1], [0], [0], [1], [0, 0, 1, 1], [], []>} : vector<1x32xf32>, vector<32x128xf32>, vector<1x128xf32> -> vector<1x128xf32>
      %174 = arith.addf %172, %173 : vector<1x128xf32>
      %175 = arith.negf %174 : vector<1x128xf32>
      %176 = math.exp %175 : vector<1x128xf32>
      %cst_78 = arith.constant 1.000000e+00 : f32
      %177 = vector.broadcast %cst_78 : f32 to vector<1x128xf32>
      %178 = arith.addf %177, %176 : vector<1x128xf32>
      %179 = arith.divf %177, %178 : vector<1x128xf32>
      %180 = math.tanh %174 : vector<1x128xf32>
      %181 = vector.extract_strided_slice %179 {offsets = [0, 0], sizes = [1, 32], strides = [1, 1]} : vector<1x128xf32> to vector<1x32xf32>
      %182 = vector.extract_strided_slice %179 {offsets = [0, 32], sizes = [1, 32], strides = [1, 1]} : vector<1x128xf32> to vector<1x32xf32>
      %183 = vector.extract_strided_slice %179 {offsets = [0, 96], sizes = [1, 32], strides = [1, 1]} : vector<1x128xf32> to vector<1x32xf32>
      %184 = vector.extract_strided_slice %180 {offsets = [0, 64], sizes = [1, 32], strides = [1, 1]} : vector<1x128xf32> to vector<1x32xf32>
      %185 = arith.mulf %182, %161 : vector<1x32xf32>
      %186 = arith.mulf %181, %184 : vector<1x32xf32>
      %187 = arith.addf %185, %186 : vector<1x32xf32>
      %188 = math.tanh %187 : vector<1x32xf32>
      %189 = arith.mulf %183, %188 : vector<1x32xf32>
      %190 = arith.truncf %189 : vector<1x32xf32> to vector<1x32xbf16>
      %191 = arith.index_cast %170 : i32 to index
      %c0_79 = arith.constant 0 : index
      %c0_80 = arith.constant 0 : index
      %192 = vector.load %arg16[%191, %c0_79, %c0_80] : memref<250x32x128xbf16, #tpu.memory_space<vmem>>, vector<1x32x128xbf16>
      %193 = vector.shape_cast %192 : vector<1x32x128xbf16> to vector<32x128xbf16>
      %cst_81 = arith.constant dense<0.000000e+00> : vector<1x128xf32>
      %194 = tpu.matmul %190, %193, %cst_81 {dimension_numbers = #tpu.dot_dimension_numbers<[1], [0], [0], [1], [0, 0, 1, 1], [], []>} : vector<1x32xbf16>, vector<32x128xbf16>, vector<1x128xf32> -> vector<1x128xf32>
      %195 = arith.addf %169, %194 : vector<1x128xf32>
      %c6_i32 = arith.constant 6 : i32
      %196 = arith.addi %39, %c6_i32 : i32
      %197 = arith.index_cast %196 : i32 to index
      %c0_82 = arith.constant 0 : index
      %198 = vector.load %arg14[%197, %c0_82] : memref<250x128xf32, #tpu.memory_space<vmem>>, vector<1x128xf32>
      %cst_83 = arith.constant dense<0.000000e+00> : vector<1x128xf32>
      %199 = tpu.matmul %189, %19, %cst_83 {dimension_numbers = #tpu.dot_dimension_numbers<[1], [0], [0], [1], [0, 0, 1, 1], [], []>} : vector<1x32xf32>, vector<32x128xf32>, vector<1x128xf32> -> vector<1x128xf32>
      %200 = arith.addf %198, %199 : vector<1x128xf32>
      %201 = arith.negf %200 : vector<1x128xf32>
      %202 = math.exp %201 : vector<1x128xf32>
      %cst_84 = arith.constant 1.000000e+00 : f32
      %203 = vector.broadcast %cst_84 : f32 to vector<1x128xf32>
      %204 = arith.addf %203, %202 : vector<1x128xf32>
      %205 = arith.divf %203, %204 : vector<1x128xf32>
      %206 = math.tanh %200 : vector<1x128xf32>
      %207 = vector.extract_strided_slice %205 {offsets = [0, 0], sizes = [1, 32], strides = [1, 1]} : vector<1x128xf32> to vector<1x32xf32>
      %208 = vector.extract_strided_slice %205 {offsets = [0, 32], sizes = [1, 32], strides = [1, 1]} : vector<1x128xf32> to vector<1x32xf32>
      %209 = vector.extract_strided_slice %205 {offsets = [0, 96], sizes = [1, 32], strides = [1, 1]} : vector<1x128xf32> to vector<1x32xf32>
      %210 = vector.extract_strided_slice %206 {offsets = [0, 64], sizes = [1, 32], strides = [1, 1]} : vector<1x128xf32> to vector<1x32xf32>
      %211 = arith.mulf %208, %187 : vector<1x32xf32>
      %212 = arith.mulf %207, %210 : vector<1x32xf32>
      %213 = arith.addf %211, %212 : vector<1x32xf32>
      %214 = math.tanh %213 : vector<1x32xf32>
      %215 = arith.mulf %209, %214 : vector<1x32xf32>
      %216 = arith.truncf %215 : vector<1x32xf32> to vector<1x32xbf16>
      %217 = arith.index_cast %196 : i32 to index
      %c0_85 = arith.constant 0 : index
      %c0_86 = arith.constant 0 : index
      %218 = vector.load %arg16[%217, %c0_85, %c0_86] : memref<250x32x128xbf16, #tpu.memory_space<vmem>>, vector<1x32x128xbf16>
      %219 = vector.shape_cast %218 : vector<1x32x128xbf16> to vector<32x128xbf16>
      %cst_87 = arith.constant dense<0.000000e+00> : vector<1x128xf32>
      %220 = tpu.matmul %216, %219, %cst_87 {dimension_numbers = #tpu.dot_dimension_numbers<[1], [0], [0], [1], [0, 0, 1, 1], [], []>} : vector<1x32xbf16>, vector<32x128xbf16>, vector<1x128xf32> -> vector<1x128xf32>
      %221 = arith.addf %195, %220 : vector<1x128xf32>
      %c7_i32 = arith.constant 7 : i32
      %222 = arith.addi %39, %c7_i32 : i32
      %223 = arith.index_cast %222 : i32 to index
      %c0_88 = arith.constant 0 : index
      %224 = vector.load %arg14[%223, %c0_88] : memref<250x128xf32, #tpu.memory_space<vmem>>, vector<1x128xf32>
      %cst_89 = arith.constant dense<0.000000e+00> : vector<1x128xf32>
      %225 = tpu.matmul %215, %19, %cst_89 {dimension_numbers = #tpu.dot_dimension_numbers<[1], [0], [0], [1], [0, 0, 1, 1], [], []>} : vector<1x32xf32>, vector<32x128xf32>, vector<1x128xf32> -> vector<1x128xf32>
      %226 = arith.addf %224, %225 : vector<1x128xf32>
      %227 = arith.negf %226 : vector<1x128xf32>
      %228 = math.exp %227 : vector<1x128xf32>
      %cst_90 = arith.constant 1.000000e+00 : f32
      %229 = vector.broadcast %cst_90 : f32 to vector<1x128xf32>
      %230 = arith.addf %229, %228 : vector<1x128xf32>
      %231 = arith.divf %229, %230 : vector<1x128xf32>
      %232 = math.tanh %226 : vector<1x128xf32>
      %233 = vector.extract_strided_slice %231 {offsets = [0, 0], sizes = [1, 32], strides = [1, 1]} : vector<1x128xf32> to vector<1x32xf32>
      %234 = vector.extract_strided_slice %231 {offsets = [0, 32], sizes = [1, 32], strides = [1, 1]} : vector<1x128xf32> to vector<1x32xf32>
      %235 = vector.extract_strided_slice %231 {offsets = [0, 96], sizes = [1, 32], strides = [1, 1]} : vector<1x128xf32> to vector<1x32xf32>
      %236 = vector.extract_strided_slice %232 {offsets = [0, 64], sizes = [1, 32], strides = [1, 1]} : vector<1x128xf32> to vector<1x32xf32>
      %237 = arith.mulf %234, %213 : vector<1x32xf32>
      %238 = arith.mulf %233, %236 : vector<1x32xf32>
      %239 = arith.addf %237, %238 : vector<1x32xf32>
      %240 = math.tanh %239 : vector<1x32xf32>
      %241 = arith.mulf %235, %240 : vector<1x32xf32>
      %242 = arith.truncf %241 : vector<1x32xf32> to vector<1x32xbf16>
      %243 = arith.index_cast %222 : i32 to index
      %c0_91 = arith.constant 0 : index
      %c0_92 = arith.constant 0 : index
      %244 = vector.load %arg16[%243, %c0_91, %c0_92] : memref<250x32x128xbf16, #tpu.memory_space<vmem>>, vector<1x32x128xbf16>
      %245 = vector.shape_cast %244 : vector<1x32x128xbf16> to vector<32x128xbf16>
      %cst_93 = arith.constant dense<0.000000e+00> : vector<1x128xf32>
      %246 = tpu.matmul %242, %245, %cst_93 {dimension_numbers = #tpu.dot_dimension_numbers<[1], [0], [0], [1], [0, 0, 1, 1], [], []>} : vector<1x32xbf16>, vector<32x128xbf16>, vector<1x128xf32> -> vector<1x128xf32>
      %247 = arith.addf %221, %246 : vector<1x128xf32>
      %c8_i32 = arith.constant 8 : i32
      %248 = arith.addi %39, %c8_i32 : i32
      %249 = arith.index_cast %248 : i32 to index
      %c0_94 = arith.constant 0 : index
      %250 = vector.load %arg14[%249, %c0_94] : memref<250x128xf32, #tpu.memory_space<vmem>>, vector<1x128xf32>
      %cst_95 = arith.constant dense<0.000000e+00> : vector<1x128xf32>
      %251 = tpu.matmul %241, %19, %cst_95 {dimension_numbers = #tpu.dot_dimension_numbers<[1], [0], [0], [1], [0, 0, 1, 1], [], []>} : vector<1x32xf32>, vector<32x128xf32>, vector<1x128xf32> -> vector<1x128xf32>
      %252 = arith.addf %250, %251 : vector<1x128xf32>
      %253 = arith.negf %252 : vector<1x128xf32>
      %254 = math.exp %253 : vector<1x128xf32>
      %cst_96 = arith.constant 1.000000e+00 : f32
      %255 = vector.broadcast %cst_96 : f32 to vector<1x128xf32>
      %256 = arith.addf %255, %254 : vector<1x128xf32>
      %257 = arith.divf %255, %256 : vector<1x128xf32>
      %258 = math.tanh %252 : vector<1x128xf32>
      %259 = vector.extract_strided_slice %257 {offsets = [0, 0], sizes = [1, 32], strides = [1, 1]} : vector<1x128xf32> to vector<1x32xf32>
      %260 = vector.extract_strided_slice %257 {offsets = [0, 32], sizes = [1, 32], strides = [1, 1]} : vector<1x128xf32> to vector<1x32xf32>
      %261 = vector.extract_strided_slice %257 {offsets = [0, 96], sizes = [1, 32], strides = [1, 1]} : vector<1x128xf32> to vector<1x32xf32>
      %262 = vector.extract_strided_slice %258 {offsets = [0, 64], sizes = [1, 32], strides = [1, 1]} : vector<1x128xf32> to vector<1x32xf32>
      %263 = arith.mulf %260, %239 : vector<1x32xf32>
      %264 = arith.mulf %259, %262 : vector<1x32xf32>
      %265 = arith.addf %263, %264 : vector<1x32xf32>
      %266 = math.tanh %265 : vector<1x32xf32>
      %267 = arith.mulf %261, %266 : vector<1x32xf32>
      %268 = arith.truncf %267 : vector<1x32xf32> to vector<1x32xbf16>
      %269 = arith.index_cast %248 : i32 to index
      %c0_97 = arith.constant 0 : index
      %c0_98 = arith.constant 0 : index
      %270 = vector.load %arg16[%269, %c0_97, %c0_98] : memref<250x32x128xbf16, #tpu.memory_space<vmem>>, vector<1x32x128xbf16>
      %271 = vector.shape_cast %270 : vector<1x32x128xbf16> to vector<32x128xbf16>
      %cst_99 = arith.constant dense<0.000000e+00> : vector<1x128xf32>
      %272 = tpu.matmul %268, %271, %cst_99 {dimension_numbers = #tpu.dot_dimension_numbers<[1], [0], [0], [1], [0, 0, 1, 1], [], []>} : vector<1x32xbf16>, vector<32x128xbf16>, vector<1x128xf32> -> vector<1x128xf32>
      %273 = arith.addf %247, %272 : vector<1x128xf32>
      %c9_i32 = arith.constant 9 : i32
      %274 = arith.addi %39, %c9_i32 : i32
      %275 = arith.index_cast %274 : i32 to index
      %c0_100 = arith.constant 0 : index
      %276 = vector.load %arg14[%275, %c0_100] : memref<250x128xf32, #tpu.memory_space<vmem>>, vector<1x128xf32>
      %cst_101 = arith.constant dense<0.000000e+00> : vector<1x128xf32>
      %277 = tpu.matmul %267, %19, %cst_101 {dimension_numbers = #tpu.dot_dimension_numbers<[1], [0], [0], [1], [0, 0, 1, 1], [], []>} : vector<1x32xf32>, vector<32x128xf32>, vector<1x128xf32> -> vector<1x128xf32>
      %278 = arith.addf %276, %277 : vector<1x128xf32>
      %279 = arith.negf %278 : vector<1x128xf32>
      %280 = math.exp %279 : vector<1x128xf32>
      %cst_102 = arith.constant 1.000000e+00 : f32
      %281 = vector.broadcast %cst_102 : f32 to vector<1x128xf32>
      %282 = arith.addf %281, %280 : vector<1x128xf32>
      %283 = arith.divf %281, %282 : vector<1x128xf32>
      %284 = math.tanh %278 : vector<1x128xf32>
      %285 = vector.extract_strided_slice %283 {offsets = [0, 0], sizes = [1, 32], strides = [1, 1]} : vector<1x128xf32> to vector<1x32xf32>
      %286 = vector.extract_strided_slice %283 {offsets = [0, 32], sizes = [1, 32], strides = [1, 1]} : vector<1x128xf32> to vector<1x32xf32>
      %287 = vector.extract_strided_slice %283 {offsets = [0, 96], sizes = [1, 32], strides = [1, 1]} : vector<1x128xf32> to vector<1x32xf32>
      %288 = vector.extract_strided_slice %284 {offsets = [0, 64], sizes = [1, 32], strides = [1, 1]} : vector<1x128xf32> to vector<1x32xf32>
      %289 = arith.mulf %286, %265 : vector<1x32xf32>
      %290 = arith.mulf %285, %288 : vector<1x32xf32>
      %291 = arith.addf %289, %290 : vector<1x32xf32>
      %292 = math.tanh %291 : vector<1x32xf32>
      %293 = arith.mulf %287, %292 : vector<1x32xf32>
      %294 = arith.truncf %293 : vector<1x32xf32> to vector<1x32xbf16>
      %295 = arith.index_cast %274 : i32 to index
      %c0_103 = arith.constant 0 : index
      %c0_104 = arith.constant 0 : index
      %296 = vector.load %arg16[%295, %c0_103, %c0_104] : memref<250x32x128xbf16, #tpu.memory_space<vmem>>, vector<1x32x128xbf16>
      %297 = vector.shape_cast %296 : vector<1x32x128xbf16> to vector<32x128xbf16>
      %cst_105 = arith.constant dense<0.000000e+00> : vector<1x128xf32>
      %298 = tpu.matmul %294, %297, %cst_105 {dimension_numbers = #tpu.dot_dimension_numbers<[1], [0], [0], [1], [0, 0, 1, 1], [], []>} : vector<1x32xbf16>, vector<32x128xbf16>, vector<1x128xf32> -> vector<1x128xf32>
      %299 = arith.addf %273, %298 : vector<1x128xf32>
      scf.yield %293, %291, %299 : vector<1x32xf32>, vector<1x32xf32>, vector<1x128xf32>
    }
    %c25_i32_32 = arith.constant 25 : i32
    %c0_33 = arith.constant 0 : index
    %c0_34 = arith.constant 0 : index
    %25 = vector.load %arg9[%c0_33, %c0_34] : memref<1x128xf32, #tpu.memory_space<vmem>>, vector<1x128xf32>
    %26 = arith.addf %24#2, %25 : vector<1x128xf32>
    %cst_35 = arith.constant 0.000000e+00 : f32
    %27 = vector.broadcast %cst_35 : f32 to vector<1x128xf32>
    %28 = arith.maximumf %26, %27 : vector<1x128xf32>
    %c0_36 = arith.constant 0 : index
    %c0_37 = arith.constant 0 : index
    %29 = vector.load %arg10[%c0_36, %c0_37] : memref<128x4xf32, #tpu.memory_space<vmem>>, vector<128x4xf32>
    %cst_38 = arith.constant dense<0.000000e+00> : vector<1x4xf32>
    %30 = tpu.matmul %28, %29, %cst_38 {dimension_numbers = #tpu.dot_dimension_numbers<[1], [0], [0], [1], [0, 0, 1, 1], [], []>} : vector<1x128xf32>, vector<128x4xf32>, vector<1x4xf32> -> vector<1x4xf32>
    %c0_39 = arith.constant 0 : index
    %c0_40 = arith.constant 0 : index
    %31 = vector.load %arg11[%c0_39, %c0_40] : memref<1x4xf32, #tpu.memory_space<vmem>>, vector<1x4xf32>
    %32 = arith.addf %30, %31 : vector<1x4xf32>
    %33 = arith.negf %32 : vector<1x4xf32>
    %34 = math.exp %33 : vector<1x4xf32>
    %cst_41 = arith.constant 1.000000e+00 : f32
    %35 = vector.broadcast %cst_41 : f32 to vector<1x4xf32>
    %36 = arith.addf %35, %34 : vector<1x4xf32>
    %37 = arith.divf %35, %36 : vector<1x4xf32>
    %c0_42 = arith.constant 0 : index
    %c0_43 = arith.constant 0 : index
    %38 = vector.load %arg13[%c0_42, %c0_43] : memref<1x4xf32, #tpu.memory_space<vmem>>, vector<1x4xf32>
    tpu.vector_store %arg13[%c0_42, %c0_43], %37 {strides = array<i32>} : memref<1x4xf32, #tpu.memory_space<vmem>>, vector<1x4xf32>,
    return
  }
}

</mosaic_0001>

<bundles_post_ra>
// kernel: tpu_custom_call.1
= control target key start
LH: loop header
LB: loop body
LE: loop exit
PB: predicated region body
PF: predicated region fallthrough
CT: control target
= control target key end

     0   :  { %18 = vsyncpa [#allocation7], 0  ;;  %s6561_s0 = inlined_call_operand.vmem [shape: f32[250,16], index: 0, kind: input, shape index: {}]   ;;  %s6562_s1 = inlined_call_operand.hbm [shape: f32[16,128], index: 1, kind: input, shape index: {}]   ;;  %s6563_s2 = inlined_call_operand.hbm [shape: f32[32,128], index: 2, kind: input, shape index: {}]   ;;  %s6564_s3 = inlined_call_operand.hbm [shape: f32[1,128], index: 3, kind: input, shape index: {}]   ;;  %s6565_s4 = inlined_call_operand.hbm [shape: f32[32,128], index: 4, kind: input, shape index: {}]   ;;  %s6566_s5 = inlined_call_operand.hbm [shape: f32[32,128], index: 5, kind: input, shape index: {}]   ;;  %s6567_s6 = inlined_call_operand.hbm [shape: f32[1,128], index: 6, kind: input, shape index: {}]   ;;  %s6568_s7 = inlined_call_operand.hbm [shape: f32[2,32], index: 7, kind: input, shape index: {}]   ;;  %s6569_s8 = inlined_call_operand.hbm [shape: f32[2,32], index: 8, kind: input, shape index: {}]   ;;  %s6570_s9 = inlined_call_operand.hbm [shape: f32[1,128], index: 9, kind: input, shape index: {}]   ;;  %s6571_s10 = inlined_call_operand.vmem [shape: f32[128,4], index: 10, kind: input, shape index: {}]   ;;  %s6572_s11 = inlined_call_operand.hbm [shape: f32[1,4], index: 11, kind: input, shape index: {}]   ;;  %s6573_s12 = inlined_call_operand.hbm [shape: bf16[250,32,128], index: 12, kind: input, shape index: {}]   ;;  %s6574_s13 = inlined_call_operand.hbm [shape: f32[1,4], index: 13, kind: output, shape index: {}]  }
   0x1   :  { %19 = vsyncpa [#allocation10], 0 }
   0x2   :  { %20 = vsyncpa [#allocation13], 0 }
   0x3   :  { %21 = vsyncpa [#allocation16], 0 }
   0x4   :  { %22 = vsyncpa [#allocation19], 0 }
   0x5   :  { %23 = vsyncpa [#allocation22], 0 }
   0x6   :  { %24 = vsyncpa [#allocation8], 0  ;;  %s5539_s25 = smov [#allocation9]   ;;  %s5540_s27 = smov [#allocation12]  }
   0x7   :  { %s44_s26 = sshll.u32 %s5539_s25, 4  ;;  %s66_s28 = sshll.u32 %s5540_s27, 4  ;;  %s45_s26 = int_to_ptr.vmem [resolvable:$true] %s44_s26  ;;  %s5638_s28 = int_to_ptr.vmem [resolvable:$true] %s66_s28 }
   0x8   :  { %s5203_s14 = scalar_lea.hbm %s6563_s2, 512 }
   0x9   :  { %p5204_p0 = scmp.ne.s32.totalorder %s6563_s2, %s5203_s14  ;;  %p5207_p1 = scmp.lt.u32.totalorder %s5203_s14, %s6563_s2 }
   0xb   :  { %p5209_p2 = pnand %p5207_p1, %p5204_p0 }
   0xd   :  { %5212 = shalt.err (!%p5209_p2)
}
   0xe   :  { %s5213_s19 = scalar_lea.vmem %s45_s26, 512  ;;  %p5218_p4 = scmp.lt.s32.totalorder %s45_s26, %s45_s26 }
   0xf   :  { %p5214_p3 = scmp.ne.s32.totalorder %s45_s26, %s5213_s19  ;;  %p5219_p5 = scmp.lt.s32.totalorder %s5213_s19, %s5213_s19 }
  0x11   :  { %p5220_p6 = por %p5219_p5, %p5218_p4 }
  0x13   :  { %p5221_p7 = pnand %p5220_p6, %p5214_p3 }
  0x15   :  { %5224 = shalt.err (!%p5221_p7)
}
  0x16   :  { %s5541_s20 = smov 128   ;;  %s5542_s21 = smov 8  }
  0x17   :  { %50 = dma.hbm_to_vmem [thread:$0]  %s6563_s2, 512, %s45_s26, [#allocation10], %s5541_s20, %s5541_s20, %s5542_s21  }
  0x18   :  { %s5225_s27 = scalar_lea.hbm %s6565_s4, 512 }
  0x19   :  { %p5226_p8 = scmp.ne.s32.totalorder %s6565_s4, %s5225_s27  ;;  %p5229_p9 = scmp.lt.u32.totalorder %s5225_s27, %s6565_s4 }
  0x1b   :  { %p5231_p10 = pnand %p5229_p9, %p5226_p8 }
  0x1d   :  { %5234 = shalt.err (!%p5231_p10)
}
  0x1e   :  { %s5235_s16 = scalar_lea.vmem %s5638_s28, 512  ;;  %p5240_p12 = scmp.lt.s32.totalorder %s5638_s28, %s5638_s28 }
  0x1f   :  { %p5236_p11 = scmp.ne.s32.totalorder %s5638_s28, %s5235_s16  ;;  %p5241_p13 = scmp.lt.s32.totalorder %s5235_s16, %s5235_s16 }
  0x21   :  { %p5242_p0 = por %p5241_p13, %p5240_p12 }
  0x23   :  { %p5243_p1 = pnand %p5242_p0, %p5236_p11 }
  0x25   :  { %5246 = shalt.err (!%p5243_p1)
}
  0x26   :  { %72 = dma.hbm_to_vmem [thread:$0]  %s6565_s4, 512, %s5638_s28, [#allocation13], %s5541_s20, %s5541_s20, %s5542_s21  }
  0x27   :  { %s5543_s17 = smov [#allocation15]   ;;  %s5544_s19 = smov [#allocation18]  }
  0x28   :  { %s91_s18 = sshll.u32 %s5543_s17, 4  ;;  %s111_s22 = sshll.u32 %s5544_s19, 4  ;;  %s92_s18 = int_to_ptr.vmem [resolvable:$true] %s91_s18  ;;  %s112_s22 = int_to_ptr.vmem [resolvable:$true] %s111_s22 }
  0x29   :  { %s5247_s25 = scalar_lea.hbm %s6567_s6, 16 }
  0x2a   :  { %p5248_p2 = scmp.ne.s32.totalorder %s6567_s6, %s5247_s25  ;;  %p5251_p3 = scmp.lt.u32.totalorder %s5247_s25, %s6567_s6 }
  0x2c   :  { %p5253_p4 = pnand %p5251_p3, %p5248_p2 }
  0x2e   :  { %5256 = shalt.err (!%p5253_p4)
}
  0x2f   :  { %s5257_s4 = scalar_lea.vmem %s92_s18, 16  ;;  %s5261_s28 = scalar_lea.vmem %s92_s18, 32 }
  0x30   :  { %p5258_p5 = scmp.ne.s32.totalorder %s92_s18, %s5257_s4  ;;  %p5262_p6 = scmp.lt.s32.totalorder %s92_s18, %s92_s18 }
  0x31   :  { %p5263_p7 = scmp.lt.s32.totalorder %s5261_s28, %s5257_s4 }
  0x33   :  { %p5264_p8 = por %p5263_p7, %p5262_p6 }
  0x35   :  { %p5265_p9 = pnand %p5264_p8, %p5258_p5 }
  0x37   :  { %5268 = shalt.err (!%p5265_p9)
}
  0x38   :  { %94 = dma.hbm_to_vmem [thread:$0]  %s6567_s6, 16, %s92_s18, [#allocation16]  }
  0x39   :  { %s5269_s17 = scalar_lea.hbm %s6569_s8, 32 }
  0x3a   :  { %p5270_p10 = scmp.ne.s32.totalorder %s6569_s8, %s5269_s17  ;;  %p5273_p11 = scmp.lt.u32.totalorder %s5269_s17, %s6569_s8 }
  0x3c   :  { %p5275_p12 = pnand %p5273_p11, %p5270_p10 }
  0x3e   :  { %5278 = shalt.err (!%p5275_p12)
}
  0x3f   :  { %s5279_s27 = scalar_lea.vmem %s112_s22, 32  ;;  %p5284_p0 = scmp.lt.s32.totalorder %s112_s22, %s112_s22 }
  0x40   :  { %p5280_p13 = scmp.ne.s32.totalorder %s112_s22, %s5279_s27  ;;  %p5285_p1 = scmp.lt.s32.totalorder %s5279_s27, %s5279_s27 }
  0x42   :  { %p5286_p2 = por %p5285_p1, %p5284_p0 }
  0x44   :  { %p5287_p3 = pnand %p5286_p2, %p5280_p13 }
  0x46   :  { %5290 = shalt.err (!%p5287_p3)
}
  0x47   :  { %114 = dma.hbm_to_vmem [thread:$0]  %s6569_s8, 32, %s112_s22, [#allocation19]  }
  0x48   :  { %s5545_s29 = smov [#allocation6]   ;;  %s5546_s14 = smov [#allocation11]  }
  0x49   :  { %s32_s30 = sshll.u32 %s5545_s29, 4  ;;  %s57_s4 = sshll.u32 %s5546_s14, 4  ;;  %s33_s30 = int_to_ptr.vmem [resolvable:$true] %s32_s30  ;;  %s58_s4 = int_to_ptr.vmem [resolvable:$true] %s57_s4 }
  0x4a   :  { %s5291_s16 = scalar_lea.hbm %s6562_s1, 256 }
  0x4b   :  { %p5292_p4 = scmp.ne.s32.totalorder %s6562_s1, %s5291_s16  ;;  %p5295_p5 = scmp.lt.u32.totalorder %s5291_s16, %s6562_s1 }
  0x4d   :  { %p5297_p6 = pnand %p5295_p5, %p5292_p4 }
  0x4f   :  { %5300 = shalt.err (!%p5297_p6)
}
  0x50   :  { %s5301_s8 = scalar_lea.vmem %s33_s30, 256  ;;  %p5306_p8 = scmp.lt.s32.totalorder %s33_s30, %s33_s30 }
  0x51   :  { %p5302_p7 = scmp.ne.s32.totalorder %s33_s30, %s5301_s8  ;;  %p5307_p9 = scmp.lt.s32.totalorder %s5301_s8, %s5301_s8 }
  0x53   :  { %p5308_p10 = por %p5307_p9, %p5306_p8 }
  0x55   :  { %p5309_p11 = pnand %p5308_p10, %p5302_p7 }
  0x57   :  { %5312 = shalt.err (!%p5309_p11)
}
  0x58   :  { %38 = dma.hbm_to_vmem [thread:$0]  %s6562_s1, 256, %s33_s30, [#allocation7], %s5541_s20, %s5541_s20, %s5542_s21  }
  0x59   :  { %s5313_s27 = scalar_lea.hbm %s6564_s3, 16 }
  0x5a   :  { %p5314_p12 = scmp.ne.s32.totalorder %s6564_s3, %s5313_s27  ;;  %p5317_p13 = scmp.lt.u32.totalorder %s5313_s27, %s6564_s3 }
  0x5c   :  { %p5319_p0 = pnand %p5317_p13, %p5314_p12 }
  0x5e   :  { %5322 = shalt.err (!%p5319_p0)
}
  0x5f   :  { %s5323_s28 = scalar_lea.vmem %s58_s4, 16  ;;  %s5327_s15 = scalar_lea.vmem %s58_s4, 32 }
  0x60   :  { %p5324_p1 = scmp.ne.s32.totalorder %s58_s4, %s5323_s28  ;;  %p5328_p2 = scmp.lt.s32.totalorder %s58_s4, %s58_s4 }
  0x61   :  { %p5329_p3 = scmp.lt.s32.totalorder %s5327_s15, %s5323_s28 }
  0x63   :  { %p5330_p4 = por %p5329_p3, %p5328_p2 }
  0x65   :  { %p5331_p5 = pnand %p5330_p4, %p5324_p1 }
  0x67   :  { %5334 = shalt.err (!%p5331_p5)
}
  0x68   :  { %60 = dma.hbm_to_vmem [thread:$0]  %s6564_s3, 16, %s58_s4, [#allocation10]  }
  0x69   :  { %s5547_s16 = smov [#allocation14]   ;;  %s5548_s26 = smov [#allocation17]  }
  0x6a   :  { %s78_s2 = sshll.u32 %s5547_s16, 4  ;;  %s101_s17 = sshll.u32 %s5548_s26, 4  ;;  %s79_s2 = int_to_ptr.vmem [resolvable:$true] %s78_s2  ;;  %s102_s17 = int_to_ptr.vmem [resolvable:$true] %s101_s17 }
  0x6b   :  { %s5335_s22 = scalar_lea.hbm %s6566_s5, 512 }
  0x6c   :  { %p5336_p6 = scmp.ne.s32.totalorder %s6566_s5, %s5335_s22  ;;  %p5339_p7 = scmp.lt.u32.totalorder %s5335_s22, %s6566_s5 }
  0x6e   :  { %p5341_p8 = pnand %p5339_p7, %p5336_p6 }
  0x70   :  { %5344 = shalt.err (!%p5341_p8)
}
  0x71   :  { %s5345_s3 = scalar_lea.vmem %s79_s2, 512  ;;  %p5350_p10 = scmp.lt.s32.totalorder %s79_s2, %s79_s2 }
  0x72   :  { %p5346_p9 = scmp.ne.s32.totalorder %s79_s2, %s5345_s3  ;;  %p5351_p11 = scmp.lt.s32.totalorder %s5345_s3, %s5345_s3 }
  0x74   :  { %p5352_p12 = por %p5351_p11, %p5350_p10 }
  0x76   :  { %p5353_p13 = pnand %p5352_p12, %p5346_p9 }
  0x78   :  { %5356 = shalt.err (!%p5353_p13)
}
  0x79   :  { %84 = dma.hbm_to_vmem [thread:$0]  %s6566_s5, 512, %s79_s2, [#allocation13], %s5541_s20, %s5541_s20, %s5542_s21  }
  0x7a   :  { %s5357_s14 = scalar_lea.hbm %s6568_s7, 32 }
  0x7b   :  { %p5358_p0 = scmp.ne.s32.totalorder %s6568_s7, %s5357_s14  ;;  %p5361_p1 = scmp.lt.u32.totalorder %s5357_s14, %s6568_s7 }
  0x7d   :  { %p5363_p2 = pnand %p5361_p1, %p5358_p0 }
  0x7f   :  { %5366 = shalt.err (!%p5363_p2)
}
  0x80   :  { %s5367_s16 = scalar_lea.vmem %s102_s17, 32  ;;  %p5372_p4 = scmp.lt.s32.totalorder %s102_s17, %s102_s17 }
  0x81   :  { %p5368_p3 = scmp.ne.s32.totalorder %s102_s17, %s5367_s16  ;;  %p5373_p5 = scmp.lt.s32.totalorder %s5367_s16, %s5367_s16 }
  0x83   :  { %p5374_p6 = por %p5373_p5, %p5372_p4 }
  0x85   :  { %p5375_p7 = pnand %p5374_p6, %p5368_p3 }
  0x87   :  { %5378 = shalt.err (!%p5375_p7)
}
  0x88   :  { %104 = dma.hbm_to_vmem [thread:$0]  %s6568_s7, 32, %s102_s17, [#allocation16]  }
  0x89   :  { %s5549_s21 = smov [#allocation20]   ;;  %s5550_s26 = smov [#allocation21]  }
  0x8a   :  { %s121_s2 = sshll.u32 %s5549_s21, 4  ;;  %s133_s19 = sshll.u32 %s5550_s26, 4  ;;  %s122_s2 = int_to_ptr.vmem [resolvable:$true] %s121_s2  ;;  %s134_s19 = int_to_ptr.vmem [resolvable:$true] %s133_s19 }
  0x8b   :  { %s5379_s23 = scalar_lea.hbm %s6570_s9, 16 }
  0x8c   :  { %p5380_p8 = scmp.ne.s32.totalorder %s6570_s9, %s5379_s23  ;;  %p5383_p9 = scmp.lt.u32.totalorder %s5379_s23, %s6570_s9 }
  0x8e   :  { %p5385_p10 = pnand %p5383_p9, %p5380_p8 }
  0x90   :  { %5388 = shalt.err (!%p5385_p10)
}
  0x91   :  { %s5389_s7 = scalar_lea.vmem %s122_s2, 16  ;;  %s5393_s17 = scalar_lea.vmem %s122_s2, 32 }
  0x92   :  { %p5390_p11 = scmp.ne.s32.totalorder %s122_s2, %s5389_s7  ;;  %p5394_p12 = scmp.lt.s32.totalorder %s122_s2, %s122_s2 }
  0x93   :  { %p5395_p13 = scmp.lt.s32.totalorder %s5393_s17, %s5389_s7 }
  0x95   :  { %p5396_p0 = por %p5395_p13, %p5394_p12 }
  0x97   :  { %p5397_p1 = pnand %p5396_p0, %p5390_p11 }
  0x99   :  { %5400 = shalt.err (!%p5397_p1)
}
  0x9a   :  { %124 = dma.hbm_to_vmem [thread:$0]  %s6570_s9, 16, %s122_s2, [#allocation19]  }
  0x9b   :  { %s5401_s14 = scalar_lea.hbm %s6572_s11, 16 }
  0x9c   :  { %p5402_p2 = scmp.ne.s32.totalorder %s6572_s11, %s5401_s14  ;;  %p5405_p3 = scmp.lt.u32.totalorder %s5401_s14, %s6572_s11 }
  0x9e   :  { %p5407_p4 = pnand %p5405_p3, %p5402_p2 }
  0xa0   :  { %5410 = shalt.err (!%p5407_p4)
}
  0xa1   :  { %s5411_s16 = scalar_lea.vmem %s134_s19, 16  ;;  %s5415_s5 = scalar_lea.vmem %s134_s19, 32 }
  0xa2   :  { %p5412_p5 = scmp.ne.s32.totalorder %s134_s19, %s5411_s16  ;;  %p5416_p6 = scmp.lt.s32.totalorder %s134_s19, %s134_s19 }
  0xa3   :  { %p5417_p7 = scmp.lt.s32.totalorder %s5415_s5, %s5411_s16 }
  0xa5   :  { %p5418_p8 = por %p5417_p7, %p5416_p6 }
  0xa7   :  { %p5419_p9 = pnand %p5418_p8, %p5412_p5 }
  0xa9   :  { %5422 = shalt.err (!%p5419_p9)
}
  0xaa   :  { %136 = dma.hbm_to_vmem [thread:$0]  %s6572_s11, 16, %s134_s19, [#allocation22]  }
  0xab   :  { %5495 = dma.done.wait [#allocation7], 256  }
  0xac   :  { %5496 = vsyncadd [#allocation7], 4294967040 }
  0xad   :  { %5497 = dma.done.wait [#allocation10], 528  }
  0xae   :  { %5498 = vsyncadd [#allocation10], 4294966768 }
  0xaf   :  { %5499 = dma.done.wait [#allocation13], 1024  }
  0xb0   :  { %5500 = vsyncadd [#allocation13], 4294966272 }
  0xb1   :  { %5501 = dma.done.wait [#allocation16], 48  }
  0xb2   :  { %5502 = vsyncadd [#allocation16], 4294967248 }
  0xb3   :  { %5503 = dma.done.wait [#allocation19], 48  }
  0xb4   :  { %5504 = vsyncadd [#allocation19], 4294967248 }
  0xb5   :  { %5505 = dma.done.wait [#allocation22], 16  }
  0xb6   :  { %5506 = vsyncadd [#allocation22], 4294967280  ;;  %v5777_v0 = vld [vmem:[#allocation9] sm:$0xff]  ;;  %v5779_v1 = vld [vmem:[#allocation9 + $0x8] sm:$0xff]  ;;  %vm220_vm0 = vcmask 130048   ;;  %s5551_s27 = smov [#allocation4]  }
  0xb7   :  { %v5781_v2 = vld [vmem:[#allocation9 + $0x10] sm:$0xff]  ;;  %v5783_v3 = vld [vmem:[#allocation9 + $0x18] sm:$0xff]  ;;  %v5785_v4 = vld [vmem:[#allocation17] sm:$0x1]   ;;  %s175_s3 = sshll.u32 %s5551_s27, 4  ;;  %s5423_s4 = scalar_lea.hbm %s6573_s12, 64000  ;;  %s176_s3 = int_to_ptr.vmem [resolvable:$true] %s175_s3 }
  0xb8   :  { %v5787_v5 = vld [vmem:[#allocation18] sm:$0x1]   ;;  %v211_v6 = vld [vmem:[#allocation6] sm:$0xff]  ;;  %v212_v7 = vld [vmem:[#allocation6 + $0x8] sm:$0xff]  ;;  %p5424_p10 = scmp.ne.s32.totalorder %s6573_s12, %s5423_s4  ;;  %p5427_p11 = scmp.lt.u32.totalorder %s5423_s4, %s6573_s12 }
  0xb9   :  { %v179_v8 = vld [vmem:[%s6561_s0] sm:$0xff]  ;;  %v4755_v9 = vpack.c.bf16 %v212_v7, %v211_v6  ;;  %v180_v11 = vld [vmem:[%s6561_s0 + $0x8] sm:$0xff]  ;;  %v181_v13 = vld [vmem:[%s6561_s0 + $0x10] sm:$0xff] }
  0xba   :  { %4316 = vmatprep.mubr.msk.f32.mxu0 %vm220_vm0, %v179_v8  ;;  %v195_v10 = vld [vmem:[%s6561_s0 + $0x80] sm:$0xff]  ;;  %v196_v12 = vld [vmem:[%s6561_s0 + $0x88] sm:$0xff]  ;;  %v197_v14 = vld [vmem:[%s6561_s0 + $0x90] sm:$0xff]  ;;  %p5429_p12 = pnand %p5427_p11, %p5424_p10 }
  0xbb   :  { %4340 = vmatprep.mubr.msk.f32.mxu1 %vm220_vm0, %v195_v10  ;;  %4756 = vmatprep.subr.bf16.mxu0 %v4755_v9  ;;  %v182_v15 = vld [vmem:[%s6561_s0 + $0x18] sm:$0xff]  ;;  %v183_v17 = vld [vmem:[%s6561_s0 + $0x20] sm:$0xff]  ;;  %v184_v19 = vld [vmem:[%s6561_s0 + $0x28] sm:$0xff] }
  0xbc   :  { %4911 = vmatprep.subr.bf16.mxu1 %v4755_v9  ;;  %4758 = vmatpush3.bf16.msra.mxu0 %v4755_v9  ;;  %v198_v16 = vld [vmem:[%s6561_s0 + $0x98] sm:$0xff]  ;;  %v199_v18 = vld [vmem:[%s6561_s0 + $0xa0] sm:$0xff]  ;;  %v200_v20 = vld [vmem:[%s6561_s0 + $0xa8] sm:$0xff] }
  0xbd   :  { %4912 = vmatpush3.bf16.msra.mxu1 %v4755_v9  ;;  %v185_v21 = vld [vmem:[%s6561_s0 + $0x30] sm:$0xff]  ;;  %v186_v23 = vld [vmem:[%s6561_s0 + $0x38] sm:$0xff]  ;;  %v187_v25 = vld [vmem:[%s6561_s0 + $0x40] sm:$0xff] }
  0xbe   :  { %v201_v22 = vld [vmem:[%s6561_s0 + $0xb0] sm:$0xff]  ;;  %v202_v24 = vld [vmem:[%s6561_s0 + $0xb8] sm:$0xff]  ;;  %v203_v26 = vld [vmem:[%s6561_s0 + $0xc0] sm:$0xff] }
  0xbf   :  { %4317 = vmatmul.mubr.msk.f32.vlgmr.msra.gmra.mrb[0].mxu0 %vm220_vm0, %v180_v11  ;;  %v188_v27 = vld [vmem:[%s6561_s0 + $0x48] sm:$0xff]  ;;  %v189_v29 = vld [vmem:[%s6561_s0 + $0x50] sm:$0xff]  ;;  %v190_v31 = vld [vmem:[%s6561_s0 + $0x58] sm:$0xff] }
  0xc0   :  { %4341 = vmatmul.mubr.msk.f32.vlgmr.msra.gmra.mrb[0].mxu1 %vm220_vm0, %v196_v12  ;;  %4319 = vmatprep.mubr.msk.f32.mxu0 %vm220_vm0, %v181_v13  ;;  %v204_v28 = vld [vmem:[%s6561_s0 + $0xc8] sm:$0xff]  ;;  %v205_v30 = vld [vmem:[%s6561_s0 + $0xd0] sm:$0xff]  ;;  %v206_v32 = vld [vmem:[%s6561_s0 + $0xd8] sm:$0xff] }
  0xc1   :  { %4343 = vmatprep.mubr.msk.f32.mxu1 %vm220_vm0, %v197_v14  ;;  %v191_v33 = vld [vmem:[%s6561_s0 + $0x60] sm:$0xff]  ;;  %v192_v35 = vld [vmem:[%s6561_s0 + $0x68] sm:$0xff]  ;;  %v193_v37 = vld [vmem:[%s6561_s0 + $0x70] sm:$0xff] }
  0xc2   :  { %v207_v34 = vld [vmem:[%s6561_s0 + $0xe0] sm:$0xff]  ;;  %v208_v36 = vld [vmem:[%s6561_s0 + $0xe8] sm:$0xff]  ;;  %v209_v38 = vld [vmem:[%s6561_s0 + $0xf0] sm:$0xff] }
  0xc3   :  { %4320 = vmatmul.mubr.msk.f32.gmra.mrb[2].mxu0 %vm220_vm0, %v182_v15  ;;  %v194_v39 = vld [vmem:[%s6561_s0 + $0x78] sm:$0xff] }
  0xc4   :  { %4344 = vmatmul.mubr.msk.f32.gmra.mrb[2].mxu1 %vm220_vm0, %v198_v16  ;;  %4322 = vmatprep.mubr.msk.f32.mxu0 %vm220_vm0, %v183_v17  ;;  %v210_v40 = vld [vmem:[%s6561_s0 + $0xf8] sm:$0x3] }
  0xc5   :  { %4346 = vmatprep.mubr.msk.f32.mxu1 %vm220_vm0, %v199_v18 }
  0xc7   :  { %4323 = vmatmul.mubr.msk.f32.gmra.mrb[4].mxu0 %vm220_vm0, %v184_v19 }
  0xc8   :  { %4347 = vmatmul.mubr.msk.f32.gmra.mrb[4].mxu1 %vm220_vm0, %v200_v20  ;;  %4325 = vmatprep.mubr.msk.f32.mxu0 %vm220_vm0, %v185_v21 }
  0xc9   :  { %4349 = vmatprep.mubr.msk.f32.mxu1 %vm220_vm0, %v201_v22 }
  0xcb   :  { %4326 = vmatmul.mubr.msk.f32.gmra.mrb[6].mxu0 %vm220_vm0, %v186_v23 }
  0xcc   :  { %4350 = vmatmul.mubr.msk.f32.gmra.mrb[6].mxu1 %vm220_vm0, %v202_v24  ;;  %4328 = vmatprep.mubr.msk.f32.mxu0 %vm220_vm0, %v187_v25 }
  0xcd   :  { %4352 = vmatprep.mubr.msk.f32.mxu1 %vm220_vm0, %v203_v26 }
  0xcf   :  { %4329 = vmatmul.mubr.msk.f32.gmra.mrb[8].mxu0 %vm220_vm0, %v188_v27 }
  0xd0   :  { %4353 = vmatmul.mubr.msk.f32.gmra.mrb[8].mxu1 %vm220_vm0, %v204_v28  ;;  %4331 = vmatprep.mubr.msk.f32.mxu0 %vm220_vm0, %v189_v29 }
  0xd1   :  { %4355 = vmatprep.mubr.msk.f32.mxu1 %vm220_vm0, %v205_v30 }
  0xd3   :  { %4332 = vmatmul.mubr.msk.f32.gmra.mrb[10].mxu0 %vm220_vm0, %v190_v31 }
  0xd4   :  { %4356 = vmatmul.mubr.msk.f32.gmra.mrb[10].mxu1 %vm220_vm0, %v206_v32  ;;  %4334 = vmatprep.mubr.msk.f32.mxu0 %vm220_vm0, %v191_v33 }
  0xd5   :  { %4358 = vmatprep.mubr.msk.f32.mxu1 %vm220_vm0, %v207_v34 }
  0xd7   :  { %4335 = vmatmul.mubr.msk.f32.gmra.mrb[12].mxu0 %vm220_vm0, %v192_v35 }
  0xd8   :  { %4359 = vmatmul.mubr.msk.f32.gmra.mrb[12].mxu1 %vm220_vm0, %v208_v36  ;;  %4337 = vmatprep.mubr.msk.f32.mxu0 %vm220_vm0, %v193_v37 }
  0xd9   :  { %4361 = vmatprep.mubr.msk.f32.mxu1 %vm220_vm0, %v209_v38 }
  0xdb   :  { %4338 = vmatmul.mubr.msk.f32.gmra.mrb[14].mxu0 %vm220_vm0, %v194_v39 }
  0xdc   :  { %4362 = vmatmul.mubr.msk.f32.gmra.mrb[14].mxu1 %vm220_vm0, %v210_v40 }
  0xdd   :  { %5432 = shalt.err (!%p5429_p12)  }
  0xde   :  { %s5433_s0 = scalar_lea.vmem %s176_s3, 64000  ;;  %p5438_p0 = scmp.lt.s32.totalorder %s176_s3, %s176_s3 }
  0xdf   :  { %p5434_p13 = scmp.ne.s32.totalorder %s176_s3, %s5433_s0  ;;  %p5439_p1 = scmp.lt.s32.totalorder %s5433_s0, %s5433_s0 }
  0xe1   :  { %p5440_p2 = por %p5439_p1, %p5438_p0 }
  0xe3   :  { %p5441_p3 = pnand %p5440_p2, %p5434_p13 }
  0xe5   :  { %5444 = shalt.err (!%p5441_p3)  }
  0xe6   :  { %178 = dma.hbm_to_vmem [thread:$0]  %s6573_s12, 64000, %s176_s3, [#allocation5]  ;;  %v5929_v41 = vld [vmem:[#allocation11] ss:$0 sm:$0xff] }
  0xe7   :  { %s5969_s12 = smov 0  }
 0x192   :  { %v4318_v42 = vpop.f32.mrb[0].mxu0 }
 0x193   :  { %v4342_v43 = vpop.f32.mrb[0].mxu1  ;;  %v389_v44 = vadd.f32 %v4318_v42, %v5929_v41  ;;  %v383_v46 = vpop.f32.mrb[1].mxu0 }
 0x194   :  { %v469_v45 = vadd.f32 %v4342_v43, %v5929_v41  ;;  %v463_v47 = vpop.f32.mrb[1].mxu1  ;;  %v384_v48 = vadd.f32 %v5929_v41, %v383_v46 }
 0x195   :  { %v464_v49 = vadd.f32 %v5929_v41, %v463_v47  ;;  %543 = vst [vmem:[#allocation2 + $0x8] sm:$0xff] %v389_v44 }
 0x196   :  { %559 = vst [vmem:[#allocation2 + $0x88] sm:$0xff] %v469_v45  ;;  %542 = vst [vmem:[#allocation2] sm:$0xff] %v384_v48  ;;  %v4321_v50 = vpop.f32.mrb[2].mxu0 }
 0x197   :  { %558 = vst [vmem:[#allocation2 + $0x80] sm:$0xff] %v464_v49  ;;  %v4345_v51 = vpop.f32.mrb[2].mxu1  ;;  %v399_v52 = vadd.f32 %v4321_v50, %v5929_v41  ;;  %v393_v54 = vpop.f32.mrb[3].mxu0 }
 0x198   :  { %v479_v53 = vadd.f32 %v4345_v51, %v5929_v41  ;;  %v473_v55 = vpop.f32.mrb[3].mxu1  ;;  %v394_v56 = vadd.f32 %v5929_v41, %v393_v54 }
 0x199   :  { %v474_v57 = vadd.f32 %v5929_v41, %v473_v55  ;;  %545 = vst [vmem:[#allocation2 + $0x18] sm:$0xff] %v399_v52 }
 0x19a   :  { %561 = vst [vmem:[#allocation2 + $0x98] sm:$0xff] %v479_v53  ;;  %544 = vst [vmem:[#allocation2 + $0x10] sm:$0xff] %v394_v56  ;;  %v4324_v58 = vpop.f32.mrb[4].mxu0 }
 0x19b   :  { %560 = vst [vmem:[#allocation2 + $0x90] sm:$0xff] %v474_v57  ;;  %v4348_v59 = vpop.f32.mrb[4].mxu1  ;;  %v409_v60 = vadd.f32 %v4324_v58, %v5929_v41  ;;  %v403_v62 = vpop.f32.mrb[5].mxu0 }
 0x19c   :  { %v489_v61 = vadd.f32 %v4348_v59, %v5929_v41  ;;  %v483_v63 = vpop.f32.mrb[5].mxu1  ;;  %v404_v6 = vadd.f32 %v5929_v41, %v403_v62 }
 0x19d   :  { %v484_v7 = vadd.f32 %v5929_v41, %v483_v63  ;;  %547 = vst [vmem:[#allocation2 + $0x28] sm:$0xff] %v409_v60 }
 0x19e   :  { %563 = vst [vmem:[#allocation2 + $0xa8] sm:$0xff] %v489_v61  ;;  %546 = vst [vmem:[#allocation2 + $0x20] sm:$0xff] %v404_v6  ;;  %v4327_v8 = vpop.f32.mrb[6].mxu0 }
 0x19f   :  { %562 = vst [vmem:[#allocation2 + $0xa0] sm:$0xff] %v484_v7  ;;  %v4351_v9 = vpop.f32.mrb[6].mxu1  ;;  %v419_v10 = vadd.f32 %v4327_v8, %v5929_v41  ;;  %v413_v12 = vpop.f32.mrb[7].mxu0 }
 0x1a0   :  { %v499_v11 = vadd.f32 %v4351_v9, %v5929_v41  ;;  %v493_v13 = vpop.f32.mrb[7].mxu1  ;;  %v414_v14 = vadd.f32 %v5929_v41, %v413_v12 }
 0x1a1   :  { %v494_v15 = vadd.f32 %v5929_v41, %v493_v13  ;;  %549 = vst [vmem:[#allocation2 + $0x38] sm:$0xff] %v419_v10 }
 0x1a2   :  { %565 = vst [vmem:[#allocation2 + $0xb8] sm:$0xff] %v499_v11  ;;  %548 = vst [vmem:[#allocation2 + $0x30] sm:$0xff] %v414_v14  ;;  %v4330_v16 = vpop.f32.mrb[8].mxu0 }
 0x1a3   :  { %564 = vst [vmem:[#allocation2 + $0xb0] sm:$0xff] %v494_v15  ;;  %v4354_v17 = vpop.f32.mrb[8].mxu1  ;;  %v429_v18 = vadd.f32 %v4330_v16, %v5929_v41  ;;  %v423_v20 = vpop.f32.mrb[9].mxu0 }
 0x1a4   :  { %v509_v19 = vadd.f32 %v4354_v17, %v5929_v41  ;;  %v503_v21 = vpop.f32.mrb[9].mxu1  ;;  %v424_v22 = vadd.f32 %v5929_v41, %v423_v20 }
 0x1a5   :  { %v504_v23 = vadd.f32 %v5929_v41, %v503_v21  ;;  %551 = vst [vmem:[#allocation2 + $0x48] sm:$0xff] %v429_v18 }
 0x1a6   :  { %567 = vst [vmem:[#allocation2 + $0xc8] sm:$0xff] %v509_v19  ;;  %550 = vst [vmem:[#allocation2 + $0x40] sm:$0xff] %v424_v22  ;;  %v4333_v24 = vpop.f32.mrb[10].mxu0 }
 0x1a7   :  { %566 = vst [vmem:[#allocation2 + $0xc0] sm:$0xff] %v504_v23  ;;  %v4357_v25 = vpop.f32.mrb[10].mxu1  ;;  %v439_v26 = vadd.f32 %v4333_v24, %v5929_v41  ;;  %v433_v28 = vpop.f32.mrb[11].mxu0 }
 0x1a8   :  { %v519_v27 = vadd.f32 %v4357_v25, %v5929_v41  ;;  %v513_v29 = vpop.f32.mrb[11].mxu1  ;;  %v434_v30 = vadd.f32 %v5929_v41, %v433_v28 }
 0x1a9   :  { %v514_v31 = vadd.f32 %v5929_v41, %v513_v29  ;;  %553 = vst [vmem:[#allocation2 + $0x58] sm:$0xff] %v439_v26 }
 0x1aa   :  { %569 = vst [vmem:[#allocation2 + $0xd8] sm:$0xff] %v519_v27  ;;  %552 = vst [vmem:[#allocation2 + $0x50] sm:$0xff] %v434_v30  ;;  %v4336_v32 = vpop.f32.mrb[12].mxu0 }
 0x1ab   :  { %568 = vst [vmem:[#allocation2 + $0xd0] sm:$0xff] %v514_v31  ;;  %v4360_v33 = vpop.f32.mrb[12].mxu1  ;;  %v449_v34 = vadd.f32 %v4336_v32, %v5929_v41  ;;  %v443_v36 = vpop.f32.mrb[13].mxu0 }
 0x1ac   :  { %v529_v35 = vadd.f32 %v4360_v33, %v5929_v41  ;;  %v523_v37 = vpop.f32.mrb[13].mxu1  ;;  %v444_v38 = vadd.f32 %v5929_v41, %v443_v36 }
 0x1ad   :  { %v524_v39 = vadd.f32 %v5929_v41, %v523_v37  ;;  %555 = vst [vmem:[#allocation2 + $0x68] sm:$0xff] %v449_v34 }
 0x1ae   :  { %571 = vst [vmem:[#allocation2 + $0xe8] sm:$0xff] %v529_v35  ;;  %554 = vst [vmem:[#allocation2 + $0x60] sm:$0xff] %v444_v38  ;;  %v4339_v40 = vpop.f32.mrb[14].mxu0 }
 0x1af   :  { %570 = vst [vmem:[#allocation2 + $0xe0] sm:$0xff] %v524_v39  ;;  %v4363_v42 = vpop.f32.mrb[14].mxu1  ;;  %v459_v43 = vadd.f32 %v4339_v40, %v5929_v41  ;;  %v453_v45 = vpop.f32.mrb[15].mxu0 }
 0x1b0   :  { %v539_v44 = vadd.f32 %v4363_v42, %v5929_v41  ;;  %v533_v46 = vpop.f32.mrb[15].mxu1  ;;  %v454_v47 = vadd.f32 %v5929_v41, %v453_v45 }
 0x1b1   :  { %v534_v48 = vadd.f32 %v5929_v41, %v533_v46  ;;  %557 = vst [vmem:[#allocation2 + $0x78] sm:$0xff] %v459_v43 }
 0x1b2   :  { %573 = vst [vmem:[#allocation2 + $0xf8] sm:$0x3] %v539_v44  ;;  %556 = vst [vmem:[#allocation2 + $0x70] sm:$0xff] %v454_v47 }
 0x1b3   :  { %572 = vst [vmem:[#allocation2 + $0xf0] sm:$0xff] %v534_v48 }
 0x1b4 LB: > { %v5978_v41 = vpack.c.bf16 %v5779_v1, %v5777_v0  ;;  %v5552_v49 = vmov 0.0|0.0   ;;  %v5985_v50 = vpack.c.bf16 %v5783_v3, %v5781_v2  ;;  %vm5553_vm1 = vmmov 0   ;;  %s588_s1 = smul.u32 10, %s5521_s12  ;;  %s5555_s16 = smov 64   ;;  %s5521_s12 = sphi %s5969_s12, %s585_s12   ;;  %v5517_v4 = vphi %v5785_v4, %v1651_v4   ;;  %v5513_v5 = vphi %v5787_v5, %v1657_v5  }
 0x1b5   : > { %4759 = vmatprep.subr.bf16.mxu0 %v5552_v49  ;;  %4765 = vmatprep.subr.bf16.mxu1 %v5552_v49  ;;  %v5554_v51 = vmov 0.0   ;;  %vm591_vm2 = vcmask 261120   ;;  %s5556_s5 = smov 32   ;;  %vm699_vm3 = vcmask 253952   ;;  %s5557_s20 = smov 96  }
 0x1b6   : > { %4761 = vmatpush3.bf16.msra.mxu0 %v5978_v41  ;;  %4372 = vmatprep.mubr.msk.f32.mxu0 %vm5553_vm1, %v5554_v51  ;;  %s6008_s30 = scalar_lea.vmem [#allocation2], %s588_s1  ;;  %s6018_s9 = scalar_lea.vmem [#allocation3], %s588_s1 }
 0x1b7   : > { %4762 = vmatprep.subr.bf16.mxu0 %v5552_v49  ;;  %4767 = vmatpush3.bf16.msra.mxu1 %v5978_v41  ;;  %s585_s12 = sadd.s32 1, %s5521_s12  }
 0x1b8   : > { %4768 = vmatprep.subr.bf16.mxu1 %v5552_v49  ;;  %4383 = vmatprep.mubr.msk.f32.mxu1 %vm5553_vm1, %v5554_v51  ;;  %p582_p4 = scmp.ge.s32.totalorder %s585_s12, 25  }
 0x1ba   : > { %4764 = vmatpush3.bf16.msra.mxu0 %v5985_v50  ;;  %v590_v52 = vld [vmem:[%s6008_s30] sm:$0x1]  ;;  %v3955_v11 = vld [vmem:[%s6008_s30 + $0x1] sm:$0x1]  ;;  %v3959_v29 = vld [vmem:[%s6008_s30 + $0x2] sm:$0x1] }
 0x1bb   : > { %4770 = vmatpush3.bf16.msra.mxu1 %v5985_v50  ;;  %4771 = vmatprep.subr.bf16.mxu0 %v5552_v49  ;;  %v3963_v48 = vld [vmem:[%s6008_s30 + $0x3] sm:$0x1] }
 0x1bc   : > { %4777 = vmatprep.subr.bf16.mxu1 %v5552_v49 }
 0x1bd   : > { %4373 = vmatmul.mubr.msk.f32.vlgmr.msra.gmra.mrb[0].mxu0 %vm591_vm2, %v5517_v4 }
 0x1be   : > { %4773 = vmatpush3.bf16.msra.mxu0 %v5978_v41  ;;  %4394 = vmatprep.mubr.msk.f32.mxu0 %vm5553_vm1, %v5554_v51 }
 0x1bf   : > { %4774 = vmatprep.subr.bf16.mxu0 %v5552_v49 }
 0x1c2   : > { %4776 = vmatpush3.bf16.msra.mxu0 %v5985_v50 }
 0x1c3   : > { %4783 = vmatprep.subr.bf16.mxu0 %v5552_v49 }
 0x290   : > { %v661_v53 = vpop.f32.mrb[0].mxu0 }
 0x291   : > { %v665_v54 = vadd.f32 %v661_v53, %v590_v52  ;;  %v4374_v4 = vpop.f32.mrb[1].mxu0 }
 0x293   : > { %5039 = vtanh.f32 %v665_v54  ;;  %v3954_v56 = vmul.f32 -1.442695, %v665_v54 }
 0x295   : > { %5041 = vpow2.f32 %v3954_v56 }
 0x29d   : > { %v5040_v55 = vpop.eup %5039 }
 0x29e   : > { %679 = vrot.lane.b32.xlu0 %v5040_v55, %s5555_s16 }
 0x29f   : > { %v5042_v57 = vpop.eup %5041 }
 0x2a0   : > { %v669_v58 = vadd.f32 1.0, %v5042_v57 }
 0x2a2   : > { %674 = vrot.lane.b32.xlu0 %v5513_v5, %s5556_s5  ;;  %5043 = vrcp.f32 %v669_v58 }
 0x2ac   : > { %v5044_v59 = vpop.eup %5043 }
 0x310   : > { %v680_v60 = vpop.permute.xlu0 %679 }
 0x311   : > { %v682_v61 = vmul.f32 %v5044_v59, %v680_v60 }
 0x313   : > { %684 = vrot.lane.b32.xlu1 %v682_v61, %s5556_s5 }
 0x314   : > { %v675_v62 = vpop.permute.xlu0 %674 }
 0x315   : > { %v677_v63 = vmul.f32 %v5044_v59, %v675_v62 }
 0x385   : > { %v685_v6 = vpop.permute.xlu1 %684 }
 0x386   : > { %v687_v7 = vadd.f32 %v685_v6, %v677_v63 }
 0x388   : > { %5045 = vtanh.f32 %v687_v7 }
 0x392   : > { %v5046_v8 = vpop.eup %5045 }
 0x393   : > { %690 = vrot.lane.b32.xlu1 %v5046_v8, %s5555_s16 }
 0x405   : > { %v691_v5 = vpop.permute.xlu1 %690 }
 0x406   : > { %v693_v9 = vmul.f32 %v5044_v59, %v691_v5 }
 0x408   : > { %695 = vrot.lane.b32.xlu0 %v693_v9, %s5556_s5  ;;  %v3967_v9 = vld [vmem:[%s6008_s30 + $0x4] sm:$0x1] }
 0x47a   : > { %v696_v10 = vpop.permute.xlu0 %695 }
 0x47b   : > { %700 = vst.msk [vmem:[%s6018_s9] sm:$0x1] %vm699_vm3, %v696_v10  ;;  %4384 = vmatmul.mubr.msk.f32.vlgmr.msra.gmra.mrb[0].mxu1 %vm591_vm2, %v696_v10 }
 0x47c   : > { %4779 = vmatpush3.bf16.msra.mxu1 %v5978_v41  ;;  %4405 = vmatprep.mubr.msk.f32.mxu1 %vm5553_vm1, %v5554_v51 }
 0x47d   : > { %4780 = vmatprep.subr.bf16.mxu1 %v5552_v49 }
 0x480   : > { %4782 = vmatpush3.bf16.msra.mxu1 %v5985_v50 }
 0x481   : > { %4789 = vmatprep.subr.bf16.mxu1 %v5552_v49 }
 0x54e   : > { %v772_v12 = vpop.f32.mrb[0].mxu1 }
 0x54f   : > { %v776_v13 = vadd.f32 %v3955_v11, %v772_v12  ;;  %v4385_v14 = vpop.f32.mrb[1].mxu1 }
 0x551   : > { %5047 = vtanh.f32 %v776_v13  ;;  %v3957_v16 = vmul.f32 -1.442695, %v776_v13 }
 0x553   : > { %5049 = vpow2.f32 %v3957_v16 }
 0x55b   : > { %v5048_v15 = vpop.eup %5047 }
 0x55c   : > { %786 = vrot.lane.b32.xlu1 %v5048_v15, %s5555_s16 }
 0x55d   : > { %v5050_v17 = vpop.eup %5049 }
 0x55e   : > { %v780_v18 = vadd.f32 1.0, %v5050_v17 }
 0x560   : > { %5051 = vrcp.f32 %v780_v18 }
 0x56a   : > { %v5052_v19 = vpop.eup %5051 }
 0x56b   : > { %v784_v22 = vmul.f32 %v5052_v19, %v687_v7 }
 0x5ce   : > { %v787_v20 = vpop.permute.xlu1 %786 }
 0x5cf   : > { %v789_v21 = vmul.f32 %v5052_v19, %v787_v20 }
 0x5d1   : > { %791 = vrot.lane.b32.xlu0 %v789_v21, %s5556_s5 }
 0x643   : > { %v792_v23 = vpop.permute.xlu0 %791 }
 0x644   : > { %v794_v24 = vadd.f32 %v792_v23, %v784_v22 }
 0x646   : > { %5053 = vtanh.f32 %v794_v24 }
 0x650   : > { %v5054_v25 = vpop.eup %5053 }
 0x651   : > { %797 = vrot.lane.b32.xlu1 %v5054_v25, %s5555_s16 }
 0x6c3   : > { %v798_v26 = vpop.permute.xlu1 %797 }
 0x6c4   : > { %v800_v27 = vmul.f32 %v5052_v19, %v798_v26 }
 0x6c6   : > { %802 = vrot.lane.b32.xlu0 %v800_v27, %s5556_s5  ;;  %v3971_v27 = vld [vmem:[%s6008_s30 + $0x5] sm:$0x1] }
 0x738   : > { %v803_v28 = vpop.permute.xlu0 %802 }
 0x739   : > { %3958 = vst.msk [vmem:[%s6018_s9 + $0x1] sm:$0x1] %vm699_vm3, %v803_v28  ;;  %4395 = vmatmul.mubr.msk.f32.vlgmr.msra.gmra.mrb[2].mxu0 %vm591_vm2, %v803_v28 }
 0x73a   : > { %4785 = vmatpush3.bf16.msra.mxu0 %v5978_v41  ;;  %4416 = vmatprep.mubr.msk.f32.mxu0 %vm5553_vm1, %v5554_v51 }
 0x73b   : > { %4786 = vmatprep.subr.bf16.mxu0 %v5552_v49 }
 0x73e   : > { %4788 = vmatpush3.bf16.msra.mxu0 %v5985_v50 }
 0x73f   : > { %4795 = vmatprep.subr.bf16.mxu0 %v5552_v49 }
 0x80c   : > { %v878_v30 = vpop.f32.mrb[2].mxu0 }
 0x80d   : > { %v882_v31 = vadd.f32 %v3959_v29, %v878_v30  ;;  %v4396_v32 = vpop.f32.mrb[3].mxu0 }
 0x80f   : > { %5055 = vtanh.f32 %v882_v31  ;;  %v3961_v34 = vmul.f32 -1.442695, %v882_v31 }
 0x811   : > { %5057 = vpow2.f32 %v3961_v34 }
 0x819   : > { %v5056_v33 = vpop.eup %5055 }
 0x81a   : > { %892 = vrot.lane.b32.xlu1 %v5056_v33, %s5555_s16 }
 0x81b   : > { %v5058_v35 = vpop.eup %5057 }
 0x81c   : > { %v886_v36 = vadd.f32 1.0, %v5058_v35 }
 0x81e   : > { %5059 = vrcp.f32 %v886_v36 }
 0x828   : > { %v5060_v37 = vpop.eup %5059 }
 0x829   : > { %v890_v40 = vmul.f32 %v5060_v37, %v794_v24 }
 0x88c   : > { %v893_v38 = vpop.permute.xlu1 %892 }
 0x88d   : > { %v895_v39 = vmul.f32 %v5060_v37, %v893_v38 }
 0x88f   : > { %897 = vrot.lane.b32.xlu0 %v895_v39, %s5556_s5 }
 0x901   : > { %v898_v42 = vpop.permute.xlu0 %897 }
 0x902   : > { %v900_v43 = vadd.f32 %v898_v42, %v890_v40 }
 0x904   : > { %5061 = vtanh.f32 %v900_v43 }
 0x90e   : > { %v5062_v44 = vpop.eup %5061 }
 0x90f   : > { %903 = vrot.lane.b32.xlu1 %v5062_v44, %s5555_s16 }
 0x981   : > { %v904_v45 = vpop.permute.xlu1 %903 }
 0x982   : > { %v906_v46 = vmul.f32 %v5060_v37, %v904_v45 }
 0x984   : > { %908 = vrot.lane.b32.xlu0 %v906_v46, %s5556_s5  ;;  %v3975_v46 = vld [vmem:[%s6008_s30 + $0x6] sm:$0x1] }
 0x9f6   : > { %v909_v47 = vpop.permute.xlu0 %908 }
 0x9f7   : > { %3962 = vst.msk [vmem:[%s6018_s9 + $0x2] sm:$0x1] %vm699_vm3, %v909_v47  ;;  %4406 = vmatmul.mubr.msk.f32.vlgmr.msra.gmra.mrb[2].mxu1 %vm591_vm2, %v909_v47 }
 0x9f8   : > { %4791 = vmatpush3.bf16.msra.mxu1 %v5978_v41  ;;  %4427 = vmatprep.mubr.msk.f32.mxu1 %vm5553_vm1, %v5554_v51 }
 0x9f9   : > { %4792 = vmatprep.subr.bf16.mxu1 %v5552_v49 }
 0x9fc   : > { %4794 = vmatpush3.bf16.msra.mxu1 %v5985_v50 }
 0x9fd   : > { %4801 = vmatprep.subr.bf16.mxu1 %v5552_v49 }
 0xaca   : > { %v984_v52 = vpop.f32.mrb[2].mxu1 }
 0xacb   : > { %v988_v53 = vadd.f32 %v3963_v48, %v984_v52  ;;  %v4407_v54 = vpop.f32.mrb[3].mxu1 }
 0xacd   : > { %5063 = vtanh.f32 %v988_v53  ;;  %v3965_v55 = vmul.f32 -1.442695, %v988_v53 }
 0xacf   : > { %5065 = vpow2.f32 %v3965_v55 }
 0xad7   : > { %v5064_v4 = vpop.eup %5063 }
 0xad8   : > { %998 = vrot.lane.b32.xlu1 %v5064_v4, %s5555_s16 }
 0xad9   : > { %v5066_v56 = vpop.eup %5065 }
 0xada   : > { %v992_v57 = vadd.f32 1.0, %v5066_v56 }
 0xadc   : > { %5067 = vrcp.f32 %v992_v57 }
 0xae6   : > { %v5068_v58 = vpop.eup %5067 }
 0xae7   : > { %v996_v61 = vmul.f32 %v5068_v58, %v900_v43 }
 0xb4a   : > { %v999_v59 = vpop.permute.xlu1 %998 }
 0xb4b   : > { %v1001_v60 = vmul.f32 %v5068_v58, %v999_v59 }
 0xb4d   : > { %1003 = vrot.lane.b32.xlu0 %v1001_v60, %s5556_s5 }
 0xbbf   : > { %v1004_v62 = vpop.permute.xlu0 %1003 }
 0xbc0   : > { %v1006_v63 = vadd.f32 %v1004_v62, %v996_v61 }
 0xbc2   : > { %5069 = vtanh.f32 %v1006_v63 }
 0xbcc   : > { %v5070_v6 = vpop.eup %5069 }
 0xbcd   : > { %1009 = vrot.lane.b32.xlu1 %v5070_v6, %s5555_s16 }
 0xc3f   : > { %v1010_v7 = vpop.permute.xlu1 %1009 }
 0xc40   : > { %v1012_v8 = vmul.f32 %v5068_v58, %v1010_v7 }
 0xc42   : > { %1014 = vrot.lane.b32.xlu0 %v1012_v8, %s5556_s5  ;;  %v3979_v8 = vld [vmem:[%s6008_s30 + $0x7] sm:$0x1] }
 0xcb4   : > { %v1015_v5 = vpop.permute.xlu0 %1014 }
 0xcb5   : > { %3966 = vst.msk [vmem:[%s6018_s9 + $0x3] sm:$0x1] %vm699_vm3, %v1015_v5  ;;  %4417 = vmatmul.mubr.msk.f32.vlgmr.msra.gmra.mrb[4].mxu0 %vm591_vm2, %v1015_v5 }
 0xcb6   : > { %4797 = vmatpush3.bf16.msra.mxu0 %v5978_v41  ;;  %4438 = vmatprep.mubr.msk.f32.mxu0 %vm5553_vm1, %v5554_v51 }
 0xcb7   : > { %4798 = vmatprep.subr.bf16.mxu0 %v5552_v49 }
 0xcba   : > { %4800 = vmatpush3.bf16.msra.mxu0 %v5985_v50 }
 0xcbb   : > { %4807 = vmatprep.subr.bf16.mxu0 %v5552_v49 }
 0xd88   : > { %v1090_v10 = vpop.f32.mrb[4].mxu0 }
 0xd89   : > { %v1094_v11 = vadd.f32 %v3967_v9, %v1090_v10  ;;  %v4418_v12 = vpop.f32.mrb[5].mxu0 }
 0xd8b   : > { %5071 = vtanh.f32 %v1094_v11  ;;  %v3969_v14 = vmul.f32 -1.442695, %v1094_v11 }
 0xd8d   : > { %5073 = vpow2.f32 %v3969_v14 }
 0xd95   : > { %v5072_v13 = vpop.eup %5071 }
 0xd96   : > { %1104 = vrot.lane.b32.xlu1 %v5072_v13, %s5555_s16 }
 0xd97   : > { %v5074_v15 = vpop.eup %5073 }
 0xd98   : > { %v1098_v16 = vadd.f32 1.0, %v5074_v15 }
 0xd9a   : > { %5075 = vrcp.f32 %v1098_v16 }
 0xda4   : > { %v5076_v17 = vpop.eup %5075 }
 0xda5   : > { %v1102_v20 = vmul.f32 %v5076_v17, %v1006_v63 }
 0xe08   : > { %v1105_v18 = vpop.permute.xlu1 %1104 }
 0xe09   : > { %v1107_v19 = vmul.f32 %v5076_v17, %v1105_v18 }
 0xe0b   : > { %1109 = vrot.lane.b32.xlu0 %v1107_v19, %s5556_s5 }
 0xe7d   : > { %v1110_v21 = vpop.permute.xlu0 %1109 }
 0xe7e   : > { %v1112_v22 = vadd.f32 %v1110_v21, %v1102_v20  ;;  %v3983_v21 = vld [vmem:[%s6008_s30 + $0x8] sm:$0x1] }
 0xe80   : > { %5077 = vtanh.f32 %v1112_v22 }
 0xe8a   : > { %v5078_v23 = vpop.eup %5077 }
 0xe8b   : > { %1115 = vrot.lane.b32.xlu1 %v5078_v23, %s5555_s16 }
 0xefd   : > { %v1116_v24 = vpop.permute.xlu1 %1115 }
 0xefe   : > { %v1118_v25 = vmul.f32 %v5076_v17, %v1116_v24 }
 0xf00   : > { %1120 = vrot.lane.b32.xlu0 %v1118_v25, %s5556_s5 }
 0xf72   : > { %v1121_v26 = vpop.permute.xlu0 %1120 }
 0xf73   : > { %3970 = vst.msk [vmem:[%s6018_s9 + $0x4] sm:$0x1] %vm699_vm3, %v1121_v26  ;;  %4428 = vmatmul.mubr.msk.f32.vlgmr.msra.gmra.mrb[4].mxu1 %vm591_vm2, %v1121_v26 }
 0xf74   : > { %4803 = vmatpush3.bf16.msra.mxu1 %v5978_v41  ;;  %4449 = vmatprep.mubr.msk.f32.mxu1 %vm5553_vm1, %v5554_v51 }
 0xf75   : > { %4804 = vmatprep.subr.bf16.mxu1 %v5552_v49 }
 0xf78   : > { %4806 = vmatpush3.bf16.msra.mxu1 %v5985_v50 }
 0xf79   : > { %4813 = vmatprep.subr.bf16.mxu1 %v5552_v49 }
0x1046   : > { %v1196_v28 = vpop.f32.mrb[4].mxu1 }
0x1047   : > { %v1200_v29 = vadd.f32 %v3971_v27, %v1196_v28  ;;  %v4429_v30 = vpop.f32.mrb[5].mxu1 }
0x1049   : > { %5079 = vtanh.f32 %v1200_v29  ;;  %v3973_v32 = vmul.f32 -1.442695, %v1200_v29 }
0x104b   : > { %5081 = vpow2.f32 %v3973_v32 }
0x1053   : > { %v5080_v31 = vpop.eup %5079 }
0x1054   : > { %1210 = vrot.lane.b32.xlu1 %v5080_v31, %s5555_s16 }
0x1055   : > { %v5082_v33 = vpop.eup %5081 }
0x1056   : > { %v1204_v34 = vadd.f32 1.0, %v5082_v33 }
0x1058   : > { %5083 = vrcp.f32 %v1204_v34 }
0x1062   : > { %v5084_v35 = vpop.eup %5083 }
0x1063   : > { %v1208_v38 = vmul.f32 %v5084_v35, %v1112_v22 }
0x10c6   : > { %v1211_v36 = vpop.permute.xlu1 %1210 }
0x10c7   : > { %v1213_v37 = vmul.f32 %v5084_v35, %v1211_v36 }
0x10c9   : > { %1215 = vrot.lane.b32.xlu0 %v1213_v37, %s5556_s5 }
0x113b   : > { %v1216_v39 = vpop.permute.xlu0 %1215 }
0x113c   : > { %v1218_v40 = vadd.f32 %v1216_v39, %v1208_v38  ;;  %v3987_v39 = vld [vmem:[%s6008_s30 + $0x9] sm:$0x1] }
0x113e   : > { %5085 = vtanh.f32 %v1218_v40 }
0x1148   : > { %v5086_v42 = vpop.eup %5085 }
0x1149   : > { %1221 = vrot.lane.b32.xlu1 %v5086_v42, %s5555_s16 }
0x11bb   : > { %v1222_v43 = vpop.permute.xlu1 %1221 }
0x11bc   : > { %v1224_v44 = vmul.f32 %v5084_v35, %v1222_v43 }
0x11be   : > { %1226 = vrot.lane.b32.xlu0 %v1224_v44, %s5556_s5 }
0x1230   : > { %v1227_v45 = vpop.permute.xlu0 %1226 }
0x1231   : > { %3974 = vst.msk [vmem:[%s6018_s9 + $0x5] sm:$0x1] %vm699_vm3, %v1227_v45  ;;  %4439 = vmatmul.mubr.msk.f32.vlgmr.msra.gmra.mrb[6].mxu0 %vm591_vm2, %v1227_v45 }
0x1232   : > { %4809 = vmatpush3.bf16.msra.mxu0 %v5978_v41  ;;  %4460 = vmatprep.mubr.msk.f32.mxu0 %vm5553_vm1, %v5554_v51 }
0x1233   : > { %4810 = vmatprep.subr.bf16.mxu0 %v5552_v49 }
0x1236   : > { %4812 = vmatpush3.bf16.msra.mxu0 %v5985_v50 }
0x1304   : > { %v1302_v47 = vpop.f32.mrb[6].mxu0 }
0x1305   : > { %v1306_v48 = vadd.f32 %v3975_v46, %v1302_v47  ;;  %v4440_v52 = vpop.f32.mrb[7].mxu0 }
0x1307   : > { %5087 = vtanh.f32 %v1306_v48  ;;  %v3977_v54 = vmul.f32 -1.442695, %v1306_v48 }
0x1309   : > { %5089 = vpow2.f32 %v3977_v54 }
0x1311   : > { %v5088_v53 = vpop.eup %5087 }
0x1312   : > { %1316 = vrot.lane.b32.xlu1 %v5088_v53, %s5555_s16 }
0x1313   : > { %v5090_v4 = vpop.eup %5089 }
0x1314   : > { %v1310_v55 = vadd.f32 1.0, %v5090_v4 }
0x1316   : > { %5091 = vrcp.f32 %v1310_v55 }
0x1320   : > { %v5092_v56 = vpop.eup %5091 }
0x1321   : > { %v1314_v59 = vmul.f32 %v5092_v56, %v1218_v40 }
0x1384   : > { %v1317_v57 = vpop.permute.xlu1 %1316 }
0x1385   : > { %v1319_v58 = vmul.f32 %v5092_v56, %v1317_v57 }
0x1387   : > { %1321 = vrot.lane.b32.xlu0 %v1319_v58, %s5556_s5 }
0x13f9   : > { %v1322_v60 = vpop.permute.xlu0 %1321 }
0x13fa   : > { %v1324_v61 = vadd.f32 %v1322_v60, %v1314_v59  ;;  %v1691_v59 = vld [vmem:[#allocation12] sm:$0xff] (%p582_p4)  ;;  %v1692_v60 = vld [vmem:[#allocation12 + $0x8] sm:$0xff] (%p582_p4) }
0x13fc   : > { %5093 = vtanh.f32 %v1324_v61 }
0x1406   : > { %v5094_v62 = vpop.eup %5093 }
0x1407   : > { %1327 = vrot.lane.b32.xlu1 %v5094_v62, %s5555_s16  ;;  %v4819_v62 = vpack.c.bf16 (%p582_p4), %v1692_v60, %v1691_v59 }
0x1409   :  { %4820 = vmatprep.subr.bf16.mxu0 (%p582_p4), %v4819_v62 }
0x1479   : > { %v1328_v63 = vpop.permute.xlu1 %1327 }
0x147a   : > { %v1330_v6 = vmul.f32 %v5092_v56, %v1328_v63  ;;  %v1694_v63 = vld [vmem:[#allocation12 + $0x18] sm:$0xff] (%p582_p4) }
0x147c   : > { %1332 = vrot.lane.b32.xlu0 %v1330_v6, %s5556_s5 }
0x14ee   : > { %v1333_v7 = vpop.permute.xlu0 %1332 }
0x14ef   : > { %3978 = vst.msk [vmem:[%s6018_s9 + $0x6] sm:$0x1] %vm699_vm3, %v1333_v7  ;;  %4450 = vmatmul.mubr.msk.f32.vlgmr.msra.gmra.mrb[6].mxu1 %vm591_vm2, %v1333_v7 }
0x14f0   : > { %4815 = vmatpush3.bf16.msra.mxu1 %v5978_v41  ;;  %4471 = vmatprep.mubr.msk.f32.mxu1 %vm5553_vm1, %v5554_v51 }
0x14f1   : > { %4816 = vmatprep.subr.bf16.mxu1 %v5552_v49 }
0x14f4   : > { %4818 = vmatpush3.bf16.msra.mxu1 %v5985_v50 }
0x14f5   :  { %4913 = vmatprep.subr.bf16.mxu1 (%p582_p4), %v4819_v62 }
0x15c2   : > { %v1408_v5 = vpop.f32.mrb[6].mxu1 }
0x15c3   : > { %v1412_v9 = vadd.f32 %v3979_v8, %v1408_v5  ;;  %v4451_v10 = vpop.f32.mrb[7].mxu1 }
0x15c5   : > { %5095 = vtanh.f32 %v1412_v9  ;;  %v3981_v12 = vmul.f32 -1.442695, %v1412_v9 }
0x15c7   : > { %5097 = vpow2.f32 %v3981_v12 }
0x15cf   : > { %v5096_v11 = vpop.eup %5095 }
0x15d0   : > { %1422 = vrot.lane.b32.xlu1 %v5096_v11, %s5555_s16 }
0x15d1   : > { %v5098_v13 = vpop.eup %5097 }
0x15d2   : > { %v1416_v14 = vadd.f32 1.0, %v5098_v13 }
0x15d4   : > { %5099 = vrcp.f32 %v1416_v14 }
0x15de   : > { %v5100_v41 = vpop.eup %5099 }
0x15df   : > { %v1420_v50 = vmul.f32 %v5100_v41, %v1324_v61  ;;  %v1693_v61 = vld [vmem:[#allocation12 + $0x10] sm:$0xff] (%p582_p4) }
0x15e0   :  { %v4823_v8 = vpack.c.bf16 (%p582_p4), %v1694_v63, %v1693_v61 }
0x1642   : > { %v1423_v51 = vpop.permute.xlu1 %1422 }
0x1643   : > { %v1425_v49 = vmul.f32 %v5100_v41, %v1423_v51 }
0x1645   : > { %1427 = vrot.lane.b32.xlu0 %v1425_v49, %s5556_s5 }
0x16b7   : > { %v1428_v15 = vpop.permute.xlu0 %1427 }
0x16b8   : > { %v1430_v16 = vadd.f32 %v1428_v15, %v1420_v50 }
0x16ba   : > { %5101 = vtanh.f32 %v1430_v16 }
0x16c4   : > { %v5102_v17 = vpop.eup %5101 }
0x16c5   : > { %1433 = vrot.lane.b32.xlu1 %v5102_v17, %s5555_s16 }
0x1737   : > { %v1434_v18 = vpop.permute.xlu1 %1433 }
0x1738   : > { %v1436_v19 = vmul.f32 %v5100_v41, %v1434_v18 }
0x173a   : > { %1438 = vrot.lane.b32.xlu0 %v1436_v19, %s5556_s5 }
0x17ac   : > { %v1439_v20 = vpop.permute.xlu0 %1438 }
0x17ad   : > { %3982 = vst.msk [vmem:[%s6018_s9 + $0x7] sm:$0x1] %vm699_vm3, %v1439_v20  ;;  %4461 = vmatmul.mubr.msk.f32.vlgmr.msra.gmra.mrb[8].mxu0 %vm591_vm2, %v1439_v20 }
0x17ae   :  { %4822 = vmatpush3.bf16.msra.mxu0 (%p582_p4), %v4819_v62 }
0x17af   :  { %4824 = vmatprep.subr.bf16.mxu0 (%p582_p4), %v4823_v8 }
0x17b2   :  { %4826 = vmatpush3.bf16.msra.mxu0 (%p582_p4), %v4823_v8 }
0x1880   : > { %v1514_v22 = vpop.f32.mrb[8].mxu0 }
0x1881   : > { %v1518_v23 = vadd.f32 %v3983_v21, %v1514_v22  ;;  %v4462_v24 = vpop.f32.mrb[9].mxu0 }
0x1883   : > { %5103 = vtanh.f32 %v1518_v23  ;;  %v3985_v26 = vmul.f32 -1.442695, %v1518_v23 }
0x1885   : > { %5105 = vpow2.f32 %v3985_v26 }
0x188d   : > { %v5104_v25 = vpop.eup %5103 }
0x188e   : > { %1528 = vrot.lane.b32.xlu1 %v5104_v25, %s5555_s16 }
0x188f   : > { %v5106_v27 = vpop.eup %5105 }
0x1890   : > { %v1522_v28 = vadd.f32 1.0, %v5106_v27 }
0x1892   : > { %5107 = vrcp.f32 %v1522_v28 }
0x189c   : > { %v5108_v29 = vpop.eup %5107 }
0x189d   : > { %v1526_v32 = vmul.f32 %v5108_v29, %v1430_v16 }
0x1900   : > { %v1529_v30 = vpop.permute.xlu1 %1528 }
0x1901   : > { %v1531_v31 = vmul.f32 %v5108_v29, %v1529_v30  ;;  %v6173_v30 = vld [vmem:[#allocation15] ss:$0 sm:$0xff] (%p582_p4) }
0x1903   : > { %1533 = vrot.lane.b32.xlu0 %v1531_v31, %s5556_s5 }
0x1975   : > { %v1534_v33 = vpop.permute.xlu0 %1533 }
0x1976   : > { %v1536_v34 = vadd.f32 %v1534_v33, %v1526_v32 }
0x1978   : > { %5109 = vtanh.f32 %v1536_v34 }
0x1982   : > { %v5110_v35 = vpop.eup %5109 }
0x1983   : > { %1539 = vrot.lane.b32.xlu1 %v5110_v35, %s5555_s16 }
0x19f5   : > { %v1540_v36 = vpop.permute.xlu1 %1539 }
0x19f6   : > { %v1542_v37 = vmul.f32 %v5108_v29, %v1540_v36 }
0x19f8   : > { %1544 = vrot.lane.b32.xlu0 %v1542_v37, %s5556_s5 }
0x1a6a   : > { %v1545_v38 = vpop.permute.xlu0 %1544 }
0x1a6b   : > { %3986 = vst.msk [vmem:[%s6018_s9 + $0x8] sm:$0x1] %vm699_vm3, %v1545_v38  ;;  %4472 = vmatmul.mubr.msk.f32.vlgmr.msra.gmra.mrb[8].mxu1 %vm591_vm2, %v1545_v38 }
0x1a6c   :  { %4915 = vmatpush3.bf16.msra.mxu1 (%p582_p4), %v4819_v62 }
0x1a6d   :  { %4914 = vmatprep.subr.bf16.mxu1 (%p582_p4), %v4823_v8 }
0x1a70   :  { %4916 = vmatpush3.bf16.msra.mxu1 (%p582_p4), %v4823_v8 }
0x1b3e   : > { %v1620_v40 = vpop.f32.mrb[8].mxu1 }
0x1b3f   : > { %v1624_v42 = vadd.f32 %v3987_v39, %v1620_v40  ;;  %v4473_v43 = vpop.f32.mrb[9].mxu1 }
0x1b41   : > { %5111 = vtanh.f32 %v1624_v42  ;;  %v3989_v45 = vmul.f32 -1.442695, %v1624_v42 }
0x1b43   : > { %5113 = vpow2.f32 %v3989_v45 }
0x1b4b   : > { %v5112_v44 = vpop.eup %5111 }
0x1b4c   : > { %1634 = vrot.lane.b32.xlu1 %v5112_v44, %s5555_s16 }
0x1b4d   : > { %v5114_v46 = vpop.eup %5113 }
0x1b4e   : > { %v1628_v47 = vadd.f32 1.0, %v5114_v46 }
0x1b50   : > { %5115 = vrcp.f32 %v1628_v47 }
0x1b5a   : > { %v5116_v48 = vpop.eup %5115 }
0x1b5b   : > { %v1632_v54 = vmul.f32 %v5116_v48, %v1536_v34 }
0x1bbe   : > { %v1635_v52 = vpop.permute.xlu1 %1634 }
0x1bbf   : > { %v1637_v53 = vmul.f32 %v5116_v48, %v1635_v52 }
0x1bc1   : > { %1639 = vrot.lane.b32.xlu0 %v1637_v53, %s5556_s5 }
0x1c33   : > { %v1640_v4 = vpop.permute.xlu0 %1639 }
0x1c34   : > { %v1642_v55 = vadd.f32 %v1640_v4, %v1632_v54 }
0x1c36   : > { %5117 = vtanh.f32 %v1642_v55 }
0x1c40   : > { %v5118_v56 = vpop.eup %5117 }
0x1c41   : > { %1645 = vrot.lane.b32.xlu1 %v5118_v56, %s5555_s16 }
0x1c45   : > { %1656 = vrot.lane.b32.xlu1 %v1642_v55, %s5557_s20 }
0x1cb3   : > { %v1646_v57 = vpop.permute.xlu1 %1645 }
0x1cb4   : > { %v1648_v58 = vmul.f32 %v5116_v48, %v1646_v57 }
0x1cb6   : > { %1650 = vrot.lane.b32.xlu0 %v1648_v58, %s5556_s5 }
0x1cb7   : > { %v1657_v5 = vpop.permute.xlu1 %1656  }
0x1d23   :  { %584 = sbr.rel (!%p582_p4) target bundleno = 436 (0x1b4), region = 166 }
0x1d28   : > { %v1651_v4 = vpop.permute.xlu0 %1650  }
0x1d29   : > { %3990 = vst.msk [vmem:[%s6018_s9 + $0x9] sm:$0x1] %vm699_vm3, %v1651_v4 }
0x1d30   :  { %v1659_v6 = vld [vmem:[#allocation3] sm:$0xff]  ;;  %v1660_v0 = vld [vmem:[#allocation3 + $0x8] sm:$0xff]  ;;  %v1661_v2 = vld [vmem:[#allocation3 + $0x10] sm:$0xff] }
0x1d31   :  { %v1675_v7 = vld [vmem:[#allocation3 + $0x80] sm:$0xff]  ;;  %4482 = vmatprep.mubr.msk.f32.mxu0 %vm591_vm2, %v1659_v6  ;;  %v1676_v1 = vld [vmem:[#allocation3 + $0x88] sm:$0xff]  ;;  %v1677_v3 = vld [vmem:[#allocation3 + $0x90] sm:$0xff] }
0x1d32   :  { %4506 = vmatprep.mubr.msk.f32.mxu1 %vm591_vm2, %v1675_v7  ;;  %4483 = vmatmul.mubr.msk.f32.vlgmr.msra.gmra.mrb[0].mxu0 %vm591_vm2, %v1660_v0  ;;  %v1662_v5 = vld [vmem:[#allocation3 + $0x18] sm:$0xff]  ;;  %v1663_v10 = vld [vmem:[#allocation3 + $0x20] sm:$0xff]  ;;  %v1664_v12 = vld [vmem:[#allocation3 + $0x28] sm:$0xff] }
0x1d33   :  { %4507 = vmatmul.mubr.msk.f32.vlgmr.msra.gmra.mrb[0].mxu1 %vm591_vm2, %v1676_v1  ;;  %4485 = vmatprep.mubr.msk.f32.mxu0 %vm591_vm2, %v1661_v2  ;;  %v1678_v9 = vld [vmem:[#allocation3 + $0x98] sm:$0xff]  ;;  %v1679_v11 = vld [vmem:[#allocation3 + $0xa0] sm:$0xff]  ;;  %v1680_v13 = vld [vmem:[#allocation3 + $0xa8] sm:$0xff] }
0x1d34   :  { %4509 = vmatprep.mubr.msk.f32.mxu1 %vm591_vm2, %v1677_v3  ;;  %v1665_v14 = vld [vmem:[#allocation3 + $0x30] sm:$0xff]  ;;  %v1666_v51 = vld [vmem:[#allocation3 + $0x38] sm:$0xff]  ;;  %v1667_v50 = vld [vmem:[#allocation3 + $0x40] sm:$0xff] }
0x1d35   :  { %v1681_v41 = vld [vmem:[#allocation3 + $0xb0] sm:$0xff]  ;;  %v1682_v49 = vld [vmem:[#allocation3 + $0xb8] sm:$0xff]  ;;  %v1683_v15 = vld [vmem:[#allocation3 + $0xc0] sm:$0xff] }
0x1d36   :  { %4486 = vmatmul.mubr.msk.f32.gmra.mrb[2].mxu0 %vm591_vm2, %v1662_v5  ;;  %v1668_v16 = vld [vmem:[#allocation3 + $0x48] sm:$0xff]  ;;  %v1669_v18 = vld [vmem:[#allocation3 + $0x50] sm:$0xff]  ;;  %v1670_v20 = vld [vmem:[#allocation3 + $0x58] sm:$0xff] }
0x1d37   :  { %4510 = vmatmul.mubr.msk.f32.gmra.mrb[2].mxu1 %vm591_vm2, %v1678_v9  ;;  %4488 = vmatprep.mubr.msk.f32.mxu0 %vm591_vm2, %v1663_v10  ;;  %v1684_v17 = vld [vmem:[#allocation3 + $0xc8] sm:$0xff]  ;;  %v1685_v19 = vld [vmem:[#allocation3 + $0xd0] sm:$0xff]  ;;  %v1686_v21 = vld [vmem:[#allocation3 + $0xd8] sm:$0xff] }
0x1d38   :  { %4512 = vmatprep.mubr.msk.f32.mxu1 %vm591_vm2, %v1679_v11  ;;  %v1671_v22 = vld [vmem:[#allocation3 + $0x60] sm:$0xff]  ;;  %v1672_v24 = vld [vmem:[#allocation3 + $0x68] sm:$0xff]  ;;  %v1673_v26 = vld [vmem:[#allocation3 + $0x70] sm:$0xff] }
0x1d39   :  { %v1687_v23 = vld [vmem:[#allocation3 + $0xe0] sm:$0xff]  ;;  %v1688_v25 = vld [vmem:[#allocation3 + $0xe8] sm:$0xff]  ;;  %v1689_v27 = vld [vmem:[#allocation3 + $0xf0] sm:$0xff] }
0x1d3a   :  { %4489 = vmatmul.mubr.msk.f32.gmra.mrb[4].mxu0 %vm591_vm2, %v1664_v12  ;;  %v1674_v28 = vld [vmem:[#allocation3 + $0x78] sm:$0xff] }
0x1d3b   :  { %4513 = vmatmul.mubr.msk.f32.gmra.mrb[4].mxu1 %vm591_vm2, %v1680_v13  ;;  %4491 = vmatprep.mubr.msk.f32.mxu0 %vm591_vm2, %v1665_v14  ;;  %v1690_v29 = vld [vmem:[#allocation3 + $0xf8] sm:$0x3] }
0x1d3c   :  { %4515 = vmatprep.mubr.msk.f32.mxu1 %vm591_vm2, %v1681_v41 }
0x1d3e   :  { %4492 = vmatmul.mubr.msk.f32.gmra.mrb[6].mxu0 %vm591_vm2, %v1666_v51 }
0x1d3f   :  { %4516 = vmatmul.mubr.msk.f32.gmra.mrb[6].mxu1 %vm591_vm2, %v1682_v49  ;;  %4494 = vmatprep.mubr.msk.f32.mxu0 %vm591_vm2, %v1667_v50 }
0x1d40   :  { %4518 = vmatprep.mubr.msk.f32.mxu1 %vm591_vm2, %v1683_v15 }
0x1d42   :  { %4495 = vmatmul.mubr.msk.f32.gmra.mrb[8].mxu0 %vm591_vm2, %v1668_v16 }
0x1d43   :  { %4519 = vmatmul.mubr.msk.f32.gmra.mrb[8].mxu1 %vm591_vm2, %v1684_v17  ;;  %4497 = vmatprep.mubr.msk.f32.mxu0 %vm591_vm2, %v1669_v18 }
0x1d44   :  { %4521 = vmatprep.mubr.msk.f32.mxu1 %vm591_vm2, %v1685_v19 }
0x1d46   :  { %4498 = vmatmul.mubr.msk.f32.gmra.mrb[10].mxu0 %vm591_vm2, %v1670_v20 }
0x1d47   :  { %4522 = vmatmul.mubr.msk.f32.gmra.mrb[10].mxu1 %vm591_vm2, %v1686_v21  ;;  %4500 = vmatprep.mubr.msk.f32.mxu0 %vm591_vm2, %v1671_v22 }
0x1d48   :  { %4524 = vmatprep.mubr.msk.f32.mxu1 %vm591_vm2, %v1687_v23 }
0x1d4a   :  { %4501 = vmatmul.mubr.msk.f32.gmra.mrb[12].mxu0 %vm591_vm2, %v1672_v24 }
0x1d4b   :  { %4525 = vmatmul.mubr.msk.f32.gmra.mrb[12].mxu1 %vm591_vm2, %v1688_v25  ;;  %4503 = vmatprep.mubr.msk.f32.mxu0 %vm591_vm2, %v1673_v26 }
0x1d4c   :  { %4527 = vmatprep.mubr.msk.f32.mxu1 %vm591_vm2, %v1689_v27 }
0x1d4e   :  { %4504 = vmatmul.mubr.msk.f32.gmra.mrb[14].mxu0 %vm591_vm2, %v1674_v28 }
0x1d4f   :  { %4528 = vmatmul.mubr.msk.f32.gmra.mrb[14].mxu1 %vm591_vm2, %v1690_v29 }
0x1e05   :  { %v4484_v31 = vpop.f32.mrb[0].mxu0 }
0x1e06   :  { %v4508_v32 = vpop.f32.mrb[0].mxu1  ;;  %v1871_v33 = vadd.f32 %v4484_v31, %v6173_v30  ;;  %v1865_v35 = vpop.f32.mrb[1].mxu0 }
0x1e07   :  { %v1951_v34 = vadd.f32 %v4508_v32, %v6173_v30  ;;  %v1945_v36 = vpop.f32.mrb[1].mxu1  ;;  %v1866_v37 = vadd.f32 %v6173_v30, %v1865_v35 }
0x1e08   :  { %v1946_v38 = vadd.f32 %v6173_v30, %v1945_v36  ;;  %2025 = vst [vmem:[#allocation2 + $0x8] sm:$0xff] %v1871_v33 }
0x1e09   :  { %2041 = vst [vmem:[#allocation2 + $0x88] sm:$0xff] %v1951_v34  ;;  %2024 = vst [vmem:[#allocation2] sm:$0xff] %v1866_v37  ;;  %v4487_v39 = vpop.f32.mrb[2].mxu0 }
0x1e0a   :  { %2040 = vst [vmem:[#allocation2 + $0x80] sm:$0xff] %v1946_v38  ;;  %v4511_v40 = vpop.f32.mrb[2].mxu1  ;;  %v1881_v42 = vadd.f32 %v4487_v39, %v6173_v30  ;;  %v1875_v44 = vpop.f32.mrb[3].mxu0 }
0x1e0b   :  { %v1961_v43 = vadd.f32 %v4511_v40, %v6173_v30  ;;  %v1955_v45 = vpop.f32.mrb[3].mxu1  ;;  %v1876_v46 = vadd.f32 %v6173_v30, %v1875_v44 }
0x1e0c   :  { %v1956_v47 = vadd.f32 %v6173_v30, %v1955_v45  ;;  %2027 = vst [vmem:[#allocation2 + $0x18] sm:$0xff] %v1881_v42 }
0x1e0d   :  { %2043 = vst [vmem:[#allocation2 + $0x98] sm:$0xff] %v1961_v43  ;;  %2026 = vst [vmem:[#allocation2 + $0x10] sm:$0xff] %v1876_v46  ;;  %v4490_v48 = vpop.f32.mrb[4].mxu0 }
0x1e0e   :  { %2042 = vst [vmem:[#allocation2 + $0x90] sm:$0xff] %v1956_v47  ;;  %v4514_v52 = vpop.f32.mrb[4].mxu1  ;;  %v1891_v53 = vadd.f32 %v4490_v48, %v6173_v30  ;;  %v1885_v4 = vpop.f32.mrb[5].mxu0 }
0x1e0f   :  { %v1971_v54 = vadd.f32 %v4514_v52, %v6173_v30  ;;  %v1965_v55 = vpop.f32.mrb[5].mxu1  ;;  %v1886_v56 = vadd.f32 %v6173_v30, %v1885_v4 }
0x1e10   :  { %v1966_v57 = vadd.f32 %v6173_v30, %v1965_v55  ;;  %2029 = vst [vmem:[#allocation2 + $0x28] sm:$0xff] %v1891_v53 }
0x1e11   :  { %2045 = vst [vmem:[#allocation2 + $0xa8] sm:$0xff] %v1971_v54  ;;  %2028 = vst [vmem:[#allocation2 + $0x20] sm:$0xff] %v1886_v56  ;;  %v4493_v58 = vpop.f32.mrb[6].mxu0 }
0x1e12   :  { %2044 = vst [vmem:[#allocation2 + $0xa0] sm:$0xff] %v1966_v57  ;;  %v4517_v59 = vpop.f32.mrb[6].mxu1  ;;  %v1901_v60 = vadd.f32 %v4493_v58, %v6173_v30  ;;  %v1895_v62 = vpop.f32.mrb[7].mxu0 }
0x1e13   :  { %v1981_v61 = vadd.f32 %v4517_v59, %v6173_v30  ;;  %v1975_v63 = vpop.f32.mrb[7].mxu1  ;;  %v1896_v6 = vadd.f32 %v6173_v30, %v1895_v62 }
0x1e14   :  { %v1976_v7 = vadd.f32 %v6173_v30, %v1975_v63  ;;  %2031 = vst [vmem:[#allocation2 + $0x38] sm:$0xff] %v1901_v60 }
0x1e15   :  { %2047 = vst [vmem:[#allocation2 + $0xb8] sm:$0xff] %v1981_v61  ;;  %2030 = vst [vmem:[#allocation2 + $0x30] sm:$0xff] %v1896_v6  ;;  %v4496_v8 = vpop.f32.mrb[8].mxu0 }
0x1e16   :  { %2046 = vst [vmem:[#allocation2 + $0xb0] sm:$0xff] %v1976_v7  ;;  %v4520_v0 = vpop.f32.mrb[8].mxu1  ;;  %v1911_v1 = vadd.f32 %v4496_v8, %v6173_v30  ;;  %v1905_v3 = vpop.f32.mrb[9].mxu0 }
0x1e17   :  { %v1991_v2 = vadd.f32 %v4520_v0, %v6173_v30  ;;  %v1985_v5 = vpop.f32.mrb[9].mxu1  ;;  %v1906_v9 = vadd.f32 %v6173_v30, %v1905_v3 }
0x1e18   :  { %v1986_v10 = vadd.f32 %v6173_v30, %v1985_v5  ;;  %2033 = vst [vmem:[#allocation2 + $0x48] sm:$0xff] %v1911_v1 }
0x1e19   :  { %2049 = vst [vmem:[#allocation2 + $0xc8] sm:$0xff] %v1991_v2  ;;  %2032 = vst [vmem:[#allocation2 + $0x40] sm:$0xff] %v1906_v9  ;;  %v4499_v11 = vpop.f32.mrb[10].mxu0 }
0x1e1a   :  { %2048 = vst [vmem:[#allocation2 + $0xc0] sm:$0xff] %v1986_v10  ;;  %v4523_v12 = vpop.f32.mrb[10].mxu1  ;;  %v1921_v13 = vadd.f32 %v4499_v11, %v6173_v30  ;;  %v1915_v41 = vpop.f32.mrb[11].mxu0 }
0x1e1b   :  { %v2001_v14 = vadd.f32 %v4523_v12, %v6173_v30  ;;  %v1995_v51 = vpop.f32.mrb[11].mxu1  ;;  %v1916_v49 = vadd.f32 %v6173_v30, %v1915_v41 }
0x1e1c   :  { %v1996_v50 = vadd.f32 %v6173_v30, %v1995_v51  ;;  %2035 = vst [vmem:[#allocation2 + $0x58] sm:$0xff] %v1921_v13 }
0x1e1d   :  { %2051 = vst [vmem:[#allocation2 + $0xd8] sm:$0xff] %v2001_v14  ;;  %2034 = vst [vmem:[#allocation2 + $0x50] sm:$0xff] %v1916_v49  ;;  %v4502_v15 = vpop.f32.mrb[12].mxu0 }
0x1e1e   :  { %2050 = vst [vmem:[#allocation2 + $0xd0] sm:$0xff] %v1996_v50  ;;  %v4526_v16 = vpop.f32.mrb[12].mxu1  ;;  %v1931_v17 = vadd.f32 %v4502_v15, %v6173_v30  ;;  %v1925_v19 = vpop.f32.mrb[13].mxu0 }
0x1e1f   :  { %v2011_v18 = vadd.f32 %v4526_v16, %v6173_v30  ;;  %v2005_v20 = vpop.f32.mrb[13].mxu1  ;;  %v1926_v21 = vadd.f32 %v6173_v30, %v1925_v19 }
0x1e20   :  { %v2006_v22 = vadd.f32 %v6173_v30, %v2005_v20  ;;  %2037 = vst [vmem:[#allocation2 + $0x68] sm:$0xff] %v1931_v17 }
0x1e21   :  { %2053 = vst [vmem:[#allocation2 + $0xe8] sm:$0xff] %v2011_v18  ;;  %2036 = vst [vmem:[#allocation2 + $0x60] sm:$0xff] %v1926_v21  ;;  %v4505_v23 = vpop.f32.mrb[14].mxu0 }
0x1e22   :  { %2052 = vst [vmem:[#allocation2 + $0xe0] sm:$0xff] %v2006_v22  ;;  %v4529_v24 = vpop.f32.mrb[14].mxu1  ;;  %v1941_v25 = vadd.f32 %v4505_v23, %v6173_v30  ;;  %v1935_v27 = vpop.f32.mrb[15].mxu0 }
0x1e23   :  { %v2021_v26 = vadd.f32 %v4529_v24, %v6173_v30  ;;  %v2015_v28 = vpop.f32.mrb[15].mxu1  ;;  %v1936_v29 = vadd.f32 %v6173_v30, %v1935_v27 }
0x1e24   :  { %v2016_v31 = vadd.f32 %v6173_v30, %v2015_v28  ;;  %2039 = vst [vmem:[#allocation2 + $0x78] sm:$0xff] %v1941_v25 }
0x1e25   :  { %2055 = vst [vmem:[#allocation2 + $0xf8] sm:$0x3] %v2021_v26  ;;  %2038 = vst [vmem:[#allocation2 + $0x70] sm:$0xff] %v1936_v29 }
0x1e26   :  { %2054 = vst [vmem:[#allocation2 + $0xf0] sm:$0xff] %v2016_v31 }
0x1e27   :  { %5507 = dma.done.wait [#allocation5], 64000 }
0x1e28   :  { %5508 = vsyncadd [#allocation5], 4294903296  ;;  %v6207_v32 = vld [vmem:[#allocation14] sm:$0xff]  ;;  %v6209_v33 = vld [vmem:[#allocation14 + $0x8] sm:$0xff]  ;;  %v6215_v38 = vmov 0.0   ;;  %s6221_s11 = smov 0  }
0x1e29   :  { %v6211_v34 = vld [vmem:[#allocation14 + $0x10] sm:$0xff]  ;;  %v6213_v35 = vld [vmem:[#allocation14 + $0x18] sm:$0xff]  ;;  %v2065_v36 = vld [vmem:[#allocation17 + $0x1] sm:$0x1]  }
0x1e2a   :  { %v2066_v37 = vld [vmem:[#allocation18 + $0x1] sm:$0x1]  }
0x1e2b LB: > { %v6233_v30 = vpack.c.bf16 %v6209_v33, %v6207_v32  ;;  %v5558_v39 = vmov 0.0|0.0   ;;  %v6239_v40 = vpack.c.bf16 %v6213_v35, %v6211_v34  ;;  %vm5559_vm4 = vmmov 0   ;;  %s2076_s21 = smul.u32 10, %s5537_s11  ;;  %s5561_s26 = smov 64   ;;  %s5537_s11 = sphi %s6221_s11, %s2072_s11   ;;  %v5533_v36 = vphi %v2065_v36, %v3640_v36   ;;  %v5529_v37 = vphi %v2066_v37, %v3644_v37   ;;  %v5525_v38 = vphi %v6215_v38, %v6575_v38  }
0x1e2c   : > { %4827 = vmatprep.subr.bf16.mxu0 %v5558_v39  ;;  %v5560_v42 = vmov 0.0   ;;  %s5562_s19 = smov 32   ;;  %s4094_s8 = smul.u32 160, %s5537_s11 }
0x1e2d   : > { %4829 = vmatpush3.bf16.msra.mxu0 %v6233_v30  ;;  %4538 = vmatprep.mubr.msk.f32.mxu0 %vm5559_vm4, %v5560_v42  ;;  %s6257_s2 = scalar_lea.vmem [#allocation2], %s2076_s21  ;;  %s5563_s23 = smov 96  }
0x1e2e   : > { %4830 = vmatprep.subr.bf16.mxu0 %v5558_v39  ;;  %4541 = vmatprep.subr.bf16.mxu1 %v5560_v42  ;;  %v2078_v43 = vld [vmem:[%s6257_s2] sm:$0x1]  ;;  %v4029_v6 = vld [vmem:[%s6257_s2 + $0x1] sm:$0x1]  ;;  %v4036_v15 = vld [vmem:[%s6257_s2 + $0x2] sm:$0x1] }
0x1e2f   : > { %4545 = vmatprep.mubr.msk.bf16.mxu1 %vm5559_vm4, %v5560_v42  ;;  %s6386_s22 = scalar_lea.vmem [#allocation4], %s4094_s8  ;;  %s2072_s11 = sadd.s32 1, %s5537_s11  }
0x1e30   : > { %p2069_p5 = scmp.ge.s32.totalorder %s2072_s11, 25  }
0x1e31   : > { %4832 = vmatpush3.bf16.msra.mxu0 %v6239_v40  ;;  %vm5565_vm5 = vmmov (%p2069_p5), 0   ;;  %v5566_v32 = vmov (%p2069_p5), 0.0   ;;  %v3653_v34 = vld [vmem:[%s6571_s10 + $0x20] sm:$0xff] (%p2069_p5)  ;;  %v3654_v35 = vld [vmem:[%s6571_s10 + $0x28] sm:$0xff] (%p2069_p5)  ;;  %s5567_s3 = smov (%p2069_p5), [#allocation23]   ;;  %vm3742_vm6 = vcmask (%p2069_p5), 24576  }
0x1e32   : > { %4833 = vmatprep.subr.bf16.mxu0 %v5558_v39  ;;  %s3750_s7 = sshll.u32 (%p2069_p5), %s5567_s3, 4  ;;  %s3751_s7 = int_to_ptr.vmem [resolvable:$true] %s3750_s7 }
0x1e33   :  { %s5449_s17 = scalar_lea.vmem (%p2069_p5), %s3751_s7, 32  ;;  %p5450_p7 = scmp.lt.s32.totalorder (%p2069_p5), %s3751_s7, %s3751_s7 }
0x1e34   : > { %4539 = vmatmul.mubr.msk.f32.vlgmr.msra.gmra.mrb[0].mxu0 %vm591_vm2, %v5533_v36 }
0x1e35   : > { %4835 = vmatpush3.bf16.msra.mxu0 %v6233_v30  ;;  %4557 = vmatprep.mubr.msk.f32.mxu0 %vm5559_vm4, %v5560_v42 }
0x1e36   : > { %4836 = vmatprep.subr.bf16.mxu0 %v5558_v39 }
0x1e39   : > { %4838 = vmatpush3.bf16.msra.mxu0 %v6239_v40 }
0x1e3a   : > { %4839 = vmatprep.subr.bf16.mxu0 %v5558_v39 }
0x1f07   : > { %v2148_v44 = vpop.f32.mrb[0].mxu0 }
0x1f08   : > { %v2152_v45 = vadd.f32 %v2148_v44, %v2078_v43  ;;  %v4540_v46 = vpop.f32.mrb[1].mxu0  ;;  %v4043_v43 = vld [vmem:[%s6257_s2 + $0x3] sm:$0x1] }
0x1f0a   : > { %5119 = vtanh.f32 %v2152_v45  ;;  %v4025_v48 = vmul.f32 -1.442695, %v2152_v45 }
0x1f0c   : > { %5121 = vpow2.f32 %v4025_v48 }
0x1f14   : > { %v5120_v47 = vpop.eup %5119 }
0x1f15   : > { %2166 = vrot.lane.b32.xlu0 %v5120_v47, %s5561_s26 }
0x1f16   : > { %v5122_v52 = vpop.eup %5121 }
0x1f17   : > { %v2156_v53 = vadd.f32 1.0, %v5122_v52 }
0x1f19   : > { %2161 = vrot.lane.b32.xlu0 %v5529_v37, %s5562_s19  ;;  %5123 = vrcp.f32 %v2156_v53 }
0x1f23   : > { %v5124_v54 = vpop.eup %5123 }
0x1f87   : > { %v2167_v4 = vpop.permute.xlu0 %2166 }
0x1f88   : > { %v2169_v55 = vmul.f32 %v5124_v54, %v2167_v4 }
0x1f8a   : > { %2171 = vrot.lane.b32.xlu1 %v2169_v55, %s5562_s19 }
0x1f8b   : > { %v2162_v56 = vpop.permute.xlu0 %2161 }
0x1f8c   : > { %v2164_v57 = vmul.f32 %v5124_v54, %v2162_v56 }
0x1ffc   : > { %v2172_v58 = vpop.permute.xlu1 %2171 }
0x1ffd   : > { %v2174_v59 = vadd.f32 %v2172_v58, %v2164_v57 }
0x1fff   : > { %5125 = vtanh.f32 %v2174_v59 }
0x2009   : > { %v5126_v60 = vpop.eup %5125 }
0x200a   : > { %2177 = vrot.lane.b32.xlu1 %v5126_v60, %s5561_s26 }
0x207c   : > { %v2178_v61 = vpop.permute.xlu1 %2177 }
0x207d   : > { %v6264_v62 = vmul.f32 %v5124_v54, %v2178_v61 }
0x207f   : > { %2238 = vrot.lane.b32.xlu0 %v6264_v62, %s5562_s19 }
0x20f1   : > { %v2239_v63 = vpop.permute.xlu0 %2238 }
0x20f2   : > { %4558 = vmatmul.mubr.msk.f32.vlgmr.msra.gmra.mrb[2].mxu0 %vm591_vm2, %v2239_v63 }
0x20f3   : > { %4841 = vmatpush3.bf16.msra.mxu0 %v6233_v30  ;;  %4576 = vmatprep.mubr.msk.f32.mxu0 %vm5559_vm4, %v5560_v42 }
0x20f4   : > { %4842 = vmatprep.subr.bf16.mxu0 %v5558_v39 }
0x20f7   : > { %4844 = vmatpush3.bf16.msra.mxu0 %v6239_v40 }
0x20f8   : > { %4845 = vmatprep.subr.bf16.mxu0 %v5558_v39 }
0x21c5   : > { %v2308_v7 = vpop.f32.mrb[2].mxu0 }
0x21c6   : > { %v2312_v8 = vadd.f32 %v4029_v6, %v2308_v7  ;;  %v4559_v0 = vpop.f32.mrb[3].mxu0  ;;  %v4050_v6 = vld [vmem:[%s6257_s2 + $0x4] sm:$0x1] }
0x21c8   : > { %5127 = vtanh.f32 %v2312_v8  ;;  %v4031_v2 = vmul.f32 -1.442695, %v2312_v8 }
0x21ca   : > { %5129 = vpow2.f32 %v4031_v2 }
0x21d2   : > { %v5128_v1 = vpop.eup %5127 }
0x21d3   : > { %2322 = vrot.lane.b32.xlu1 %v5128_v1, %s5561_s26 }
0x21d4   : > { %v5130_v3 = vpop.eup %5129 }
0x21d5   : > { %v2316_v5 = vadd.f32 1.0, %v5130_v3 }
0x21d7   : > { %5131 = vrcp.f32 %v2316_v5 }
0x21e1   : > { %v5132_v9 = vpop.eup %5131 }
0x21e2   : > { %v2320_v12 = vmul.f32 %v5132_v9, %v2174_v59 }
0x2245   : > { %v2323_v10 = vpop.permute.xlu1 %2322 }
0x2246   : > { %v2325_v11 = vmul.f32 %v5132_v9, %v2323_v10 }
0x2248   : > { %2327 = vrot.lane.b32.xlu0 %v2325_v11, %s5562_s19 }
0x22ba   : > { %v2328_v13 = vpop.permute.xlu0 %2327 }
0x22bb   : > { %v2330_v14 = vadd.f32 %v2328_v13, %v2320_v12 }
0x22bd   : > { %5133 = vtanh.f32 %v2330_v14 }
0x22c7   : > { %v5134_v41 = vpop.eup %5133 }
0x22c8   : > { %2333 = vrot.lane.b32.xlu1 %v5134_v41, %s5561_s26 }
0x233a   : > { %v2334_v51 = vpop.permute.xlu1 %2333 }
0x233b   : > { %v6279_v49 = vmul.f32 %v5132_v9, %v2334_v51 }
0x233d   : > { %2394 = vrot.lane.b32.xlu0 %v6279_v49, %s5562_s19 }
0x23af   : > { %v2395_v50 = vpop.permute.xlu0 %2394 }
0x23b0   : > { %4577 = vmatmul.mubr.msk.f32.vlgmr.msra.gmra.mrb[4].mxu0 %vm591_vm2, %v2395_v50 }
0x23b1   : > { %4847 = vmatpush3.bf16.msra.mxu0 %v6233_v30  ;;  %4595 = vmatprep.mubr.msk.f32.mxu0 %vm5559_vm4, %v5560_v42 }
0x23b2   : > { %4848 = vmatprep.subr.bf16.mxu0 %v5558_v39 }
0x23b5   : > { %4850 = vmatpush3.bf16.msra.mxu0 %v6239_v40 }
0x23b6   : > { %4851 = vmatprep.subr.bf16.mxu0 %v5558_v39 }
0x2483   : > { %v2464_v16 = vpop.f32.mrb[4].mxu0 }
0x2484   : > { %v2468_v17 = vadd.f32 %v4036_v15, %v2464_v16  ;;  %v4578_v18 = vpop.f32.mrb[5].mxu0  ;;  %v4057_v16 = vld [vmem:[%s6257_s2 + $0x5] sm:$0x1] }
0x2486   : > { %5135 = vtanh.f32 %v2468_v17  ;;  %v4038_v20 = vmul.f32 -1.442695, %v2468_v17 }
0x2488   : > { %5137 = vpow2.f32 %v4038_v20 }
0x2490   : > { %v5136_v19 = vpop.eup %5135 }
0x2491   : > { %2478 = vrot.lane.b32.xlu1 %v5136_v19, %s5561_s26 }
0x2492   : > { %v5138_v21 = vpop.eup %5137 }
0x2493   : > { %v2472_v22 = vadd.f32 1.0, %v5138_v21 }
0x2495   : > { %5139 = vrcp.f32 %v2472_v22 }
0x249f   : > { %v5140_v23 = vpop.eup %5139 }
0x24a0   : > { %v2476_v26 = vmul.f32 %v5140_v23, %v2330_v14 }
0x2503   : > { %v2479_v24 = vpop.permute.xlu1 %2478 }
0x2504   : > { %v2481_v25 = vmul.f32 %v5140_v23, %v2479_v24 }
0x2506   : > { %2483 = vrot.lane.b32.xlu0 %v2481_v25, %s5562_s19 }
0x2578   : > { %v2484_v27 = vpop.permute.xlu0 %2483 }
0x2579   : > { %v2486_v28 = vadd.f32 %v2484_v27, %v2476_v26 }
0x257b   : > { %5141 = vtanh.f32 %v2486_v28 }
0x2585   : > { %v5142_v29 = vpop.eup %5141 }
0x2586   : > { %2489 = vrot.lane.b32.xlu1 %v5142_v29, %s5561_s26 }
0x25f8   : > { %v2490_v31 = vpop.permute.xlu1 %2489 }
0x25f9   : > { %v6294_v36 = vmul.f32 %v5140_v23, %v2490_v31 }
0x25fb   : > { %2550 = vrot.lane.b32.xlu0 %v6294_v36, %s5562_s19 }
0x266d   : > { %v2551_v37 = vpop.permute.xlu0 %2550 }
0x266e   : > { %4596 = vmatmul.mubr.msk.f32.vlgmr.msra.gmra.mrb[6].mxu0 %vm591_vm2, %v2551_v37 }
0x266f   : > { %4853 = vmatpush3.bf16.msra.mxu0 %v6233_v30  ;;  %4614 = vmatprep.mubr.msk.f32.mxu0 %vm5559_vm4, %v5560_v42 }
0x2670   : > { %4854 = vmatprep.subr.bf16.mxu0 %v5558_v39 }
0x2673   : > { %4856 = vmatpush3.bf16.msra.mxu0 %v6239_v40 }
0x2674   : > { %4857 = vmatprep.subr.bf16.mxu0 %v5558_v39 }
0x2741   : > { %v2620_v44 = vpop.f32.mrb[6].mxu0 }
0x2742   : > { %v2624_v45 = vadd.f32 %v4043_v43, %v2620_v44  ;;  %v4597_v46 = vpop.f32.mrb[7].mxu0 }
0x2744   : > { %5143 = vtanh.f32 %v2624_v45  ;;  %v4045_v48 = vmul.f32 -1.442695, %v2624_v45  ;;  %v4064_v45 = vld [vmem:[%s6257_s2 + $0x6] sm:$0x1] }
0x2746   : > { %5145 = vpow2.f32 %v4045_v48 }
0x274e   : > { %v5144_v47 = vpop.eup %5143 }
0x274f   : > { %2634 = vrot.lane.b32.xlu1 %v5144_v47, %s5561_s26 }
0x2750   : > { %v5146_v52 = vpop.eup %5145 }
0x2751   : > { %v2628_v53 = vadd.f32 1.0, %v5146_v52 }
0x2753   : > { %5147 = vrcp.f32 %v2628_v53 }
0x275d   : > { %v5148_v54 = vpop.eup %5147 }
0x275e   : > { %v2632_v56 = vmul.f32 %v5148_v54, %v2486_v28 }
0x27c1   : > { %v2635_v4 = vpop.permute.xlu1 %2634 }
0x27c2   : > { %v2637_v55 = vmul.f32 %v5148_v54, %v2635_v4 }
0x27c4   : > { %2639 = vrot.lane.b32.xlu0 %v2637_v55, %s5562_s19 }
0x2836   : > { %v2640_v57 = vpop.permute.xlu0 %2639 }
0x2837   : > { %v2642_v58 = vadd.f32 %v2640_v57, %v2632_v56 }
0x2839   : > { %5149 = vtanh.f32 %v2642_v58 }
0x2843   : > { %v5150_v59 = vpop.eup %5149 }
0x2844   : > { %2645 = vrot.lane.b32.xlu1 %v5150_v59, %s5561_s26 }
0x28b6   : > { %v2646_v60 = vpop.permute.xlu1 %2645 }
0x28b7   : > { %v6309_v61 = vmul.f32 %v5148_v54, %v2646_v60 }
0x28b9   : > { %2706 = vrot.lane.b32.xlu0 %v6309_v61, %s5562_s19 }
0x292b   : > { %v2707_v63 = vpop.permute.xlu0 %2706 }
0x292c   : > { %4615 = vmatmul.mubr.msk.f32.vlgmr.msra.gmra.mrb[8].mxu0 %vm591_vm2, %v2707_v63 }
0x292d   : > { %4859 = vmatpush3.bf16.msra.mxu0 %v6233_v30  ;;  %4633 = vmatprep.mubr.msk.f32.mxu0 %vm5559_vm4, %v5560_v42 }
0x292e   : > { %4860 = vmatprep.subr.bf16.mxu0 %v5558_v39 }
0x2931   : > { %4862 = vmatpush3.bf16.msra.mxu0 %v6239_v40 }
0x2932   : > { %4863 = vmatprep.subr.bf16.mxu0 %v5558_v39 }
0x29ff   : > { %v2776_v7 = vpop.f32.mrb[8].mxu0 }
0x2a00   : > { %v2780_v8 = vadd.f32 %v4050_v6, %v2776_v7  ;;  %v4616_v0 = vpop.f32.mrb[9].mxu0 }
0x2a01   : > { %v4071_v0 = vld [vmem:[%s6257_s2 + $0x7] sm:$0x1] }
0x2a02   : > { %5151 = vtanh.f32 %v2780_v8  ;;  %v4052_v2 = vmul.f32 -1.442695, %v2780_v8 }
0x2a04   : > { %5153 = vpow2.f32 %v4052_v2 }
0x2a0c   : > { %v5152_v1 = vpop.eup %5151 }
0x2a0d   : > { %2790 = vrot.lane.b32.xlu1 %v5152_v1, %s5561_s26 }
0x2a0e   : > { %v5154_v3 = vpop.eup %5153 }
0x2a0f   : > { %v2784_v5 = vadd.f32 1.0, %v5154_v3 }
0x2a11   : > { %5155 = vrcp.f32 %v2784_v5 }
0x2a1b   : > { %v5156_v9 = vpop.eup %5155 }
0x2a1c   : > { %v2788_v12 = vmul.f32 %v5156_v9, %v2642_v58 }
0x2a7f   : > { %v2791_v10 = vpop.permute.xlu1 %2790 }
0x2a80   : > { %v2793_v11 = vmul.f32 %v5156_v9, %v2791_v10 }
0x2a82   : > { %2795 = vrot.lane.b32.xlu0 %v2793_v11, %s5562_s19 }
0x2af4   : > { %v2796_v13 = vpop.permute.xlu0 %2795 }
0x2af5   : > { %v2798_v14 = vadd.f32 %v2796_v13, %v2788_v12 }
0x2af7   : > { %5157 = vtanh.f32 %v2798_v14 }
0x2b01   : > { %v5158_v41 = vpop.eup %5157 }
0x2b02   : > { %2801 = vrot.lane.b32.xlu1 %v5158_v41, %s5561_s26 }
0x2b74   : > { %v2802_v51 = vpop.permute.xlu1 %2801 }
0x2b75   : > { %v6324_v50 = vmul.f32 %v5156_v9, %v2802_v51 }
0x2b77   : > { %2862 = vrot.lane.b32.xlu0 %v6324_v50, %s5562_s19 }
0x2be9   : > { %v2863_v15 = vpop.permute.xlu0 %2862 }
0x2bea   : > { %4634 = vmatmul.mubr.msk.f32.vlgmr.msra.gmra.mrb[10].mxu0 %vm591_vm2, %v2863_v15 }
0x2beb   : > { %4865 = vmatpush3.bf16.msra.mxu0 %v6233_v30  ;;  %4652 = vmatprep.mubr.msk.f32.mxu0 %vm5559_vm4, %v5560_v42 }
0x2bec   : > { %4866 = vmatprep.subr.bf16.mxu0 %v5558_v39 }
0x2bef   : > { %4868 = vmatpush3.bf16.msra.mxu0 %v6239_v40 }
0x2bf0   : > { %4869 = vmatprep.subr.bf16.mxu0 %v5558_v39 }
0x2cbd   : > { %v2932_v17 = vpop.f32.mrb[10].mxu0 }
0x2cbe   : > { %v2936_v18 = vadd.f32 %v4057_v16, %v2932_v17  ;;  %v4635_v19 = vpop.f32.mrb[11].mxu0 }
0x2cc0   : > { %5159 = vtanh.f32 %v2936_v18  ;;  %v4059_v21 = vmul.f32 -1.442695, %v2936_v18 }
0x2cc2   : > { %5161 = vpow2.f32 %v4059_v21 }
0x2cca   : > { %v5160_v20 = vpop.eup %5159 }
0x2ccb   : > { %2946 = vrot.lane.b32.xlu1 %v5160_v20, %s5561_s26  ;;  %v4078_v20 = vld [vmem:[%s6257_s2 + $0x8] sm:$0x1] }
0x2ccc   : > { %v5162_v22 = vpop.eup %5161 }
0x2ccd   : > { %v2940_v23 = vadd.f32 1.0, %v5162_v22 }
0x2ccf   : > { %5163 = vrcp.f32 %v2940_v23 }
0x2cd9   : > { %v5164_v24 = vpop.eup %5163 }
0x2cda   : > { %v2944_v27 = vmul.f32 %v5164_v24, %v2798_v14 }
0x2d3d   : > { %v2947_v25 = vpop.permute.xlu1 %2946 }
0x2d3e   : > { %v2949_v26 = vmul.f32 %v5164_v24, %v2947_v25 }
0x2d40   : > { %2951 = vrot.lane.b32.xlu0 %v2949_v26, %s5562_s19 }
0x2db2   : > { %v2952_v28 = vpop.permute.xlu0 %2951 }
0x2db3   : > { %v2954_v29 = vadd.f32 %v2952_v28, %v2944_v27 }
0x2db5   : > { %5165 = vtanh.f32 %v2954_v29 }
0x2dbf   : > { %v5166_v31 = vpop.eup %5165 }
0x2dc0   : > { %2957 = vrot.lane.b32.xlu1 %v5166_v31, %s5561_s26 }
0x2e32   : > { %v2958_v37 = vpop.permute.xlu1 %2957 }
0x2e33   : > { %v6339_v43 = vmul.f32 %v5164_v24, %v2958_v37 }
0x2e35   : > { %3018 = vrot.lane.b32.xlu0 %v6339_v43, %s5562_s19 }
0x2ea7   : > { %v3019_v44 = vpop.permute.xlu0 %3018 }
0x2ea8   : > { %4653 = vmatmul.mubr.msk.f32.vlgmr.msra.gmra.mrb[12].mxu0 %vm591_vm2, %v3019_v44 }
0x2ea9   : > { %4871 = vmatpush3.bf16.msra.mxu0 %v6233_v30  ;;  %4671 = vmatprep.mubr.msk.f32.mxu0 %vm5559_vm4, %v5560_v42 }
0x2eaa   : > { %4872 = vmatprep.subr.bf16.mxu0 %v5558_v39 }
0x2ead   : > { %4874 = vmatpush3.bf16.msra.mxu0 %v6239_v40 }
0x2eae   : > { %4875 = vmatprep.subr.bf16.mxu0 %v5558_v39 }
0x2f7b   : > { %v3088_v46 = vpop.f32.mrb[12].mxu0 }
0x2f7c   : > { %v3092_v47 = vadd.f32 %v4064_v45, %v3088_v46  ;;  %v4654_v48 = vpop.f32.mrb[13].mxu0 }
0x2f7d   : > { %v4085_v48 = vld [vmem:[%s6257_s2 + $0x9] sm:$0x1] }
0x2f7e   : > { %5167 = vtanh.f32 %v3092_v47  ;;  %v4066_v53 = vmul.f32 -1.442695, %v3092_v47  ;;  %v2185_v47 = vld [vmem:[%s6386_s22] sm:$0xff] }
0x2f7f   : > { %4542 = vmatpush3.bf16.msra.mxu1 %v2185_v47 }
0x2f80   : > { %5169 = vpow2.f32 %v4066_v53  ;;  %4543 = vmatprep.subr.bf16.mxu1 %v5560_v42 }
0x2f88   : > { %v5168_v52 = vpop.eup %5167 }
0x2f89   : > { %3102 = vrot.lane.b32.xlu1 %v5168_v52, %s5561_s26 }
0x2f8a   : > { %v5170_v54 = vpop.eup %5169 }
0x2f8b   : > { %v3096_v4 = vadd.f32 1.0, %v5170_v54 }
0x2f8d   : > { %5171 = vrcp.f32 %v3096_v4  ;;  %v2186_v4 = vld [vmem:[%s6386_s22 + $0x8] sm:$0xff] }
0x2f8e   : > { %4544 = vmatpush3.bf16.msra.mxu1 %v2186_v4  ;;  %v3651_v4 = vld [vmem:[%s6571_s10 + $0x10] sm:$0xff] (%p2069_p5) }
0x2f8f   : > { %4560 = vmatprep.subr.bf16.mxu1 %v5560_v42 }
0x2f97   : > { %v5172_v55 = vpop.eup %5171 }
0x2f98   : > { %v3100_v58 = vmul.f32 %v5172_v55, %v2954_v29 }
0x2ffb   : > { %v3103_v56 = vpop.permute.xlu1 %3102 }
0x2ffc   : > { %v3105_v57 = vmul.f32 %v5172_v55, %v3103_v56  ;;  %v2181_v56 = vpack.c.bf16 %v6264_v62, %v6264_v62  ;;  %v4033_v62 = vld [vmem:[%s6386_s22 + $0x10] sm:$0xff] }
0x2ffe   : > { %3107 = vrot.lane.b32.xlu0 %v3105_v57, %s5562_s19  ;;  %v2493_v57 = vpack.c.bf16 %v6294_v36, %v6294_v36  ;;  %v2337_v36 = vpack.c.bf16 %v6279_v49, %v6279_v49  ;;  %v2805_v49 = vpack.c.bf16 %v6324_v50, %v6324_v50  ;;  %v4041_v50 = vld [vmem:[%s6386_s22 + $0x28] sm:$0xff] }
0x3070   : > { %v3108_v59 = vpop.permute.xlu0 %3107 }
0x3071   : > { %v3110_v60 = vadd.f32 %v3108_v59, %v3100_v58 }
0x3073   : > { %5173 = vtanh.f32 %v3110_v60 }
0x307d   : > { %v5174_v63 = vpop.eup %5173 }
0x307e   : > { %3113 = vrot.lane.b32.xlu1 %v5174_v63, %s5561_s26 }
0x30f0   : > { %v3114_v6 = vpop.permute.xlu1 %3113 }
0x30f1   : > { %v6354_v7 = vmul.f32 %v5172_v55, %v3114_v6 }
0x30f3   : > { %3174 = vrot.lane.b32.xlu0 %v6354_v7, %s5562_s19 }
0x3165   : > { %v3175_v8 = vpop.permute.xlu0 %3174 }
0x3166   : > { %4672 = vmatmul.mubr.msk.f32.vlgmr.msra.gmra.mrb[14].mxu0 %vm591_vm2, %v3175_v8 }
0x3167   : > { %4877 = vmatpush3.bf16.msra.mxu0 %v6233_v30  ;;  %4690 = vmatprep.mubr.msk.f32.mxu0 %vm5559_vm4, %v5560_v42 }
0x3168   : > { %4878 = vmatprep.subr.bf16.mxu0 %v5558_v39 }
0x316b   : > { %4880 = vmatpush3.bf16.msra.mxu0 %v6239_v40 }
0x316c   : > { %4881 = vmatprep.subr.bf16.mxu0 %v5558_v39 }
0x3239   : > { %v3244_v1 = vpop.f32.mrb[14].mxu0 }
0x323a   : > { %v3248_v2 = vadd.f32 %v4071_v0, %v3244_v1  ;;  %v4673_v3 = vpop.f32.mrb[15].mxu0  ;;  %v4034_v1 = vld [vmem:[%s6386_s22 + $0x18] sm:$0xff] }
0x323b   : > { %v3117_v3 = vpack.c.bf16 %v6354_v7, %v6354_v7 }
0x323c   : > { %5175 = vtanh.f32 %v3248_v2  ;;  %v4073_v9 = vmul.f32 -1.442695, %v3248_v2  ;;  %v2649_v2 = vpack.c.bf16 %v6309_v61, %v6309_v61 }
0x323e   : > { %5177 = vpow2.f32 %v4073_v9 }
0x3246   : > { %v5176_v5 = vpop.eup %5175 }
0x3247   : > { %3258 = vrot.lane.b32.xlu1 %v5176_v5, %s5561_s26 }
0x3248   : > { %v5178_v10 = vpop.eup %5177 }
0x3249   : > { %v3252_v11 = vadd.f32 1.0, %v5178_v10 }
0x324b   : > { %5179 = vrcp.f32 %v3252_v11  ;;  %v4040_v11 = vld [vmem:[%s6386_s22 + $0x20] sm:$0xff] }
0x3255   : > { %v5180_v12 = vpop.eup %5179 }
0x3256   : > { %v3256_v41 = vmul.f32 %v5180_v12, %v3110_v60 }
0x32b9   : > { %v3259_v13 = vpop.permute.xlu1 %3258 }
0x32ba   : > { %v3261_v14 = vmul.f32 %v5180_v12, %v3259_v13  ;;  %v4047_v13 = vld [vmem:[%s6386_s22 + $0x30] sm:$0xff] }
0x32bc   : > { %3263 = vrot.lane.b32.xlu0 %v3261_v14, %s5562_s19  ;;  %v2961_v14 = vpack.c.bf16 %v6339_v43, %v6339_v43  ;;  %v4054_v43 = vld [vmem:[%s6386_s22 + $0x40] sm:$0xff] }
0x332e   : > { %v3264_v51 = vpop.permute.xlu0 %3263 }
0x332f   : > { %v3266_v15 = vadd.f32 %v3264_v51, %v3256_v41  ;;  %v4048_v51 = vld [vmem:[%s6386_s22 + $0x38] sm:$0xff] }
0x3331   : > { %5181 = vtanh.f32 %v3266_v15 }
0x333b   : > { %v5182_v16 = vpop.eup %5181 }
0x333c   : > { %3269 = vrot.lane.b32.xlu1 %v5182_v16, %s5561_s26 }
0x33ae   : > { %v3270_v17 = vpop.permute.xlu1 %3269 }
0x33af   : > { %v6369_v18 = vmul.f32 %v5180_v12, %v3270_v17  ;;  %v4055_v17 = vld [vmem:[%s6386_s22 + $0x48] sm:$0xff] }
0x33b1   : > { %3330 = vrot.lane.b32.xlu0 %v6369_v18, %s5562_s19 }
0x3423   : > { %v3331_v19 = vpop.permute.xlu0 %3330 }
0x3424   : > { %4691 = vmatmul.mubr.msk.f32.vlgmr.msra.gmra.mrb[16].mxu0 %vm591_vm2, %v3331_v19 }
0x3425   : > { %4883 = vmatpush3.bf16.msra.mxu0 %v6233_v30  ;;  %4709 = vmatprep.mubr.msk.f32.mxu0 %vm5559_vm4, %v5560_v42 }
0x3426   : > { %4884 = vmatprep.subr.bf16.mxu0 %v5558_v39 }
0x3429   : > { %4886 = vmatpush3.bf16.msra.mxu0 %v6239_v40 }
0x34f7   : > { %v3400_v21 = vpop.f32.mrb[16].mxu0 }
0x34f8   : > { %v3404_v22 = vadd.f32 %v4078_v20, %v3400_v21  ;;  %v4692_v23 = vpop.f32.mrb[17].mxu0  ;;  %v4062_v20 = vld [vmem:[%s6386_s22 + $0x58] sm:$0xff] }
0x34fa   : > { %5183 = vtanh.f32 %v3404_v22  ;;  %v4080_v25 = vmul.f32 -1.442695, %v3404_v22 }
0x34fc   : > { %5185 = vpow2.f32 %v4080_v25 }
0x3504   : > { %v5184_v24 = vpop.eup %5183 }
0x3505   : > { %3414 = vrot.lane.b32.xlu1 %v5184_v24, %s5561_s26  ;;  %v4068_v24 = vld [vmem:[%s6386_s22 + $0x60] sm:$0xff] }
0x3506   : > { %v5186_v26 = vpop.eup %5185 }
0x3507   : > { %v3408_v27 = vadd.f32 1.0, %v5186_v26  ;;  %v4069_v26 = vld [vmem:[%s6386_s22 + $0x68] sm:$0xff] }
0x3509   : > { %5187 = vrcp.f32 %v3408_v27  ;;  %v4075_v27 = vld [vmem:[%s6386_s22 + $0x70] sm:$0xff] }
0x3513   : > { %v5188_v30 = vpop.eup %5187 }
0x3514   : > { %v3412_v39 = vmul.f32 %v5188_v30, %v3266_v15  ;;  %v3273_v15 = vpack.c.bf16 %v6369_v18, %v6369_v18  ;;  %v4061_v18 = vld [vmem:[%s6386_s22 + $0x50] sm:$0xff] }
0x3577   : > { %v3415_v28 = vpop.permute.xlu1 %3414 }
0x3578   : > { %v3417_v29 = vmul.f32 %v5188_v30, %v3415_v28  ;;  %v4076_v28 = vld [vmem:[%s6386_s22 + $0x78] sm:$0xff] }
0x357a   : > { %3419 = vrot.lane.b32.xlu0 %v3417_v29, %s5562_s19  ;;  %v4082_v29 = vld [vmem:[%s6386_s22 + $0x80] sm:$0xff] }
0x35ec   : > { %v3420_v40 = vpop.permute.xlu0 %3419 }
0x35ed   : > { %v3422_v31 = vadd.f32 %v3420_v40, %v3412_v39  ;;  %v4083_v40 = vld [vmem:[%s6386_s22 + $0x88] sm:$0xff] }
0x35ef   : > { %5189 = vtanh.f32 %v3422_v31 }
0x35f9   : > { %v5190_v37 = vpop.eup %5189 }
0x35fa   : > { %3425 = vrot.lane.b32.xlu1 %v5190_v37, %s5561_s26 }
0x366c   : > { %v3426_v44 = vpop.permute.xlu1 %3425 }
0x366d   : > { %v3428_v45 = vmul.f32 %v5188_v30, %v3426_v44  ;;  %v4090_v44 = vld [vmem:[%s6386_s22 + $0x98] sm:$0xff] }
0x366f   : > { %3486 = vrot.lane.b32.xlu0 %v3428_v45, %s5562_s19  ;;  %v3429_v5 = vpack.c.bf16 %v3428_v45, %v3428_v45 }
0x36e1   : > { %v3487_v46 = vpop.permute.xlu0 %3486 }
0x36e2   : > { %4710 = vmatmul.mubr.msk.f32.vlgmr.msra.gmra.mrb[18].mxu0 %vm591_vm2, %v3487_v46 }
0x36e3   :  { %4752 = vmatprep.mubr.msk.f32.mxu0 (%p2069_p5), %vm5565_vm5, %v5566_v32 }
0x37b5   : > { %v3556_v52 = vpop.f32.mrb[18].mxu0 }
0x37b6   : > { %v3560_v53 = vadd.f32 %v4085_v48, %v3556_v52  ;;  %v4711_v54 = vpop.f32.mrb[19].mxu0 }
0x37b7   :  { %v3650_v54 = vld [vmem:[%s6571_s10 + $0x8] sm:$0xff] (%p2069_p5) }
0x37b8   : > { %5191 = vtanh.f32 %v3560_v53  ;;  %v4087_v58 = vmul.f32 -1.442695, %v3560_v53 }
0x37ba   : > { %5193 = vpow2.f32 %v4087_v58  ;;  %v3655_v58 = vld [vmem:[%s6571_s10 + $0x30] sm:$0xff] (%p2069_p5) }
0x37c2   : > { %v5192_v55 = vpop.eup %5191 }
0x37c3   : > { %3570 = vrot.lane.b32.xlu1 %v5192_v55, %s5561_s26  ;;  %v5564_v55 = vmov (%p2069_p5), 0.0|0.0  }
0x37c4   : > { %v5194_v59 = vpop.eup %5193  ;;  %4887 = vmatprep.subr.bf16.mxu0 (%p2069_p5), %v5564_v55 }
0x37c5   : > { %v3564_v60 = vadd.f32 1.0, %v5194_v59  ;;  %v3656_v59 = vld [vmem:[%s6571_s10 + $0x38] sm:$0xff] (%p2069_p5) }
0x37c7   : > { %2188 = vrot.lane.b32.xlu1 %v2181_v56, %s5562_s19  ;;  %5195 = vrcp.f32 %v3564_v60  ;;  %v4897_v60 = vpack.c.bf16 (%p2069_p5), %v3656_v59, %v3655_v58 }
0x37cb   : > { %2500 = vrot.lane.b32.xlu1 %v2493_v57, %s5562_s19  ;;  %v3652_v57 = vld [vmem:[%s6571_s10 + $0x18] sm:$0xff] (%p2069_p5) }
0x37cc   :  { %v4891_v33 = vpack.c.bf16 (%p2069_p5), %v3652_v57, %v3651_v4 }
0x37d1   : > { %v6400_v63 = vpop.eup %5195 }
0x37d2   : > { %v3568_v61 = vmul.f32 %v6400_v63, %v3422_v31  ;;  %v4089_v31 = vld [vmem:[%s6386_s22 + $0x90] sm:$0xff] }
0x3835   : > { %v3571_v6 = vpop.permute.xlu1 %3570 }
0x3836   : > { %v3573_v8 = vmul.f32 %v6400_v63, %v3571_v6  ;;  %v3658_v6 = vld [vmem:[%s6571_s10 + $0x48] sm:$0xff] (%p2069_p5) }
0x3838   : > { %3575 = vrot.lane.b32.xlu0 %v3573_v8, %s5562_s19 }
0x3839   : > { %v2189_v0 = vpop.permute.xlu1 %2188 }
0x383a   : > { %4546 = vmatmul.mubr.msk.bf16.vlgmr.msra.gmra.mrb[0].mxu1 %vm591_vm2, %v2189_v0  ;;  %v3660_v0 = vld [vmem:[%s6571_s10 + $0x58] sm:$0xff] (%p2069_p5) }
0x383b   : > { %4561 = vmatpush3.bf16.msra.mxu1 %v4033_v62  ;;  %4564 = vmatprep.mubr.msk.bf16.mxu1 %vm5559_vm4, %v5560_v42  ;;  %v3659_v62 = vld [vmem:[%s6571_s10 + $0x50] sm:$0xff] (%p2069_p5) }
0x383c   : > { %2344 = vrot.lane.b32.xlu0 %v2337_v36, %s5562_s19  ;;  %4562 = vmatprep.subr.bf16.mxu1 %v5560_v42 }
0x383d   : > { %v2501_v41 = vpop.permute.xlu1 %2500 }
0x383f   : > { %4563 = vmatpush3.bf16.msra.mxu1 %v4034_v1  ;;  %v3661_v1 = vld [vmem:[%s6571_s10 + $0x60] sm:$0xff] (%p2069_p5) }
0x3840   : > { %2656 = vrot.lane.b32.xlu0 %v2649_v2, %s5562_s19  ;;  %4579 = vmatprep.subr.bf16.mxu1 %v5560_v42  ;;  %v3662_v2 = vld [vmem:[%s6571_s10 + $0x68] sm:$0xff] (%p2069_p5) }
0x3844   : > { %2812 = vrot.lane.b32.xlu0 %v2805_v49, %s5562_s19  ;;  %v4906_v49 = vpack.c.bf16 (%p2069_p5), %v3662_v2, %v3661_v1 }
0x3848   : > { %3124 = vrot.lane.b32.xlu0 %v3117_v3, %s5562_s19  ;;  %v3646_v3 = vld [vmem:[#allocation20] sm:$0x1] (%p2069_p5) }
0x384c   : > { %3436 = vrot.lane.b32.xlu0 %v3429_v5, %s5562_s19  ;;  %v3663_v5 = vld [vmem:[%s6571_s10 + $0x70] sm:$0xff] (%p2069_p5) }
0x38aa   : > { %v3576_v9 = vpop.permute.xlu0 %3575 }
0x38ab   : > { %v3578_v10 = vadd.f32 %v3576_v9, %v3568_v61  ;;  %v3664_v61 = vld [vmem:[%s6571_s10 + $0x78] sm:$0xff] (%p2069_p5) }
0x38ad   : > { %5197 = vtanh.f32 %v3578_v10 }
0x38ae   : > { %v2345_v12 = vpop.permute.xlu0 %2344 }
0x38af   : > { %4565 = vmatmul.mubr.msk.bf16.vlgmr.msra.gmra.mrb[0].mxu1 %vm591_vm2, %v2345_v12  ;;  %v3665_v12 = vld [vmem:[#allocation21] sm:$0x1] (%p2069_p5) }
0x38b0   : > { %4580 = vmatpush3.bf16.msra.mxu1 %v4040_v11  ;;  %4583 = vmatprep.mubr.msk.bf16.mxu1 %vm5559_vm4, %v5560_v42 }
0x38b1   : > { %4581 = vmatprep.subr.bf16.mxu1 %v5560_v42 }
0x38b2   : > { %v2657_v16 = vpop.permute.xlu0 %2656 }
0x38b4   : > { %4582 = vmatpush3.bf16.msra.mxu1 %v4041_v50 }
0x38b5   : > { %4598 = vmatprep.subr.bf16.mxu1 %v5560_v42 }
0x38b6   : > { %v2813_v19 = vpop.permute.xlu0 %2812 }
0x38b7   : > { %v5198_v7 = vpop.eup %5197 }
0x38b8   : > { %3581 = vrot.lane.b32.xlu1 %v5198_v7, %s5561_s26 }
0x38ba   : > { %v3125_v30 = vpop.permute.xlu0 %3124 }
0x38bb   : > { %4584 = vmatmul.mubr.msk.bf16.vlgmr.msra.gmra.mrb[0].mxu1 %vm591_vm2, %v2501_v41 }
0x38bc   : > { %2968 = vrot.lane.b32.xlu1 %v2961_v14, %s5562_s19  ;;  %4599 = vmatpush3.bf16.msra.mxu1 %v4047_v13 }
0x38bd   : > { %4600 = vmatprep.subr.bf16.mxu1 %v5560_v42  ;;  %4602 = vmatprep.mubr.msk.bf16.mxu1 %vm5559_vm4, %v5560_v42 }
0x38be   : > { %v3437_v37 = vpop.permute.xlu0 %3436 }
0x38c0   : > { %3280 = vrot.lane.b32.xlu1 %v3273_v15, %s5562_s19  ;;  %4601 = vmatpush3.bf16.msra.mxu1 %v4048_v51 }
0x38c1   : > { %4617 = vmatprep.subr.bf16.mxu1 %v5560_v42 }
0x38c7   : > { %4603 = vmatmul.mubr.msk.bf16.vlgmr.msra.gmra.mrb[0].mxu1 %vm591_vm2, %v2657_v16 }
0x38c8   : > { %4618 = vmatpush3.bf16.msra.mxu1 %v4054_v43  ;;  %4621 = vmatprep.mubr.msk.bf16.mxu1 %vm5559_vm4, %v5560_v42 }
0x38c9   : > { %4619 = vmatprep.subr.bf16.mxu1 %v5560_v42 }
0x38cc   : > { %4620 = vmatpush3.bf16.msra.mxu1 %v4055_v17 }
0x38cd   : > { %4636 = vmatprep.subr.bf16.mxu1 %v5560_v42 }
0x38d3   : > { %4622 = vmatmul.mubr.msk.bf16.vlgmr.msra.gmra.mrb[0].mxu1 %vm591_vm2, %v2813_v19 }
0x38d4   : > { %4637 = vmatpush3.bf16.msra.mxu1 %v4061_v18  ;;  %4640 = vmatprep.mubr.msk.bf16.mxu1 %vm5559_vm4, %v5560_v42 }
0x38d5   : > { %4638 = vmatprep.subr.bf16.mxu1 %v5560_v42 }
0x38d8   : > { %4639 = vmatpush3.bf16.msra.mxu1 %v4062_v20 }
0x38d9   : > { %4655 = vmatprep.subr.bf16.mxu1 %v5560_v42 }
0x392a   : > { %v3582_v21 = vpop.permute.xlu1 %3581 }
0x392b   : > { %v3584_v22 = vmul.f32 %v6400_v63, %v3582_v21  ;;  %v3657_v63 = vld [vmem:[%s6571_s10 + $0x40] sm:$0xff] (%p2069_p5) }
0x392c   :  { %v4900_v8 = vpack.c.bf16 (%p2069_p5), %v3658_v6, %v3657_v63 }
0x392d   : > { %v3585_v23 = vpack.c.bf16 %v3584_v22, %v3584_v22  ;;  %3639 = vrot.lane.b32.xlu0 %v3584_v22, %s5562_s19 }
0x392e   : > { %v2969_v25 = vpop.permute.xlu1 %2968 }
0x392f   : > { %3592 = vrot.lane.b32.xlu1 %v3585_v23, %s5562_s19  ;;  %4641 = vmatmul.mubr.msk.bf16.vlgmr.msra.gmra.mrb[0].mxu1 %vm591_vm2, %v2969_v25 }
0x3930   : > { %4656 = vmatpush3.bf16.msra.mxu1 %v4068_v24  ;;  %4659 = vmatprep.mubr.msk.bf16.mxu1 %vm5559_vm4, %v5560_v42 }
0x3931   : > { %4657 = vmatprep.subr.bf16.mxu1 %v5560_v42 }
0x3932   : > { %v3281_v39 = vpop.permute.xlu1 %3280 }
0x3933   : > { %3643 = vrot.lane.b32.xlu1 %v3578_v10, %s5563_s23  ;;  %v4909_v10 = vpack.c.bf16 (%p2069_p5), %v3664_v61, %v3663_v5 }
0x3934   : > { %4658 = vmatpush3.bf16.msra.mxu1 %v4069_v26 }
0x3935   : > { %4674 = vmatprep.subr.bf16.mxu1 %v5560_v42 }
0x393b   : > { %4660 = vmatmul.mubr.msk.bf16.vlgmr.msra.gmra.mrb[0].mxu1 %vm591_vm2, %v3125_v30 }
0x393c   : > { %4675 = vmatpush3.bf16.msra.mxu1 %v4075_v27  ;;  %4678 = vmatprep.mubr.msk.bf16.mxu1 %vm5559_vm4, %v5560_v42 }
0x393d   : > { %4676 = vmatprep.subr.bf16.mxu1 %v5560_v42 }
0x3940   : > { %4677 = vmatpush3.bf16.msra.mxu1 %v4076_v28 }
0x3941   : > { %4693 = vmatprep.subr.bf16.mxu1 %v5560_v42 }
0x3947   : > { %4679 = vmatmul.mubr.msk.bf16.vlgmr.msra.gmra.mrb[0].mxu1 %vm591_vm2, %v3281_v39 }
0x3948   : > { %4694 = vmatpush3.bf16.msra.mxu1 %v4082_v29  ;;  %4697 = vmatprep.mubr.msk.bf16.mxu1 %vm5559_vm4, %v5560_v42 }
0x3949   : > { %4695 = vmatprep.subr.bf16.mxu1 %v5560_v42 }
0x394c   : > { %4696 = vmatpush3.bf16.msra.mxu1 %v4083_v40 }
0x394d   : > { %4712 = vmatprep.subr.bf16.mxu1 %v5560_v42 }
0x3953   : > { %4698 = vmatmul.mubr.msk.bf16.vlgmr.msra.gmra.mrb[0].mxu1 %vm591_vm2, %v3437_v37 }
0x3954   : > { %4713 = vmatpush3.bf16.msra.mxu1 %v4089_v31  ;;  %4716 = vmatprep.mubr.msk.bf16.mxu1 %vm5559_vm4, %v5560_v42 }
0x3955   : > { %4714 = vmatprep.subr.bf16.mxu1 %v5560_v42  ;;  %v3649_v42 = vld [vmem:[%s6571_s10] sm:$0xff] (%p2069_p5)  ;;  %s5445_s10 = scalar_lea.vmem (%p2069_p5), %s3751_s7, 16 }
0x3956   :  { %v4888_v56 = vpack.c.bf16 (%p2069_p5), %v3650_v54, %v3649_v42  ;;  %p5446_p6 = scmp.ne.s32.totalorder (%p2069_p5), %s3751_s7, %s5445_s10  ;;  %p5451_p8 = scmp.lt.s32.totalorder (%p2069_p5), %s5449_s17, %s5445_s10 }
0x3958   : > { %4715 = vmatpush3.bf16.msra.mxu1 %v4090_v44  ;;  %4889 = vmatpush3.bf16.msra.mxu0 (%p2069_p5), %v4888_v56  ;;  %p5452_p9 = por (%p2069_p5), %p5451_p8, %p5450_p7 }
0x3959   :  { %4890 = vmatprep.subr.bf16.mxu0 (%p2069_p5), %v5564_v55 }
0x395a   :  { %p5453_p10 = pnand (%p2069_p5), %p5452_p9, %p5446_p6 }
0x395c   :  { %4892 = vmatpush3.bf16.msra.mxu0 (%p2069_p5), %v4891_v33 }
0x395d   :  { %4893 = vmatprep.subr.bf16.mxu0 (%p2069_p5), %v5564_v55 }
0x399f   : > { %v3640_v36 = vpop.permute.xlu0 %3639  }
0x39a0   :  { %v4903_v36 = vpack.c.bf16 (%p2069_p5), %v3660_v0, %v3659_v62 }
0x39a1   : > { %v3593_v45 = vpop.permute.xlu1 %3592 }
0x39a2   : > { %4717 = vmatmul.mubr.msk.bf16.vlgmr.msra.gmra.mrb[0].mxu1 %vm591_vm2, %v3593_v45 }
0x39a5   : > { %v3644_v37 = vpop.permute.xlu1 %3643  }
0x3a72   :  { %2071 = sbr.rel (!%p2069_p5) target bundleno = 7723 (0x1e2b), region = 177 }
0x3a75   : > { %v3631_v46 = vpop.f32.mrb[0].mxu1 }
0x3a76   : > { %v4917_v47 = vadd.f32 %v5525_v38, %v3631_v46   ;;  %v4718_v48 = vpop.f32.mrb[1].mxu1 }
0x3a77   : > { %v3634_v52 = vpop.f32.mrb[2].mxu1 }
0x3a78   : > { %v4719_v53 = vpop.f32.mrb[3].mxu1  ;;  %v6575_v38 = vmov %v4917_v47  ;;  %v3647_v9 = vadd.f32 (%p2069_p5), %v4917_v47, %v3646_v3 }
0x3a79   :  { %v4894_v38 = vpack.c.bf16 %v3654_v35, %v3653_v34 }
0x3a7a   :  { %v3648_v11 = vmax.f32 %v3647_v9, 0.0 }
0x3a7b   :  { %4895 = vmatpush3.bf16.msra.mxu0 %v4894_v38 }
0x3a7c   :  { %4896 = vmatprep.subr.bf16.mxu0 %v5564_v55 }
0x3a7f   :  { %4898 = vmatpush3.bf16.msra.mxu0 %v4897_v60 }
0x3a80   :  { %4899 = vmatprep.subr.bf16.mxu0 %v5564_v55 }
0x3a83   :  { %4901 = vmatpush3.bf16.msra.mxu0 %v4900_v8 }
0x3a84   :  { %4902 = vmatprep.subr.bf16.mxu0 %v5564_v55 }
0x3a87   :  { %4904 = vmatpush3.bf16.msra.mxu0 %v4903_v36 }
0x3a88   :  { %4905 = vmatprep.subr.bf16.mxu0 %v5564_v55 }
0x3a8b   :  { %4907 = vmatpush3.bf16.msra.mxu0 %v4906_v49 }
0x3a8c   :  { %4908 = vmatprep.subr.bf16.mxu0 %v5564_v55 }
0x3a8f   :  { %4910 = vmatpush3.bf16.msra.mxu0 %v4909_v10 }
0x3a92   :  { %4753 = vmatmul.mubr.f32.vlgmr.msra.gmra.mrb[0].mxu0 %v3648_v11 }
0x3b65   :  { %v3732_v50 = vpop.f32.mrb[0].mxu0 }
0x3b66   :  { %v3733_v7 = vadd.f32 %v3732_v50, %v3665_v12  ;;  %v4754_v13 = vpop.f32.mrb[1].mxu0 }
0x3b68   :  { %v4092_v14 = vmul.f32 -1.442695, %v3733_v7 }
0x3b6a   :  { %5199 = vpow2.f32 %v4092_v14 }
0x3b74   :  { %v5200_v41 = vpop.eup %5199 }
0x3b75   :  { %v3739_v51 = vadd.f32 1.0, %v5200_v41 }
0x3b77   :  { %5201 = vrcp.f32 %v3739_v51 }
0x3b81   :  { %v5202_v15 = vpop.eup %5201 }
0x3b82   :  { %3743 = vst.msk [vmem:[#allocation23] sm:$0x1] %vm3742_vm6, %v5202_v15 }
0x3b83   :  { %5456 = shalt.err (!%p5453_p10)
}
0x3b84   :  { %s5457_s18 = scalar_lea.hbm %s6574_s13, 16 }
0x3b85   :  { %p5458_p11 = scmp.ne.s32.totalorder %s6574_s13, %s5457_s18  ;;  %p5461_p12 = scmp.lt.u32.totalorder %s5457_s18, %s6574_s13 }
0x3b87   :  { %p5463_p13 = pnand %p5461_p12, %p5458_p11 }
0x3b89   :  { %5466 = shalt.err (!%p5463_p13)
}
0x3b8a   :  { %3753 = dma.vmem_to_hbm [thread:$0]  %s3751_s7, 16, %s6574_s13, [#allocation8]  }
0x3b8b   :  { %5509 = dma.done.wait [#allocation8], 16  }
0x3b8c   :  { %5510 = vsyncadd [#allocation8], 4294967280 }
0x3b8d   :  { %3757 = vsyncpa [#allocation7], 1 }
0x3b8e   :  { %3758 = vsyncpa [#allocation10], 1 }
0x3b8f   :  { %3759 = vsyncpa [#allocation13], 1 }
0x3b90   :  { %3760 = vsyncpa [#allocation16], 1 }
0x3b91   :  { %3761 = vsyncpa [#allocation19], 1 }
0x3b92   :  { %3762 = vsyncpa [#allocation22], 1 }
0x3b93   :  { %3763 = vsyncpa [#allocation8], 1 }
0x3b94   :  { %3764 = vsyncmov [#allocation5] }
0x3b97   :  { %s3765_s1 = vpop.sfrf %3764 }
0x3b98   :  { %p4093_p0 = scmp.ne.s32.totalorder %s3765_s1, 0 }
0x3b9a   :  { %3769 = shalt.err (%p4093_p0)  }

</bundles_post_ra>
